<compile_context>
chip_gen: v5e
topology: v5e:2x2
jax: 0.10.0
libtpu: 0.0.40
codegen_flags: <defaults>
</compile_context>

<pallas_src>
from functools import partial

import jax
import jax.numpy as jnp
from jax.experimental import pallas as pl
from jax.experimental.pallas import tpu as pltpu

ACTNORM_SCALE = 1.0
ACTNORM_EPS = 1e-6


def _bcast_elem(v11, rows):
    """(1,1) value -> (rows,128) slab via lane-broadcast then sublane-broadcast."""
    return jnp.broadcast_to(jnp.broadcast_to(v11, (1, 128)), (rows, 128))


def _reduce_slab(slab, rows):
    """(rows,128) -> (1,1) sum: unrolled sublane adds + one lane reduction."""
    acc = slab[0:1, :]
    for r in range(1, rows):
        acc = acc + slab[r:r + 1, :]
    return jnp.sum(acc, axis=1, keepdims=True)


def _flow_block_kernel(x_ref, w_ref, z_ref, ld_out_ref,
                       act_ref, psum_ref, psq_ref, shift_ref,
                       wb_ref, bb_ref, ld_ref,
                       *, num_steps, num_tiles, tile_g, chunk, rows, hw, inv_m):
    """Fused FlowBlock kernel.

    grid = (num_steps + 1, num_tiles); phase 0 primes the resident VMEM
    activation scratch (and shifted per-channel statistics) from HBM, phase s
    (1..S) finalizes the ActNorm parameters of step s-1 (folded into the 1x1
    conv), applies it tile-by-tile while accumulating the statistics needed by
    step s, and the last phase writes the output tiles + logdet.
    """
    s = pl.program_id(0)          # phase: 0 = prime, 1..S = apply step s-1
    j = pl.program_id(1)          # group-tile index
    C = x_ref.shape[0]
    n_chunks = tile_g // chunk
    goff = pl.multiple_of(j * tile_g, tile_g)

    # ---- one-time init: zero accumulators + per-channel shift from x[.,0,0] ----
    @pl.when(jnp.logical_and(s == 0, j == 0))
    def _init():
        psum_ref[...] = jnp.zeros_like(psum_ref)
        psq_ref[...] = jnp.zeros_like(psq_ref)
        ld_ref[...] = jnp.zeros_like(ld_ref)
        for c in range(C):
            xc0 = x_ref[c]                                  # (tile_g, rows, 128)
            shift_ref[c] = _bcast_elem(xc0[0, 0:1, 0:1], rows)

    # ---- phase 0: copy HBM tile into resident scratch + shifted statistics ----
    @pl.when(s == 0)
    def _prime():
        for c in range(C):
            xc = x_ref[c]                                   # (tile_g, rows, 128)
            d = xc - shift_ref[c]
            psum_ref[c] += jnp.sum(d, axis=0)
            psq_ref[c] += jnp.sum(d * d, axis=0)
            act_ref[c, pl.ds(goff, tile_g)] = xc

    # ---- phases 1..S: finalize step (s-1), apply it, carry stats for step s ----
    @pl.when(s > 0)
    def _apply():
        step = s - 1

        @pl.when(j == 0)
        def _finalize():
            w = w_ref[step]                                 # (C, C)
            bp = [None] * C
            ld_add = None
            for k in range(C):
                s1 = _reduce_slab(psum_ref[k], rows)        # (1,1) sum(x - r)
                s2 = _reduce_slab(psq_ref[k], rows)         # (1,1) sum((x - r)^2)
                r = shift_ref[k][0:1, 0:1]                  # (1,1) shift value
                m1 = s1 * inv_m                             # E[x - r]
                mean = r + m1
                var = jnp.maximum(s2 * inv_m - m1 * m1, 0.0)
                scale = ACTNORM_SCALE / (jnp.sqrt(var) + ACTNORM_EPS)  # exp(logs)
                logs = jnp.log(scale)
                ld_add = logs if ld_add is None else ld_add + logs
                nmean = -mean
                for c in range(C):
                    wp = w[c:c + 1, k:k + 1] * scale        # folded weight (1,1)
                    wb_ref[c, k] = _bcast_elem(wp, rows)
                    contrib = wp * nmean
                    bp[c] = contrib if bp[c] is None else bp[c] + contrib
            for c in range(C):
                bb_ref[c] = _bcast_elem(bp[c], rows)
            ld_ref[...] += ld_add * hw
            psum_ref[...] = jnp.zeros_like(psum_ref)
            psq_ref[...] = jnp.zeros_like(psq_ref)

        # Hoisted parameter slabs (reused by every chunk of this tile).
        wbv = [[wb_ref[c, k] for k in range(C)] for c in range(C)]
        bbv = [bb_ref[c] for c in range(C)]

        for u in range(n_chunks):
            lo = u * chunk
            go = goff + lo
            xs = [act_ref[k, pl.ds(go, chunk)] for k in range(C)]
            zs = []
            for c in range(C):
                acc = xs[0] * wbv[c][0] + bbv[c]
                for k in range(1, C):
                    acc = acc + xs[k] * wbv[c][k]
                zs.append(acc)

            if u == 0:
                @pl.when(jnp.logical_and(j == 0, s < num_steps))
                def _set_shift(zs=zs):
                    for c in range(C):
                        shift_ref[c] = _bcast_elem(zs[c][0, 0:1, 0:1], rows)

            @pl.when(s < num_steps)
            def _carry(zs=zs, go=go):
                for c in range(C):
                    d = zs[c] - shift_ref[c]
                    psum_ref[c] += jnp.sum(d, axis=0)
                    psq_ref[c] += jnp.sum(d * d, axis=0)
                    act_ref[c, pl.ds(go, chunk)] = zs[c]

            @pl.when(s == num_steps)
            def _emit(zs=zs, lo=lo):
                for c in range(C):
                    z_ref[c, pl.ds(lo, chunk)] = zs[c]

    # ---- emit the scalar logdet exactly once at the end of the grid ----
    @pl.when(jnp.logical_and(s == num_steps, j == num_tiles - 1))
    def _emit_logdet():
        ld_out_ref[...] = ld_ref[...]


def _pick_rows(r):
    for p in (8, 4, 2, 1):
        if r % p == 0:
            return p
    return 1


def _pick_tile_g(g):
    for t in (64, 32, 16, 8, 4, 2, 1):
        if g % t == 0:
            return t
    return 1


def flow_block_forward(x_nchw, weights, *, tile_g=None):
    """FlowBlock forward: sequentially apply len(weights) FlowSteps.

    x_nchw: (N, C, H, W) float32; weights: list of (C, C) 1x1-conv weights.
    Returns (z_nchw, logdet).
    """
    N, C, H, W = x_nchw.shape
    M = N * H * W
    S = len(weights)
    assert S >= 1
    # TODO(synk): pad-and-mask path for M not a multiple of 128.
    assert M % 128 == 0, "N*H*W must be a multiple of 128"
    hw = float(H * W)

    R = M // 128
    P = _pick_rows(R)          # rows per vreg group (<= 8)
    G = R // P                 # number of (P,128) groups per channel
    if tile_g is None:
        tile_g = _pick_tile_g(G)
    assert G % tile_g == 0
    num_tiles = G // tile_g
    chunk = min(tile_g, 8)
    while tile_g % chunk != 0:
        chunk -= 1

    # NCHW -> (C, M) -> (C, G, P, 128): pixels fill whole (sublane, lane) tiles.
    x2d = jnp.transpose(x_nchw.astype(jnp.float32), (1, 0, 2, 3)).reshape(C, M)
    x4 = x2d.reshape(C, G, P, 128)
    w_stack = jnp.stack([jnp.asarray(w, jnp.float32) for w in weights], axis=0)

    kernel = partial(_flow_block_kernel, num_steps=S, num_tiles=num_tiles,
                     tile_g=tile_g, chunk=chunk, rows=P, hw=hw, inv_m=1.0 / M)

    # VMEM budget (P pads up to 8 sublanes per group).
    f32 = 4
    p_pad = 8
    resident = f32 * C * G * p_pad * 128                 # resident activations
    block_bytes = f32 * C * tile_g * p_pad * 128         # one x/z block
    param_bytes = f32 * (C * C + 5 * C) * p_pad * 128 + f32 * S * C * C + 8192
    vmem_need = resident + 4 * block_bytes + param_bytes + (2 << 20)
    try:
        vmem_cap = int(pltpu.get_tpu_info().vmem_capacity_bytes)
    except Exception:
        vmem_cap = 64 * 1024 * 1024
    if vmem_need > int(0.9 * vmem_cap):
        # TODO(synk): streaming two-pass-per-step (or bf16 residency) fallback
        # when the resident activations do not fit in VMEM.
        raise ValueError("activations too large for resident-VMEM FlowBlock kernel")
    vmem_limit = int(max(vmem_need, 16 * 1024 * 1024))

    z4, ld_act = pl.pallas_call(
        kernel,
        grid=(S + 1, num_tiles),
        in_specs=[
            # x is only consumed during the priming phase; afterwards the index
            # is pinned to the LAST fetched block so no HBM re-fetch happens.
            pl.BlockSpec((C, tile_g, P, 128),
                         lambda p, t: (0, jnp.where(p == 0, t, num_tiles - 1), 0, 0)),
            pl.BlockSpec((S, C, C), lambda p, t: (0, 0, 0)),
        ],
        out_specs=(
            # z blocks only advance (and are written back) during the last phase.
            pl.BlockSpec((C, tile_g, P, 128),
                         lambda p, t: (0, jnp.where(p == S, t, 0), 0, 0)),
            pl.BlockSpec((1, 1), lambda p, t: (0, 0)),
        ),
        out_shape=(
            jax.ShapeDtypeStruct((C, G, P, 128), jnp.float32),
            jax.ShapeDtypeStruct((1, 1), jnp.float32),
        ),
        scratch_shapes=[
            pltpu.VMEM((C, G, P, 128), jnp.float32),   # resident activations
            pltpu.VMEM((C, P, 128), jnp.float32),      # shifted sum accumulator
            pltpu.VMEM((C, P, 128), jnp.float32),      # shifted sum-sq accumulator
            pltpu.VMEM((C, P, 128), jnp.float32),      # per-channel shift slabs
            pltpu.VMEM((C, C, P, 128), jnp.float32),   # folded conv weights (pre-broadcast)
            pltpu.VMEM((C, P, 128), jnp.float32),      # folded bias (pre-broadcast)
            pltpu.VMEM((1, 1), jnp.float32),           # ActNorm logdet accumulator
        ],
        compiler_params=pltpu.CompilerParams(
            # Both axes are sequential: phases depend on each other and the tile
            # axis accumulates shared statistics (resident-in-VMEM fusion trades
            # megacore sharding for S x fewer HBM passes).
            dimension_semantics=("arbitrary", "arbitrary"),
            vmem_limit_bytes=vmem_limit,
        ),
    )(x4, w_stack)

    # TODO(synk): slogdet has no clean in-kernel Pallas lowering; it is
    # data-independent, so it is computed once in glue and added here.
    dlogdet_w = jnp.float32(0.0)
    for w in weights:
        dlogdet_w = dlogdet_w + jnp.linalg.slogdet(jnp.asarray(w, jnp.float32))[1]
    logdet = ld_act[0, 0] + dlogdet_w * hw

    z = jnp.transpose(z4.reshape(C, N, H, W), (1, 0, 2, 3))
    return z, logdet


def flow_block_reference(x_nchw, weights):
    """Pure-JAX reference (mirrors the PyTorch module math) for validation."""
    x = x_nchw.astype(jnp.float32)
    N, C, H, W = x.shape
    logdet = jnp.float32(0.0)
    for w in weights:
        w = jnp.asarray(w, jnp.float32)
        mean = jnp.mean(x, axis=(0, 2, 3), keepdims=True)
        bias = -mean
        var = jnp.mean((x + bias) ** 2, axis=(0, 2, 3), keepdims=True)
        logs = jnp.log(ACTNORM_SCALE / (jnp.sqrt(var) + ACTNORM_EPS))
        x = (x + bias) * jnp.exp(logs)
        logdet = logdet + jnp.sum(logs) * (H * W)
        x = jnp.einsum('oc,nchw->nohw', w, x,
                       precision=jax.lax.Precision.HIGHEST)
        logdet = logdet + jnp.linalg.slogdet(w)[1] * (H * W)
    return x, logdet


def init_flow_block_weights(key, in_channel, step_num):
    """Mirrors InvertibleConv1x1.__init__: W = Q from QR of a random normal."""
    ws = []
    for k in jax.random.split(key, step_num):
        w_rand = jax.random.normal(k, (in_channel, in_channel), jnp.float32)
        q, _ = jnp.linalg.qr(w_rand)
        ws.append(q)
    return ws


if __name__ == "__main__":
    key = jax.random.PRNGKey(0)
    kx1, kw1, kx2, kw2 = jax.random.split(key, 4)

    # Case 1: module-scale demo (batch=2, channels=4, spatial=16, 2 flow steps).
    N, C, H, W = 2, 4, 16, 16
    STEP_NUM = 2
    x = jax.random.normal(kx1, (N, C, H, W), jnp.float32)
    weights = init_flow_block_weights(kw1, C, STEP_NUM)

    z, logdet = flow_block_forward(x, weights)
    z = jax.block_until_ready(z)
    logdet = jax.block_until_ready(logdet)

    z_ref, logdet_ref = flow_block_reference(x, weights)
    assert z.shape == (N, C, H, W)
    assert bool(jnp.all(jnp.isfinite(z))) and bool(jnp.isfinite(logdet))
    assert bool(jnp.allclose(z, z_ref, atol=1e-3, rtol=1e-3))
    assert bool(jnp.allclose(logdet, logdet_ref, atol=1e-1, rtol=1e-3))

    # Case 2: larger spatial size, nonzero channel mean (exercises the shifted
    # statistics) and a forced small tile (exercises multi-tile / multi-chunk
    # accumulation against the resident scratch).
    N2, C2, H2, W2 = 2, 4, 64, 64
    STEP_NUM2 = 3
    x2 = jax.random.normal(kx2, (N2, C2, H2, W2), jnp.float32) * 0.5 + 3.0
    weights2 = init_flow_block_weights(kw2, C2, STEP_NUM2)

    z2, logdet2 = flow_block_forward(x2, weights2, tile_g=2)
    z2 = jax.block_until_ready(z2)
    logdet2 = jax.block_until_ready(logdet2)

    z2_ref, logdet2_ref = flow_block_reference(x2, weights2)
    assert bool(jnp.allclose(z2, z2_ref, atol=1e-3, rtol=1e-3))
    assert bool(jnp.allclose(logdet2, logdet2_ref, atol=1e-1, rtol=1e-3))

    print("KERNEL_OK")
</pallas_src>

<mosaic_0001>
module attributes {stable_mosaic.version = 11 : i64} {
  func.func @_flow_block_kernel(%arg0: i32, %arg1: i32, %arg2: memref<4x1x4x128xf32, #tpu.memory_space<vmem>>, %arg3: memref<2x4x4xf32, #tpu.memory_space<vmem>>, %arg4: memref<4x1x4x128xf32, #tpu.memory_space<vmem>>, %arg5: memref<1x1xf32, #tpu.memory_space<vmem>>, %arg6: memref<4x1x4x128xf32, #tpu.memory_space<vmem>>, %arg7: memref<4x4x128xf32, #tpu.memory_space<vmem>>, %arg8: memref<4x4x128xf32, #tpu.memory_space<vmem>>, %arg9: memref<4x4x128xf32, #tpu.memory_space<vmem>>, %arg10: memref<4x4x4x128xf32, #tpu.memory_space<vmem>>, %arg11: memref<4x4x128xf32, #tpu.memory_space<vmem>>, %arg12: memref<1x1xf32, #tpu.memory_space<vmem>>) attributes {dimension_semantics = [#tpu.dimension_semantics<arbitrary>, #tpu.dimension_semantics<arbitrary>], iteration_bounds = array<i64: 3, 1>, scalar_prefetch = 0 : i64, scratch_operands = 7 : i64, tpu.core_type = #tpu.core_type<tc>, window_params = [{transform_indices = @transform_0, window_bounds = array<i64: 4, 1, 4, 128>}, {pipeline_mode = #tpu.pipeline_mode<synchronous>, transform_indices = @transform_1, window_bounds = array<i64: 2, 4, 4>}, {transform_indices = @transform_2, window_bounds = array<i64: 4, 1, 4, 128>}, {pipeline_mode = #tpu.pipeline_mode<synchronous>, transform_indices = @transform_3, window_bounds = array<i64: 1, 1>}]} {
    %c1_i32 = arith.constant 1 : i32
    %0 = arith.muli %arg1, %c1_i32 : i32
    %1 = tpu.assume_multiple %0, 1 : i32
    %c0_i32 = arith.constant 0 : i32
    %2 = arith.cmpi eq, %arg0, %c0_i32 : i32
    %c0_i32_0 = arith.constant 0 : i32
    %3 = arith.cmpi eq, %arg1, %c0_i32_0 : i32
    %4 = arith.andi %2, %3 : i1
    %5 = arith.extui %4 : i1 to i32
    %c0_i32_1 = arith.constant 0 : i32
    %6 = arith.cmpi ne, %5, %c0_i32_1 : i32
    scf.if %6 {
      %cst = arith.constant 0.000000e+00 : f32
      %18 = vector.broadcast %cst : f32 to vector<4x4x128xf32>
      %c0 = arith.constant 0 : index
      %c0_8 = arith.constant 0 : index
      %c0_9 = arith.constant 0 : index
      %19 = vector.load %arg7[%c0, %c0_8, %c0_9] : memref<4x4x128xf32, #tpu.memory_space<vmem>>, vector<4x4x128xf32>
      tpu.vector_store %arg7[%c0, %c0_8, %c0_9], %18 {strides = array<i32>} : memref<4x4x128xf32, #tpu.memory_space<vmem>>, vector<4x4x128xf32>,
      %cst_10 = arith.constant 0.000000e+00 : f32
      %20 = vector.broadcast %cst_10 : f32 to vector<4x4x128xf32>
      %c0_11 = arith.constant 0 : index
      %c0_12 = arith.constant 0 : index
      %c0_13 = arith.constant 0 : index
      %21 = vector.load %arg8[%c0_11, %c0_12, %c0_13] : memref<4x4x128xf32, #tpu.memory_space<vmem>>, vector<4x4x128xf32>
      tpu.vector_store %arg8[%c0_11, %c0_12, %c0_13], %20 {strides = array<i32>} : memref<4x4x128xf32, #tpu.memory_space<vmem>>, vector<4x4x128xf32>,
      %cst_14 = arith.constant 0.000000e+00 : f32
      %22 = vector.broadcast %cst_14 : f32 to vector<1x1xf32>
      %c0_15 = arith.constant 0 : index
      %c0_16 = arith.constant 0 : index
      %23 = vector.load %arg12[%c0_15, %c0_16] : memref<1x1xf32, #tpu.memory_space<vmem>>, vector<1x1xf32>
      tpu.vector_store %arg12[%c0_15, %c0_16], %22 {strides = array<i32>} : memref<1x1xf32, #tpu.memory_space<vmem>>, vector<1x1xf32>,
      %c0_17 = arith.constant 0 : index
      %c0_18 = arith.constant 0 : index
      %c0_19 = arith.constant 0 : index
      %c0_20 = arith.constant 0 : index
      %24 = vector.load %arg2[%c0_17, %c0_18, %c0_19, %c0_20] : memref<4x1x4x128xf32, #tpu.memory_space<vmem>>, vector<1x1x4x128xf32>
      %25 = vector.shape_cast %24 : vector<1x1x4x128xf32> to vector<1x4x128xf32>
      %26 = vector.extract_strided_slice %25 {offsets = [0, 0, 0], sizes = [1, 1, 1], strides = [1, 1, 1]} : vector<1x4x128xf32> to vector<1x1x1xf32>
      %27 = vector.shape_cast %26 : vector<1x1x1xf32> to vector<1x1xf32>
      %28 = vector.shape_cast %27 : vector<1x1xf32> to vector<1x1xf32>
      %29 = vector.broadcast %28 : vector<1x1xf32> to vector<1x128xf32>
      %30 = vector.shape_cast %29 : vector<1x128xf32> to vector<1x128xf32>
      %31 = vector.broadcast %30 : vector<1x128xf32> to vector<4x128xf32>
      %c0_21 = arith.constant 0 : index
      %c0_22 = arith.constant 0 : index
      %c0_23 = arith.constant 0 : index
      %32 = vector.load %arg9[%c0_21, %c0_22, %c0_23] : memref<4x4x128xf32, #tpu.memory_space<vmem>>, vector<1x4x128xf32>
      %33 = vector.shape_cast %32 : vector<1x4x128xf32> to vector<4x128xf32>
      %34 = vector.shape_cast %31 : vector<4x128xf32> to vector<1x4x128xf32>
      tpu.vector_store %arg9[%c0_21, %c0_22, %c0_23], %34 {strides = array<i32>} : memref<4x4x128xf32, #tpu.memory_space<vmem>>, vector<1x4x128xf32>,
      %c1 = arith.constant 1 : index
      %c0_24 = arith.constant 0 : index
      %c0_25 = arith.constant 0 : index
      %c0_26 = arith.constant 0 : index
      %35 = vector.load %arg2[%c1, %c0_24, %c0_25, %c0_26] : memref<4x1x4x128xf32, #tpu.memory_space<vmem>>, vector<1x1x4x128xf32>
      %36 = vector.shape_cast %35 : vector<1x1x4x128xf32> to vector<1x4x128xf32>
      %37 = vector.extract_strided_slice %36 {offsets = [0, 0, 0], sizes = [1, 1, 1], strides = [1, 1, 1]} : vector<1x4x128xf32> to vector<1x1x1xf32>
      %38 = vector.shape_cast %37 : vector<1x1x1xf32> to vector<1x1xf32>
      %39 = vector.shape_cast %38 : vector<1x1xf32> to vector<1x1xf32>
      %40 = vector.broadcast %39 : vector<1x1xf32> to vector<1x128xf32>
      %41 = vector.shape_cast %40 : vector<1x128xf32> to vector<1x128xf32>
      %42 = vector.broadcast %41 : vector<1x128xf32> to vector<4x128xf32>
      %c1_27 = arith.constant 1 : index
      %c0_28 = arith.constant 0 : index
      %c0_29 = arith.constant 0 : index
      %43 = vector.load %arg9[%c1_27, %c0_28, %c0_29] : memref<4x4x128xf32, #tpu.memory_space<vmem>>, vector<1x4x128xf32>
      %44 = vector.shape_cast %43 : vector<1x4x128xf32> to vector<4x128xf32>
      %45 = vector.shape_cast %42 : vector<4x128xf32> to vector<1x4x128xf32>
      tpu.vector_store %arg9[%c1_27, %c0_28, %c0_29], %45 {strides = array<i32>} : memref<4x4x128xf32, #tpu.memory_space<vmem>>, vector<1x4x128xf32>,
      %c2 = arith.constant 2 : index
      %c0_30 = arith.constant 0 : index
      %c0_31 = arith.constant 0 : index
      %c0_32 = arith.constant 0 : index
      %46 = vector.load %arg2[%c2, %c0_30, %c0_31, %c0_32] : memref<4x1x4x128xf32, #tpu.memory_space<vmem>>, vector<1x1x4x128xf32>
      %47 = vector.shape_cast %46 : vector<1x1x4x128xf32> to vector<1x4x128xf32>
      %48 = vector.extract_strided_slice %47 {offsets = [0, 0, 0], sizes = [1, 1, 1], strides = [1, 1, 1]} : vector<1x4x128xf32> to vector<1x1x1xf32>
      %49 = vector.shape_cast %48 : vector<1x1x1xf32> to vector<1x1xf32>
      %50 = vector.shape_cast %49 : vector<1x1xf32> to vector<1x1xf32>
      %51 = vector.broadcast %50 : vector<1x1xf32> to vector<1x128xf32>
      %52 = vector.shape_cast %51 : vector<1x128xf32> to vector<1x128xf32>
      %53 = vector.broadcast %52 : vector<1x128xf32> to vector<4x128xf32>
      %c2_33 = arith.constant 2 : index
      %c0_34 = arith.constant 0 : index
      %c0_35 = arith.constant 0 : index
      %54 = vector.load %arg9[%c2_33, %c0_34, %c0_35] : memref<4x4x128xf32, #tpu.memory_space<vmem>>, vector<1x4x128xf32>
      %55 = vector.shape_cast %54 : vector<1x4x128xf32> to vector<4x128xf32>
      %56 = vector.shape_cast %53 : vector<4x128xf32> to vector<1x4x128xf32>
      tpu.vector_store %arg9[%c2_33, %c0_34, %c0_35], %56 {strides = array<i32>} : memref<4x4x128xf32, #tpu.memory_space<vmem>>, vector<1x4x128xf32>,
      %c3 = arith.constant 3 : index
      %c0_36 = arith.constant 0 : index
      %c0_37 = arith.constant 0 : index
      %c0_38 = arith.constant 0 : index
      %57 = vector.load %arg2[%c3, %c0_36, %c0_37, %c0_38] : memref<4x1x4x128xf32, #tpu.memory_space<vmem>>, vector<1x1x4x128xf32>
      %58 = vector.shape_cast %57 : vector<1x1x4x128xf32> to vector<1x4x128xf32>
      %59 = vector.extract_strided_slice %58 {offsets = [0, 0, 0], sizes = [1, 1, 1], strides = [1, 1, 1]} : vector<1x4x128xf32> to vector<1x1x1xf32>
      %60 = vector.shape_cast %59 : vector<1x1x1xf32> to vector<1x1xf32>
      %61 = vector.shape_cast %60 : vector<1x1xf32> to vector<1x1xf32>
      %62 = vector.broadcast %61 : vector<1x1xf32> to vector<1x128xf32>
      %63 = vector.shape_cast %62 : vector<1x128xf32> to vector<1x128xf32>
      %64 = vector.broadcast %63 : vector<1x128xf32> to vector<4x128xf32>
      %c3_39 = arith.constant 3 : index
      %c0_40 = arith.constant 0 : index
      %c0_41 = arith.constant 0 : index
      %65 = vector.load %arg9[%c3_39, %c0_40, %c0_41] : memref<4x4x128xf32, #tpu.memory_space<vmem>>, vector<1x4x128xf32>
      %66 = vector.shape_cast %65 : vector<1x4x128xf32> to vector<4x128xf32>
      %67 = vector.shape_cast %64 : vector<4x128xf32> to vector<1x4x128xf32>
      tpu.vector_store %arg9[%c3_39, %c0_40, %c0_41], %67 {strides = array<i32>} : memref<4x4x128xf32, #tpu.memory_space<vmem>>, vector<1x4x128xf32>,
    } else {
    }
    %c0_i32_2 = arith.constant 0 : i32
    %7 = arith.cmpi eq, %arg0, %c0_i32_2 : i32
    %8 = arith.extui %7 : i1 to i32
    %c0_i32_3 = arith.constant 0 : i32
    %9 = arith.cmpi ne, %8, %c0_i32_3 : i32
    scf.if %9 {
      %c0 = arith.constant 0 : index
      %c0_8 = arith.constant 0 : index
      %c0_9 = arith.constant 0 : index
      %c0_10 = arith.constant 0 : index
      %18 = vector.load %arg2[%c0, %c0_8, %c0_9, %c0_10] : memref<4x1x4x128xf32, #tpu.memory_space<vmem>>, vector<1x1x4x128xf32>
      %19 = vector.shape_cast %18 : vector<1x1x4x128xf32> to vector<1x4x128xf32>
      %c0_11 = arith.constant 0 : index
      %c0_12 = arith.constant 0 : index
      %c0_13 = arith.constant 0 : index
      %20 = vector.load %arg9[%c0_11, %c0_12, %c0_13] : memref<4x4x128xf32, #tpu.memory_space<vmem>>, vector<1x4x128xf32>
      %21 = vector.shape_cast %20 : vector<1x4x128xf32> to vector<4x128xf32>
      %22 = vector.shape_cast %21 : vector<4x128xf32> to vector<1x4x128xf32>
      %23 = arith.subf %19, %22 : vector<1x4x128xf32>
      %c0_14 = arith.constant 0 : index
      %c0_15 = arith.constant 0 : index
      %c0_16 = arith.constant 0 : index
      %24 = vector.load %arg7[%c0_14, %c0_15, %c0_16] : memref<4x4x128xf32, #tpu.memory_space<vmem>>, vector<1x4x128xf32>
      %25 = vector.shape_cast %24 : vector<1x4x128xf32> to vector<4x128xf32>
      %cst = arith.constant dense<0.000000e+00> : vector<4x128xf32>
      %26 = vector.multi_reduction <add>, %23, %cst [0] : vector<1x4x128xf32> to vector<4x128xf32>
      %27 = arith.addf %25, %26 : vector<4x128xf32>
      %c0_17 = arith.constant 0 : index
      %c0_18 = arith.constant 0 : index
      %c0_19 = arith.constant 0 : index
      %28 = vector.load %arg7[%c0_17, %c0_18, %c0_19] : memref<4x4x128xf32, #tpu.memory_space<vmem>>, vector<1x4x128xf32>
      %29 = vector.shape_cast %28 : vector<1x4x128xf32> to vector<4x128xf32>
      %30 = vector.shape_cast %27 : vector<4x128xf32> to vector<1x4x128xf32>
      tpu.vector_store %arg7[%c0_17, %c0_18, %c0_19], %30 {strides = array<i32>} : memref<4x4x128xf32, #tpu.memory_space<vmem>>, vector<1x4x128xf32>,
      %c0_20 = arith.constant 0 : index
      %c0_21 = arith.constant 0 : index
      %c0_22 = arith.constant 0 : index
      %31 = vector.load %arg8[%c0_20, %c0_21, %c0_22] : memref<4x4x128xf32, #tpu.memory_space<vmem>>, vector<1x4x128xf32>
      %32 = vector.shape_cast %31 : vector<1x4x128xf32> to vector<4x128xf32>
      %33 = arith.mulf %23, %23 : vector<1x4x128xf32>
      %cst_23 = arith.constant dense<0.000000e+00> : vector<4x128xf32>
      %34 = vector.multi_reduction <add>, %33, %cst_23 [0] : vector<1x4x128xf32> to vector<4x128xf32>
      %35 = arith.addf %32, %34 : vector<4x128xf32>
      %c0_24 = arith.constant 0 : index
      %c0_25 = arith.constant 0 : index
      %c0_26 = arith.constant 0 : index
      %36 = vector.load %arg8[%c0_24, %c0_25, %c0_26] : memref<4x4x128xf32, #tpu.memory_space<vmem>>, vector<1x4x128xf32>
      %37 = vector.shape_cast %36 : vector<1x4x128xf32> to vector<4x128xf32>
      %38 = vector.shape_cast %35 : vector<4x128xf32> to vector<1x4x128xf32>
      tpu.vector_store %arg8[%c0_24, %c0_25, %c0_26], %38 {strides = array<i32>} : memref<4x4x128xf32, #tpu.memory_space<vmem>>, vector<1x4x128xf32>,
      %c0_27 = arith.constant 0 : index
      %39 = arith.index_cast %1 : i32 to index
      %c0_28 = arith.constant 0 : index
      %c0_29 = arith.constant 0 : index
      %40 = vector.load %arg6[%c0_27, %39, %c0_28, %c0_29] : memref<4x1x4x128xf32, #tpu.memory_space<vmem>>, vector<1x1x4x128xf32>
      %41 = vector.shape_cast %40 : vector<1x1x4x128xf32> to vector<1x4x128xf32>
      %42 = vector.shape_cast %19 : vector<1x4x128xf32> to vector<1x1x4x128xf32>
      tpu.vector_store %arg6[%c0_27, %39, %c0_28, %c0_29], %42 {strides = array<i32>} : memref<4x1x4x128xf32, #tpu.memory_space<vmem>>, vector<1x1x4x128xf32>,
      %c1 = arith.constant 1 : index
      %c0_30 = arith.constant 0 : index
      %c0_31 = arith.constant 0 : index
      %c0_32 = arith.constant 0 : index
      %43 = vector.load %arg2[%c1, %c0_30, %c0_31, %c0_32] : memref<4x1x4x128xf32, #tpu.memory_space<vmem>>, vector<1x1x4x128xf32>
      %44 = vector.shape_cast %43 : vector<1x1x4x128xf32> to vector<1x4x128xf32>
      %c1_33 = arith.constant 1 : index
      %c0_34 = arith.constant 0 : index
      %c0_35 = arith.constant 0 : index
      %45 = vector.load %arg9[%c1_33, %c0_34, %c0_35] : memref<4x4x128xf32, #tpu.memory_space<vmem>>, vector<1x4x128xf32>
      %46 = vector.shape_cast %45 : vector<1x4x128xf32> to vector<4x128xf32>
      %47 = vector.shape_cast %46 : vector<4x128xf32> to vector<1x4x128xf32>
      %48 = arith.subf %44, %47 : vector<1x4x128xf32>
      %c1_36 = arith.constant 1 : index
      %c0_37 = arith.constant 0 : index
      %c0_38 = arith.constant 0 : index
      %49 = vector.load %arg7[%c1_36, %c0_37, %c0_38] : memref<4x4x128xf32, #tpu.memory_space<vmem>>, vector<1x4x128xf32>
      %50 = vector.shape_cast %49 : vector<1x4x128xf32> to vector<4x128xf32>
      %cst_39 = arith.constant dense<0.000000e+00> : vector<4x128xf32>
      %51 = vector.multi_reduction <add>, %48, %cst_39 [0] : vector<1x4x128xf32> to vector<4x128xf32>
      %52 = arith.addf %50, %51 : vector<4x128xf32>
      %c1_40 = arith.constant 1 : index
      %c0_41 = arith.constant 0 : index
      %c0_42 = arith.constant 0 : index
      %53 = vector.load %arg7[%c1_40, %c0_41, %c0_42] : memref<4x4x128xf32, #tpu.memory_space<vmem>>, vector<1x4x128xf32>
      %54 = vector.shape_cast %53 : vector<1x4x128xf32> to vector<4x128xf32>
      %55 = vector.shape_cast %52 : vector<4x128xf32> to vector<1x4x128xf32>
      tpu.vector_store %arg7[%c1_40, %c0_41, %c0_42], %55 {strides = array<i32>} : memref<4x4x128xf32, #tpu.memory_space<vmem>>, vector<1x4x128xf32>,
      %c1_43 = arith.constant 1 : index
      %c0_44 = arith.constant 0 : index
      %c0_45 = arith.constant 0 : index
      %56 = vector.load %arg8[%c1_43, %c0_44, %c0_45] : memref<4x4x128xf32, #tpu.memory_space<vmem>>, vector<1x4x128xf32>
      %57 = vector.shape_cast %56 : vector<1x4x128xf32> to vector<4x128xf32>
      %58 = arith.mulf %48, %48 : vector<1x4x128xf32>
      %cst_46 = arith.constant dense<0.000000e+00> : vector<4x128xf32>
      %59 = vector.multi_reduction <add>, %58, %cst_46 [0] : vector<1x4x128xf32> to vector<4x128xf32>
      %60 = arith.addf %57, %59 : vector<4x128xf32>
      %c1_47 = arith.constant 1 : index
      %c0_48 = arith.constant 0 : index
      %c0_49 = arith.constant 0 : index
      %61 = vector.load %arg8[%c1_47, %c0_48, %c0_49] : memref<4x4x128xf32, #tpu.memory_space<vmem>>, vector<1x4x128xf32>
      %62 = vector.shape_cast %61 : vector<1x4x128xf32> to vector<4x128xf32>
      %63 = vector.shape_cast %60 : vector<4x128xf32> to vector<1x4x128xf32>
      tpu.vector_store %arg8[%c1_47, %c0_48, %c0_49], %63 {strides = array<i32>} : memref<4x4x128xf32, #tpu.memory_space<vmem>>, vector<1x4x128xf32>,
      %c1_50 = arith.constant 1 : index
      %64 = arith.index_cast %1 : i32 to index
      %c0_51 = arith.constant 0 : index
      %c0_52 = arith.constant 0 : index
      %65 = vector.load %arg6[%c1_50, %64, %c0_51, %c0_52] : memref<4x1x4x128xf32, #tpu.memory_space<vmem>>, vector<1x1x4x128xf32>
      %66 = vector.shape_cast %65 : vector<1x1x4x128xf32> to vector<1x4x128xf32>
      %67 = vector.shape_cast %44 : vector<1x4x128xf32> to vector<1x1x4x128xf32>
      tpu.vector_store %arg6[%c1_50, %64, %c0_51, %c0_52], %67 {strides = array<i32>} : memref<4x1x4x128xf32, #tpu.memory_space<vmem>>, vector<1x1x4x128xf32>,
      %c2 = arith.constant 2 : index
      %c0_53 = arith.constant 0 : index
      %c0_54 = arith.constant 0 : index
      %c0_55 = arith.constant 0 : index
      %68 = vector.load %arg2[%c2, %c0_53, %c0_54, %c0_55] : memref<4x1x4x128xf32, #tpu.memory_space<vmem>>, vector<1x1x4x128xf32>
      %69 = vector.shape_cast %68 : vector<1x1x4x128xf32> to vector<1x4x128xf32>
      %c2_56 = arith.constant 2 : index
      %c0_57 = arith.constant 0 : index
      %c0_58 = arith.constant 0 : index
      %70 = vector.load %arg9[%c2_56, %c0_57, %c0_58] : memref<4x4x128xf32, #tpu.memory_space<vmem>>, vector<1x4x128xf32>
      %71 = vector.shape_cast %70 : vector<1x4x128xf32> to vector<4x128xf32>
      %72 = vector.shape_cast %71 : vector<4x128xf32> to vector<1x4x128xf32>
      %73 = arith.subf %69, %72 : vector<1x4x128xf32>
      %c2_59 = arith.constant 2 : index
      %c0_60 = arith.constant 0 : index
      %c0_61 = arith.constant 0 : index
      %74 = vector.load %arg7[%c2_59, %c0_60, %c0_61] : memref<4x4x128xf32, #tpu.memory_space<vmem>>, vector<1x4x128xf32>
      %75 = vector.shape_cast %74 : vector<1x4x128xf32> to vector<4x128xf32>
      %cst_62 = arith.constant dense<0.000000e+00> : vector<4x128xf32>
      %76 = vector.multi_reduction <add>, %73, %cst_62 [0] : vector<1x4x128xf32> to vector<4x128xf32>
      %77 = arith.addf %75, %76 : vector<4x128xf32>
      %c2_63 = arith.constant 2 : index
      %c0_64 = arith.constant 0 : index
      %c0_65 = arith.constant 0 : index
      %78 = vector.load %arg7[%c2_63, %c0_64, %c0_65] : memref<4x4x128xf32, #tpu.memory_space<vmem>>, vector<1x4x128xf32>
      %79 = vector.shape_cast %78 : vector<1x4x128xf32> to vector<4x128xf32>
      %80 = vector.shape_cast %77 : vector<4x128xf32> to vector<1x4x128xf32>
      tpu.vector_store %arg7[%c2_63, %c0_64, %c0_65], %80 {strides = array<i32>} : memref<4x4x128xf32, #tpu.memory_space<vmem>>, vector<1x4x128xf32>,
      %c2_66 = arith.constant 2 : index
      %c0_67 = arith.constant 0 : index
      %c0_68 = arith.constant 0 : index
      %81 = vector.load %arg8[%c2_66, %c0_67, %c0_68] : memref<4x4x128xf32, #tpu.memory_space<vmem>>, vector<1x4x128xf32>
      %82 = vector.shape_cast %81 : vector<1x4x128xf32> to vector<4x128xf32>
      %83 = arith.mulf %73, %73 : vector<1x4x128xf32>
      %cst_69 = arith.constant dense<0.000000e+00> : vector<4x128xf32>
      %84 = vector.multi_reduction <add>, %83, %cst_69 [0] : vector<1x4x128xf32> to vector<4x128xf32>
      %85 = arith.addf %82, %84 : vector<4x128xf32>
      %c2_70 = arith.constant 2 : index
      %c0_71 = arith.constant 0 : index
      %c0_72 = arith.constant 0 : index
      %86 = vector.load %arg8[%c2_70, %c0_71, %c0_72] : memref<4x4x128xf32, #tpu.memory_space<vmem>>, vector<1x4x128xf32>
      %87 = vector.shape_cast %86 : vector<1x4x128xf32> to vector<4x128xf32>
      %88 = vector.shape_cast %85 : vector<4x128xf32> to vector<1x4x128xf32>
      tpu.vector_store %arg8[%c2_70, %c0_71, %c0_72], %88 {strides = array<i32>} : memref<4x4x128xf32, #tpu.memory_space<vmem>>, vector<1x4x128xf32>,
      %c2_73 = arith.constant 2 : index
      %89 = arith.index_cast %1 : i32 to index
      %c0_74 = arith.constant 0 : index
      %c0_75 = arith.constant 0 : index
      %90 = vector.load %arg6[%c2_73, %89, %c0_74, %c0_75] : memref<4x1x4x128xf32, #tpu.memory_space<vmem>>, vector<1x1x4x128xf32>
      %91 = vector.shape_cast %90 : vector<1x1x4x128xf32> to vector<1x4x128xf32>
      %92 = vector.shape_cast %69 : vector<1x4x128xf32> to vector<1x1x4x128xf32>
      tpu.vector_store %arg6[%c2_73, %89, %c0_74, %c0_75], %92 {strides = array<i32>} : memref<4x1x4x128xf32, #tpu.memory_space<vmem>>, vector<1x1x4x128xf32>,
      %c3 = arith.constant 3 : index
      %c0_76 = arith.constant 0 : index
      %c0_77 = arith.constant 0 : index
      %c0_78 = arith.constant 0 : index
      %93 = vector.load %arg2[%c3, %c0_76, %c0_77, %c0_78] : memref<4x1x4x128xf32, #tpu.memory_space<vmem>>, vector<1x1x4x128xf32>
      %94 = vector.shape_cast %93 : vector<1x1x4x128xf32> to vector<1x4x128xf32>
      %c3_79 = arith.constant 3 : index
      %c0_80 = arith.constant 0 : index
      %c0_81 = arith.constant 0 : index
      %95 = vector.load %arg9[%c3_79, %c0_80, %c0_81] : memref<4x4x128xf32, #tpu.memory_space<vmem>>, vector<1x4x128xf32>
      %96 = vector.shape_cast %95 : vector<1x4x128xf32> to vector<4x128xf32>
      %97 = vector.shape_cast %96 : vector<4x128xf32> to vector<1x4x128xf32>
      %98 = arith.subf %94, %97 : vector<1x4x128xf32>
      %c3_82 = arith.constant 3 : index
      %c0_83 = arith.constant 0 : index
      %c0_84 = arith.constant 0 : index
      %99 = vector.load %arg7[%c3_82, %c0_83, %c0_84] : memref<4x4x128xf32, #tpu.memory_space<vmem>>, vector<1x4x128xf32>
      %100 = vector.shape_cast %99 : vector<1x4x128xf32> to vector<4x128xf32>
      %cst_85 = arith.constant dense<0.000000e+00> : vector<4x128xf32>
      %101 = vector.multi_reduction <add>, %98, %cst_85 [0] : vector<1x4x128xf32> to vector<4x128xf32>
      %102 = arith.addf %100, %101 : vector<4x128xf32>
      %c3_86 = arith.constant 3 : index
      %c0_87 = arith.constant 0 : index
      %c0_88 = arith.constant 0 : index
      %103 = vector.load %arg7[%c3_86, %c0_87, %c0_88] : memref<4x4x128xf32, #tpu.memory_space<vmem>>, vector<1x4x128xf32>
      %104 = vector.shape_cast %103 : vector<1x4x128xf32> to vector<4x128xf32>
      %105 = vector.shape_cast %102 : vector<4x128xf32> to vector<1x4x128xf32>
      tpu.vector_store %arg7[%c3_86, %c0_87, %c0_88], %105 {strides = array<i32>} : memref<4x4x128xf32, #tpu.memory_space<vmem>>, vector<1x4x128xf32>,
      %c3_89 = arith.constant 3 : index
      %c0_90 = arith.constant 0 : index
      %c0_91 = arith.constant 0 : index
      %106 = vector.load %arg8[%c3_89, %c0_90, %c0_91] : memref<4x4x128xf32, #tpu.memory_space<vmem>>, vector<1x4x128xf32>
      %107 = vector.shape_cast %106 : vector<1x4x128xf32> to vector<4x128xf32>
      %108 = arith.mulf %98, %98 : vector<1x4x128xf32>
      %cst_92 = arith.constant dense<0.000000e+00> : vector<4x128xf32>
      %109 = vector.multi_reduction <add>, %108, %cst_92 [0] : vector<1x4x128xf32> to vector<4x128xf32>
      %110 = arith.addf %107, %109 : vector<4x128xf32>
      %c3_93 = arith.constant 3 : index
      %c0_94 = arith.constant 0 : index
      %c0_95 = arith.constant 0 : index
      %111 = vector.load %arg8[%c3_93, %c0_94, %c0_95] : memref<4x4x128xf32, #tpu.memory_space<vmem>>, vector<1x4x128xf32>
      %112 = vector.shape_cast %111 : vector<1x4x128xf32> to vector<4x128xf32>
      %113 = vector.shape_cast %110 : vector<4x128xf32> to vector<1x4x128xf32>
      tpu.vector_store %arg8[%c3_93, %c0_94, %c0_95], %113 {strides = array<i32>} : memref<4x4x128xf32, #tpu.memory_space<vmem>>, vector<1x4x128xf32>,
      %c3_96 = arith.constant 3 : index
      %114 = arith.index_cast %1 : i32 to index
      %c0_97 = arith.constant 0 : index
      %c0_98 = arith.constant 0 : index
      %115 = vector.load %arg6[%c3_96, %114, %c0_97, %c0_98] : memref<4x1x4x128xf32, #tpu.memory_space<vmem>>, vector<1x1x4x128xf32>
      %116 = vector.shape_cast %115 : vector<1x1x4x128xf32> to vector<1x4x128xf32>
      %117 = vector.shape_cast %94 : vector<1x4x128xf32> to vector<1x1x4x128xf32>
      tpu.vector_store %arg6[%c3_96, %114, %c0_97, %c0_98], %117 {strides = array<i32>} : memref<4x1x4x128xf32, #tpu.memory_space<vmem>>, vector<1x1x4x128xf32>,
    } else {
    }
    %c0_i32_4 = arith.constant 0 : i32
    %10 = arith.cmpi sgt, %arg0, %c0_i32_4 : i32
    %11 = arith.extui %10 : i1 to i32
    %c0_i32_5 = arith.constant 0 : i32
    %12 = arith.cmpi ne, %11, %c0_i32_5 : i32
    scf.if %12 {
      %c1_i32_8 = arith.constant 1 : i32
      %18 = arith.subi %arg0, %c1_i32_8 : i32
      %c0_i32_9 = arith.constant 0 : i32
      %19 = arith.cmpi eq, %arg1, %c0_i32_9 : i32
      %20 = arith.extui %19 : i1 to i32
      %c0_i32_10 = arith.constant 0 : i32
      %21 = arith.cmpi ne, %20, %c0_i32_10 : i32
      scf.if %21 {
        %138 = arith.index_cast %18 : i32 to index
        %c0_103 = arith.constant 0 : index
        %c0_104 = arith.constant 0 : index
        %139 = vector.load %arg3[%138, %c0_103, %c0_104] : memref<2x4x4xf32, #tpu.memory_space<vmem>>, vector<1x4x4xf32>
        %140 = vector.shape_cast %139 : vector<1x4x4xf32> to vector<4x4xf32>
        %c0_105 = arith.constant 0 : index
        %c0_106 = arith.constant 0 : index
        %c0_107 = arith.constant 0 : index
        %141 = vector.load %arg7[%c0_105, %c0_106, %c0_107] : memref<4x4x128xf32, #tpu.memory_space<vmem>>, vector<1x4x128xf32>
        %142 = vector.shape_cast %141 : vector<1x4x128xf32> to vector<4x128xf32>
        %143 = vector.extract_strided_slice %142 {offsets = [0, 0], sizes = [1, 128], strides = [1, 1]} : vector<4x128xf32> to vector<1x128xf32>
        %144 = vector.extract_strided_slice %142 {offsets = [1, 0], sizes = [1, 128], strides = [1, 1]} : vector<4x128xf32> to vector<1x128xf32>
        %145 = arith.addf %143, %144 : vector<1x128xf32>
        %146 = vector.extract_strided_slice %142 {offsets = [2, 0], sizes = [1, 128], strides = [1, 1]} : vector<4x128xf32> to vector<1x128xf32>
        %147 = arith.addf %145, %146 : vector<1x128xf32>
        %148 = vector.extract_strided_slice %142 {offsets = [3, 0], sizes = [1, 128], strides = [1, 1]} : vector<4x128xf32> to vector<1x128xf32>
        %149 = arith.addf %147, %148 : vector<1x128xf32>
        %cst = arith.constant dense<0.000000e+00> : vector<1xf32>
        %150 = vector.multi_reduction <add>, %149, %cst [1] : vector<1x128xf32> to vector<1xf32>
        %151 = vector.shape_cast %150 : vector<1xf32> to vector<1x1xf32>
        %c0_108 = arith.constant 0 : index
        %c0_109 = arith.constant 0 : index
        %c0_110 = arith.constant 0 : index
        %152 = vector.load %arg8[%c0_108, %c0_109, %c0_110] : memref<4x4x128xf32, #tpu.memory_space<vmem>>, vector<1x4x128xf32>
        %153 = vector.shape_cast %152 : vector<1x4x128xf32> to vector<4x128xf32>
        %154 = vector.extract_strided_slice %153 {offsets = [0, 0], sizes = [1, 128], strides = [1, 1]} : vector<4x128xf32> to vector<1x128xf32>
        %155 = vector.extract_strided_slice %153 {offsets = [1, 0], sizes = [1, 128], strides = [1, 1]} : vector<4x128xf32> to vector<1x128xf32>
        %156 = arith.addf %154, %155 : vector<1x128xf32>
        %157 = vector.extract_strided_slice %153 {offsets = [2, 0], sizes = [1, 128], strides = [1, 1]} : vector<4x128xf32> to vector<1x128xf32>
        %158 = arith.addf %156, %157 : vector<1x128xf32>
        %159 = vector.extract_strided_slice %153 {offsets = [3, 0], sizes = [1, 128], strides = [1, 1]} : vector<4x128xf32> to vector<1x128xf32>
        %160 = arith.addf %158, %159 : vector<1x128xf32>
        %cst_111 = arith.constant dense<0.000000e+00> : vector<1xf32>
        %161 = vector.multi_reduction <add>, %160, %cst_111 [1] : vector<1x128xf32> to vector<1xf32>
        %162 = vector.shape_cast %161 : vector<1xf32> to vector<1x1xf32>
        %c0_112 = arith.constant 0 : index
        %c0_113 = arith.constant 0 : index
        %c0_114 = arith.constant 0 : index
        %163 = vector.load %arg9[%c0_112, %c0_113, %c0_114] : memref<4x4x128xf32, #tpu.memory_space<vmem>>, vector<1x4x128xf32>
        %164 = vector.shape_cast %163 : vector<1x4x128xf32> to vector<4x128xf32>
        %165 = vector.extract_strided_slice %164 {offsets = [0, 0], sizes = [1, 1], strides = [1, 1]} : vector<4x128xf32> to vector<1x1xf32>
        %cst_115 = arith.constant 0.001953125 : f32
        %166 = vector.broadcast %cst_115 : f32 to vector<1x1xf32>
        %167 = arith.mulf %151, %166 : vector<1x1xf32>
        %168 = arith.addf %165, %167 : vector<1x1xf32>
        %cst_116 = arith.constant 0.001953125 : f32
        %169 = vector.broadcast %cst_116 : f32 to vector<1x1xf32>
        %170 = arith.mulf %162, %169 : vector<1x1xf32>
        %171 = arith.mulf %167, %167 : vector<1x1xf32>
        %172 = arith.subf %170, %171 : vector<1x1xf32>
        %cst_117 = arith.constant 0.000000e+00 : f32
        %173 = vector.broadcast %cst_117 : f32 to vector<1x1xf32>
        %174 = arith.maximumf %172, %173 : vector<1x1xf32>
        %175 = math.sqrt %174 : vector<1x1xf32>
        %cst_118 = arith.constant 9.99999997E-7 : f32
        %176 = vector.broadcast %cst_118 : f32 to vector<1x1xf32>
        %177 = arith.addf %175, %176 : vector<1x1xf32>
        %cst_119 = arith.constant 1.000000e+00 : f32
        %178 = vector.broadcast %cst_119 : f32 to vector<1x1xf32>
        %179 = arith.divf %178, %177 : vector<1x1xf32>
        %180 = math.log %179 : vector<1x1xf32>
        %cst_120 = arith.constant 0.000000e+00 : f32
        %181 = vector.broadcast %cst_120 : f32 to vector<1x1xf32>
        %182 = arith.subf %181, %168 : vector<1x1xf32>
        %183 = vector.extract_strided_slice %140 {offsets = [0, 0], sizes = [1, 1], strides = [1, 1]} : vector<4x4xf32> to vector<1x1xf32>
        %184 = arith.mulf %183, %179 : vector<1x1xf32>
        %185 = vector.shape_cast %184 : vector<1x1xf32> to vector<1x1xf32>
        %186 = vector.broadcast %185 : vector<1x1xf32> to vector<1x128xf32>
        %187 = vector.shape_cast %186 : vector<1x128xf32> to vector<1x128xf32>
        %188 = vector.broadcast %187 : vector<1x128xf32> to vector<4x128xf32>
        %c0_121 = arith.constant 0 : index
        %c0_122 = arith.constant 0 : index
        %c0_123 = arith.constant 0 : index
        %c0_124 = arith.constant 0 : index
        %189 = vector.load %arg10[%c0_121, %c0_122, %c0_123, %c0_124] : memref<4x4x4x128xf32, #tpu.memory_space<vmem>>, vector<1x1x4x128xf32>
        %190 = vector.shape_cast %189 : vector<1x1x4x128xf32> to vector<4x128xf32>
        %191 = vector.shape_cast %188 : vector<4x128xf32> to vector<1x1x4x128xf32>
        tpu.vector_store %arg10[%c0_121, %c0_122, %c0_123, %c0_124], %191 {strides = array<i32>} : memref<4x4x4x128xf32, #tpu.memory_space<vmem>>, vector<1x1x4x128xf32>,
        %192 = arith.mulf %184, %182 : vector<1x1xf32>
        %193 = vector.extract_strided_slice %140 {offsets = [1, 0], sizes = [1, 1], strides = [1, 1]} : vector<4x4xf32> to vector<1x1xf32>
        %194 = arith.mulf %193, %179 : vector<1x1xf32>
        %195 = vector.shape_cast %194 : vector<1x1xf32> to vector<1x1xf32>
        %196 = vector.broadcast %195 : vector<1x1xf32> to vector<1x128xf32>
        %197 = vector.shape_cast %196 : vector<1x128xf32> to vector<1x128xf32>
        %198 = vector.broadcast %197 : vector<1x128xf32> to vector<4x128xf32>
        %c1_125 = arith.constant 1 : index
        %c0_126 = arith.constant 0 : index
        %c0_127 = arith.constant 0 : index
        %c0_128 = arith.constant 0 : index
        %199 = vector.load %arg10[%c1_125, %c0_126, %c0_127, %c0_128] : memref<4x4x4x128xf32, #tpu.memory_space<vmem>>, vector<1x1x4x128xf32>
        %200 = vector.shape_cast %199 : vector<1x1x4x128xf32> to vector<4x128xf32>
        %201 = vector.shape_cast %198 : vector<4x128xf32> to vector<1x1x4x128xf32>
        tpu.vector_store %arg10[%c1_125, %c0_126, %c0_127, %c0_128], %201 {strides = array<i32>} : memref<4x4x4x128xf32, #tpu.memory_space<vmem>>, vector<1x1x4x128xf32>,
        %202 = arith.mulf %194, %182 : vector<1x1xf32>
        %203 = vector.extract_strided_slice %140 {offsets = [2, 0], sizes = [1, 1], strides = [1, 1]} : vector<4x4xf32> to vector<1x1xf32>
        %204 = arith.mulf %203, %179 : vector<1x1xf32>
        %205 = vector.shape_cast %204 : vector<1x1xf32> to vector<1x1xf32>
        %206 = vector.broadcast %205 : vector<1x1xf32> to vector<1x128xf32>
        %207 = vector.shape_cast %206 : vector<1x128xf32> to vector<1x128xf32>
        %208 = vector.broadcast %207 : vector<1x128xf32> to vector<4x128xf32>
        %c2_129 = arith.constant 2 : index
        %c0_130 = arith.constant 0 : index
        %c0_131 = arith.constant 0 : index
        %c0_132 = arith.constant 0 : index
        %209 = vector.load %arg10[%c2_129, %c0_130, %c0_131, %c0_132] : memref<4x4x4x128xf32, #tpu.memory_space<vmem>>, vector<1x1x4x128xf32>
        %210 = vector.shape_cast %209 : vector<1x1x4x128xf32> to vector<4x128xf32>
        %211 = vector.shape_cast %208 : vector<4x128xf32> to vector<1x1x4x128xf32>
        tpu.vector_store %arg10[%c2_129, %c0_130, %c0_131, %c0_132], %211 {strides = array<i32>} : memref<4x4x4x128xf32, #tpu.memory_space<vmem>>, vector<1x1x4x128xf32>,
        %212 = arith.mulf %204, %182 : vector<1x1xf32>
        %213 = vector.extract_strided_slice %140 {offsets = [3, 0], sizes = [1, 1], strides = [1, 1]} : vector<4x4xf32> to vector<1x1xf32>
        %214 = arith.mulf %213, %179 : vector<1x1xf32>
        %215 = vector.shape_cast %214 : vector<1x1xf32> to vector<1x1xf32>
        %216 = vector.broadcast %215 : vector<1x1xf32> to vector<1x128xf32>
        %217 = vector.shape_cast %216 : vector<1x128xf32> to vector<1x128xf32>
        %218 = vector.broadcast %217 : vector<1x128xf32> to vector<4x128xf32>
        %c3_133 = arith.constant 3 : index
        %c0_134 = arith.constant 0 : index
        %c0_135 = arith.constant 0 : index
        %c0_136 = arith.constant 0 : index
        %219 = vector.load %arg10[%c3_133, %c0_134, %c0_135, %c0_136] : memref<4x4x4x128xf32, #tpu.memory_space<vmem>>, vector<1x1x4x128xf32>
        %220 = vector.shape_cast %219 : vector<1x1x4x128xf32> to vector<4x128xf32>
        %221 = vector.shape_cast %218 : vector<4x128xf32> to vector<1x1x4x128xf32>
        tpu.vector_store %arg10[%c3_133, %c0_134, %c0_135, %c0_136], %221 {strides = array<i32>} : memref<4x4x4x128xf32, #tpu.memory_space<vmem>>, vector<1x1x4x128xf32>,
        %222 = arith.mulf %214, %182 : vector<1x1xf32>
        %c1_137 = arith.constant 1 : index
        %c0_138 = arith.constant 0 : index
        %c0_139 = arith.constant 0 : index
        %223 = vector.load %arg7[%c1_137, %c0_138, %c0_139] : memref<4x4x128xf32, #tpu.memory_space<vmem>>, vector<1x4x128xf32>
        %224 = vector.shape_cast %223 : vector<1x4x128xf32> to vector<4x128xf32>
        %225 = vector.extract_strided_slice %224 {offsets = [0, 0], sizes = [1, 128], strides = [1, 1]} : vector<4x128xf32> to vector<1x128xf32>
        %226 = vector.extract_strided_slice %224 {offsets = [1, 0], sizes = [1, 128], strides = [1, 1]} : vector<4x128xf32> to vector<1x128xf32>
        %227 = arith.addf %225, %226 : vector<1x128xf32>
        %228 = vector.extract_strided_slice %224 {offsets = [2, 0], sizes = [1, 128], strides = [1, 1]} : vector<4x128xf32> to vector<1x128xf32>
        %229 = arith.addf %227, %228 : vector<1x128xf32>
        %230 = vector.extract_strided_slice %224 {offsets = [3, 0], sizes = [1, 128], strides = [1, 1]} : vector<4x128xf32> to vector<1x128xf32>
        %231 = arith.addf %229, %230 : vector<1x128xf32>
        %cst_140 = arith.constant dense<0.000000e+00> : vector<1xf32>
        %232 = vector.multi_reduction <add>, %231, %cst_140 [1] : vector<1x128xf32> to vector<1xf32>
        %233 = vector.shape_cast %232 : vector<1xf32> to vector<1x1xf32>
        %c1_141 = arith.constant 1 : index
        %c0_142 = arith.constant 0 : index
        %c0_143 = arith.constant 0 : index
        %234 = vector.load %arg8[%c1_141, %c0_142, %c0_143] : memref<4x4x128xf32, #tpu.memory_space<vmem>>, vector<1x4x128xf32>
        %235 = vector.shape_cast %234 : vector<1x4x128xf32> to vector<4x128xf32>
        %236 = vector.extract_strided_slice %235 {offsets = [0, 0], sizes = [1, 128], strides = [1, 1]} : vector<4x128xf32> to vector<1x128xf32>
        %237 = vector.extract_strided_slice %235 {offsets = [1, 0], sizes = [1, 128], strides = [1, 1]} : vector<4x128xf32> to vector<1x128xf32>
        %238 = arith.addf %236, %237 : vector<1x128xf32>
        %239 = vector.extract_strided_slice %235 {offsets = [2, 0], sizes = [1, 128], strides = [1, 1]} : vector<4x128xf32> to vector<1x128xf32>
        %240 = arith.addf %238, %239 : vector<1x128xf32>
        %241 = vector.extract_strided_slice %235 {offsets = [3, 0], sizes = [1, 128], strides = [1, 1]} : vector<4x128xf32> to vector<1x128xf32>
        %242 = arith.addf %240, %241 : vector<1x128xf32>
        %cst_144 = arith.constant dense<0.000000e+00> : vector<1xf32>
        %243 = vector.multi_reduction <add>, %242, %cst_144 [1] : vector<1x128xf32> to vector<1xf32>
        %244 = vector.shape_cast %243 : vector<1xf32> to vector<1x1xf32>
        %c1_145 = arith.constant 1 : index
        %c0_146 = arith.constant 0 : index
        %c0_147 = arith.constant 0 : index
        %245 = vector.load %arg9[%c1_145, %c0_146, %c0_147] : memref<4x4x128xf32, #tpu.memory_space<vmem>>, vector<1x4x128xf32>
        %246 = vector.shape_cast %245 : vector<1x4x128xf32> to vector<4x128xf32>
        %247 = vector.extract_strided_slice %246 {offsets = [0, 0], sizes = [1, 1], strides = [1, 1]} : vector<4x128xf32> to vector<1x1xf32>
        %cst_148 = arith.constant 0.001953125 : f32
        %248 = vector.broadcast %cst_148 : f32 to vector<1x1xf32>
        %249 = arith.mulf %233, %248 : vector<1x1xf32>
        %250 = arith.addf %247, %249 : vector<1x1xf32>
        %cst_149 = arith.constant 0.001953125 : f32
        %251 = vector.broadcast %cst_149 : f32 to vector<1x1xf32>
        %252 = arith.mulf %244, %251 : vector<1x1xf32>
        %253 = arith.mulf %249, %249 : vector<1x1xf32>
        %254 = arith.subf %252, %253 : vector<1x1xf32>
        %cst_150 = arith.constant 0.000000e+00 : f32
        %255 = vector.broadcast %cst_150 : f32 to vector<1x1xf32>
        %256 = arith.maximumf %254, %255 : vector<1x1xf32>
        %257 = math.sqrt %256 : vector<1x1xf32>
        %cst_151 = arith.constant 9.99999997E-7 : f32
        %258 = vector.broadcast %cst_151 : f32 to vector<1x1xf32>
        %259 = arith.addf %257, %258 : vector<1x1xf32>
        %cst_152 = arith.constant 1.000000e+00 : f32
        %260 = vector.broadcast %cst_152 : f32 to vector<1x1xf32>
        %261 = arith.divf %260, %259 : vector<1x1xf32>
        %262 = math.log %261 : vector<1x1xf32>
        %263 = arith.addf %180, %262 : vector<1x1xf32>
        %cst_153 = arith.constant 0.000000e+00 : f32
        %264 = vector.broadcast %cst_153 : f32 to vector<1x1xf32>
        %265 = arith.subf %264, %250 : vector<1x1xf32>
        %266 = vector.extract_strided_slice %140 {offsets = [0, 1], sizes = [1, 1], strides = [1, 1]} : vector<4x4xf32> to vector<1x1xf32>
        %267 = arith.mulf %266, %261 : vector<1x1xf32>
        %268 = vector.shape_cast %267 : vector<1x1xf32> to vector<1x1xf32>
        %269 = vector.broadcast %268 : vector<1x1xf32> to vector<1x128xf32>
        %270 = vector.shape_cast %269 : vector<1x128xf32> to vector<1x128xf32>
        %271 = vector.broadcast %270 : vector<1x128xf32> to vector<4x128xf32>
        %c0_154 = arith.constant 0 : index
        %c1_155 = arith.constant 1 : index
        %c0_156 = arith.constant 0 : index
        %c0_157 = arith.constant 0 : index
        %272 = vector.load %arg10[%c0_154, %c1_155, %c0_156, %c0_157] : memref<4x4x4x128xf32, #tpu.memory_space<vmem>>, vector<1x1x4x128xf32>
        %273 = vector.shape_cast %272 : vector<1x1x4x128xf32> to vector<4x128xf32>
        %274 = vector.shape_cast %271 : vector<4x128xf32> to vector<1x1x4x128xf32>
        tpu.vector_store %arg10[%c0_154, %c1_155, %c0_156, %c0_157], %274 {strides = array<i32>} : memref<4x4x4x128xf32, #tpu.memory_space<vmem>>, vector<1x1x4x128xf32>,
        %275 = arith.mulf %267, %265 : vector<1x1xf32>
        %276 = arith.addf %192, %275 : vector<1x1xf32>
        %277 = vector.extract_strided_slice %140 {offsets = [1, 1], sizes = [1, 1], strides = [1, 1]} : vector<4x4xf32> to vector<1x1xf32>
        %278 = arith.mulf %277, %261 : vector<1x1xf32>
        %279 = vector.shape_cast %278 : vector<1x1xf32> to vector<1x1xf32>
        %280 = vector.broadcast %279 : vector<1x1xf32> to vector<1x128xf32>
        %281 = vector.shape_cast %280 : vector<1x128xf32> to vector<1x128xf32>
        %282 = vector.broadcast %281 : vector<1x128xf32> to vector<4x128xf32>
        %c1_158 = arith.constant 1 : index
        %c1_159 = arith.constant 1 : index
        %c0_160 = arith.constant 0 : index
        %c0_161 = arith.constant 0 : index
        %283 = vector.load %arg10[%c1_158, %c1_159, %c0_160, %c0_161] : memref<4x4x4x128xf32, #tpu.memory_space<vmem>>, vector<1x1x4x128xf32>
        %284 = vector.shape_cast %283 : vector<1x1x4x128xf32> to vector<4x128xf32>
        %285 = vector.shape_cast %282 : vector<4x128xf32> to vector<1x1x4x128xf32>
        tpu.vector_store %arg10[%c1_158, %c1_159, %c0_160, %c0_161], %285 {strides = array<i32>} : memref<4x4x4x128xf32, #tpu.memory_space<vmem>>, vector<1x1x4x128xf32>,
        %286 = arith.mulf %278, %265 : vector<1x1xf32>
        %287 = arith.addf %202, %286 : vector<1x1xf32>
        %288 = vector.extract_strided_slice %140 {offsets = [2, 1], sizes = [1, 1], strides = [1, 1]} : vector<4x4xf32> to vector<1x1xf32>
        %289 = arith.mulf %288, %261 : vector<1x1xf32>
        %290 = vector.shape_cast %289 : vector<1x1xf32> to vector<1x1xf32>
        %291 = vector.broadcast %290 : vector<1x1xf32> to vector<1x128xf32>
        %292 = vector.shape_cast %291 : vector<1x128xf32> to vector<1x128xf32>
        %293 = vector.broadcast %292 : vector<1x128xf32> to vector<4x128xf32>
        %c2_162 = arith.constant 2 : index
        %c1_163 = arith.constant 1 : index
        %c0_164 = arith.constant 0 : index
        %c0_165 = arith.constant 0 : index
        %294 = vector.load %arg10[%c2_162, %c1_163, %c0_164, %c0_165] : memref<4x4x4x128xf32, #tpu.memory_space<vmem>>, vector<1x1x4x128xf32>
        %295 = vector.shape_cast %294 : vector<1x1x4x128xf32> to vector<4x128xf32>
        %296 = vector.shape_cast %293 : vector<4x128xf32> to vector<1x1x4x128xf32>
        tpu.vector_store %arg10[%c2_162, %c1_163, %c0_164, %c0_165], %296 {strides = array<i32>} : memref<4x4x4x128xf32, #tpu.memory_space<vmem>>, vector<1x1x4x128xf32>,
        %297 = arith.mulf %289, %265 : vector<1x1xf32>
        %298 = arith.addf %212, %297 : vector<1x1xf32>
        %299 = vector.extract_strided_slice %140 {offsets = [3, 1], sizes = [1, 1], strides = [1, 1]} : vector<4x4xf32> to vector<1x1xf32>
        %300 = arith.mulf %299, %261 : vector<1x1xf32>
        %301 = vector.shape_cast %300 : vector<1x1xf32> to vector<1x1xf32>
        %302 = vector.broadcast %301 : vector<1x1xf32> to vector<1x128xf32>
        %303 = vector.shape_cast %302 : vector<1x128xf32> to vector<1x128xf32>
        %304 = vector.broadcast %303 : vector<1x128xf32> to vector<4x128xf32>
        %c3_166 = arith.constant 3 : index
        %c1_167 = arith.constant 1 : index
        %c0_168 = arith.constant 0 : index
        %c0_169 = arith.constant 0 : index
        %305 = vector.load %arg10[%c3_166, %c1_167, %c0_168, %c0_169] : memref<4x4x4x128xf32, #tpu.memory_space<vmem>>, vector<1x1x4x128xf32>
        %306 = vector.shape_cast %305 : vector<1x1x4x128xf32> to vector<4x128xf32>
        %307 = vector.shape_cast %304 : vector<4x128xf32> to vector<1x1x4x128xf32>
        tpu.vector_store %arg10[%c3_166, %c1_167, %c0_168, %c0_169], %307 {strides = array<i32>} : memref<4x4x4x128xf32, #tpu.memory_space<vmem>>, vector<1x1x4x128xf32>,
        %308 = arith.mulf %300, %265 : vector<1x1xf32>
        %309 = arith.addf %222, %308 : vector<1x1xf32>
        %c2_170 = arith.constant 2 : index
        %c0_171 = arith.constant 0 : index
        %c0_172 = arith.constant 0 : index
        %310 = vector.load %arg7[%c2_170, %c0_171, %c0_172] : memref<4x4x128xf32, #tpu.memory_space<vmem>>, vector<1x4x128xf32>
        %311 = vector.shape_cast %310 : vector<1x4x128xf32> to vector<4x128xf32>
        %312 = vector.extract_strided_slice %311 {offsets = [0, 0], sizes = [1, 128], strides = [1, 1]} : vector<4x128xf32> to vector<1x128xf32>
        %313 = vector.extract_strided_slice %311 {offsets = [1, 0], sizes = [1, 128], strides = [1, 1]} : vector<4x128xf32> to vector<1x128xf32>
        %314 = arith.addf %312, %313 : vector<1x128xf32>
        %315 = vector.extract_strided_slice %311 {offsets = [2, 0], sizes = [1, 128], strides = [1, 1]} : vector<4x128xf32> to vector<1x128xf32>
        %316 = arith.addf %314, %315 : vector<1x128xf32>
        %317 = vector.extract_strided_slice %311 {offsets = [3, 0], sizes = [1, 128], strides = [1, 1]} : vector<4x128xf32> to vector<1x128xf32>
        %318 = arith.addf %316, %317 : vector<1x128xf32>
        %cst_173 = arith.constant dense<0.000000e+00> : vector<1xf32>
        %319 = vector.multi_reduction <add>, %318, %cst_173 [1] : vector<1x128xf32> to vector<1xf32>
        %320 = vector.shape_cast %319 : vector<1xf32> to vector<1x1xf32>
        %c2_174 = arith.constant 2 : index
        %c0_175 = arith.constant 0 : index
        %c0_176 = arith.constant 0 : index
        %321 = vector.load %arg8[%c2_174, %c0_175, %c0_176] : memref<4x4x128xf32, #tpu.memory_space<vmem>>, vector<1x4x128xf32>
        %322 = vector.shape_cast %321 : vector<1x4x128xf32> to vector<4x128xf32>
        %323 = vector.extract_strided_slice %322 {offsets = [0, 0], sizes = [1, 128], strides = [1, 1]} : vector<4x128xf32> to vector<1x128xf32>
        %324 = vector.extract_strided_slice %322 {offsets = [1, 0], sizes = [1, 128], strides = [1, 1]} : vector<4x128xf32> to vector<1x128xf32>
        %325 = arith.addf %323, %324 : vector<1x128xf32>
        %326 = vector.extract_strided_slice %322 {offsets = [2, 0], sizes = [1, 128], strides = [1, 1]} : vector<4x128xf32> to vector<1x128xf32>
        %327 = arith.addf %325, %326 : vector<1x128xf32>
        %328 = vector.extract_strided_slice %322 {offsets = [3, 0], sizes = [1, 128], strides = [1, 1]} : vector<4x128xf32> to vector<1x128xf32>
        %329 = arith.addf %327, %328 : vector<1x128xf32>
        %cst_177 = arith.constant dense<0.000000e+00> : vector<1xf32>
        %330 = vector.multi_reduction <add>, %329, %cst_177 [1] : vector<1x128xf32> to vector<1xf32>
        %331 = vector.shape_cast %330 : vector<1xf32> to vector<1x1xf32>
        %c2_178 = arith.constant 2 : index
        %c0_179 = arith.constant 0 : index
        %c0_180 = arith.constant 0 : index
        %332 = vector.load %arg9[%c2_178, %c0_179, %c0_180] : memref<4x4x128xf32, #tpu.memory_space<vmem>>, vector<1x4x128xf32>
        %333 = vector.shape_cast %332 : vector<1x4x128xf32> to vector<4x128xf32>
        %334 = vector.extract_strided_slice %333 {offsets = [0, 0], sizes = [1, 1], strides = [1, 1]} : vector<4x128xf32> to vector<1x1xf32>
        %cst_181 = arith.constant 0.001953125 : f32
        %335 = vector.broadcast %cst_181 : f32 to vector<1x1xf32>
        %336 = arith.mulf %320, %335 : vector<1x1xf32>
        %337 = arith.addf %334, %336 : vector<1x1xf32>
        %cst_182 = arith.constant 0.001953125 : f32
        %338 = vector.broadcast %cst_182 : f32 to vector<1x1xf32>
        %339 = arith.mulf %331, %338 : vector<1x1xf32>
        %340 = arith.mulf %336, %336 : vector<1x1xf32>
        %341 = arith.subf %339, %340 : vector<1x1xf32>
        %cst_183 = arith.constant 0.000000e+00 : f32
        %342 = vector.broadcast %cst_183 : f32 to vector<1x1xf32>
        %343 = arith.maximumf %341, %342 : vector<1x1xf32>
        %344 = math.sqrt %343 : vector<1x1xf32>
        %cst_184 = arith.constant 9.99999997E-7 : f32
        %345 = vector.broadcast %cst_184 : f32 to vector<1x1xf32>
        %346 = arith.addf %344, %345 : vector<1x1xf32>
        %cst_185 = arith.constant 1.000000e+00 : f32
        %347 = vector.broadcast %cst_185 : f32 to vector<1x1xf32>
        %348 = arith.divf %347, %346 : vector<1x1xf32>
        %349 = math.log %348 : vector<1x1xf32>
        %350 = arith.addf %263, %349 : vector<1x1xf32>
        %cst_186 = arith.constant 0.000000e+00 : f32
        %351 = vector.broadcast %cst_186 : f32 to vector<1x1xf32>
        %352 = arith.subf %351, %337 : vector<1x1xf32>
        %353 = vector.extract_strided_slice %140 {offsets = [0, 2], sizes = [1, 1], strides = [1, 1]} : vector<4x4xf32> to vector<1x1xf32>
        %354 = arith.mulf %353, %348 : vector<1x1xf32>
        %355 = vector.shape_cast %354 : vector<1x1xf32> to vector<1x1xf32>
        %356 = vector.broadcast %355 : vector<1x1xf32> to vector<1x128xf32>
        %357 = vector.shape_cast %356 : vector<1x128xf32> to vector<1x128xf32>
        %358 = vector.broadcast %357 : vector<1x128xf32> to vector<4x128xf32>
        %c0_187 = arith.constant 0 : index
        %c2_188 = arith.constant 2 : index
        %c0_189 = arith.constant 0 : index
        %c0_190 = arith.constant 0 : index
        %359 = vector.load %arg10[%c0_187, %c2_188, %c0_189, %c0_190] : memref<4x4x4x128xf32, #tpu.memory_space<vmem>>, vector<1x1x4x128xf32>
        %360 = vector.shape_cast %359 : vector<1x1x4x128xf32> to vector<4x128xf32>
        %361 = vector.shape_cast %358 : vector<4x128xf32> to vector<1x1x4x128xf32>
        tpu.vector_store %arg10[%c0_187, %c2_188, %c0_189, %c0_190], %361 {strides = array<i32>} : memref<4x4x4x128xf32, #tpu.memory_space<vmem>>, vector<1x1x4x128xf32>,
        %362 = arith.mulf %354, %352 : vector<1x1xf32>
        %363 = arith.addf %276, %362 : vector<1x1xf32>
        %364 = vector.extract_strided_slice %140 {offsets = [1, 2], sizes = [1, 1], strides = [1, 1]} : vector<4x4xf32> to vector<1x1xf32>
        %365 = arith.mulf %364, %348 : vector<1x1xf32>
        %366 = vector.shape_cast %365 : vector<1x1xf32> to vector<1x1xf32>
        %367 = vector.broadcast %366 : vector<1x1xf32> to vector<1x128xf32>
        %368 = vector.shape_cast %367 : vector<1x128xf32> to vector<1x128xf32>
        %369 = vector.broadcast %368 : vector<1x128xf32> to vector<4x128xf32>
        %c1_191 = arith.constant 1 : index
        %c2_192 = arith.constant 2 : index
        %c0_193 = arith.constant 0 : index
        %c0_194 = arith.constant 0 : index
        %370 = vector.load %arg10[%c1_191, %c2_192, %c0_193, %c0_194] : memref<4x4x4x128xf32, #tpu.memory_space<vmem>>, vector<1x1x4x128xf32>
        %371 = vector.shape_cast %370 : vector<1x1x4x128xf32> to vector<4x128xf32>
        %372 = vector.shape_cast %369 : vector<4x128xf32> to vector<1x1x4x128xf32>
        tpu.vector_store %arg10[%c1_191, %c2_192, %c0_193, %c0_194], %372 {strides = array<i32>} : memref<4x4x4x128xf32, #tpu.memory_space<vmem>>, vector<1x1x4x128xf32>,
        %373 = arith.mulf %365, %352 : vector<1x1xf32>
        %374 = arith.addf %287, %373 : vector<1x1xf32>
        %375 = vector.extract_strided_slice %140 {offsets = [2, 2], sizes = [1, 1], strides = [1, 1]} : vector<4x4xf32> to vector<1x1xf32>
        %376 = arith.mulf %375, %348 : vector<1x1xf32>
        %377 = vector.shape_cast %376 : vector<1x1xf32> to vector<1x1xf32>
        %378 = vector.broadcast %377 : vector<1x1xf32> to vector<1x128xf32>
        %379 = vector.shape_cast %378 : vector<1x128xf32> to vector<1x128xf32>
        %380 = vector.broadcast %379 : vector<1x128xf32> to vector<4x128xf32>
        %c2_195 = arith.constant 2 : index
        %c2_196 = arith.constant 2 : index
        %c0_197 = arith.constant 0 : index
        %c0_198 = arith.constant 0 : index
        %381 = vector.load %arg10[%c2_195, %c2_196, %c0_197, %c0_198] : memref<4x4x4x128xf32, #tpu.memory_space<vmem>>, vector<1x1x4x128xf32>
        %382 = vector.shape_cast %381 : vector<1x1x4x128xf32> to vector<4x128xf32>
        %383 = vector.shape_cast %380 : vector<4x128xf32> to vector<1x1x4x128xf32>
        tpu.vector_store %arg10[%c2_195, %c2_196, %c0_197, %c0_198], %383 {strides = array<i32>} : memref<4x4x4x128xf32, #tpu.memory_space<vmem>>, vector<1x1x4x128xf32>,
        %384 = arith.mulf %376, %352 : vector<1x1xf32>
        %385 = arith.addf %298, %384 : vector<1x1xf32>
        %386 = vector.extract_strided_slice %140 {offsets = [3, 2], sizes = [1, 1], strides = [1, 1]} : vector<4x4xf32> to vector<1x1xf32>
        %387 = arith.mulf %386, %348 : vector<1x1xf32>
        %388 = vector.shape_cast %387 : vector<1x1xf32> to vector<1x1xf32>
        %389 = vector.broadcast %388 : vector<1x1xf32> to vector<1x128xf32>
        %390 = vector.shape_cast %389 : vector<1x128xf32> to vector<1x128xf32>
        %391 = vector.broadcast %390 : vector<1x128xf32> to vector<4x128xf32>
        %c3_199 = arith.constant 3 : index
        %c2_200 = arith.constant 2 : index
        %c0_201 = arith.constant 0 : index
        %c0_202 = arith.constant 0 : index
        %392 = vector.load %arg10[%c3_199, %c2_200, %c0_201, %c0_202] : memref<4x4x4x128xf32, #tpu.memory_space<vmem>>, vector<1x1x4x128xf32>
        %393 = vector.shape_cast %392 : vector<1x1x4x128xf32> to vector<4x128xf32>
        %394 = vector.shape_cast %391 : vector<4x128xf32> to vector<1x1x4x128xf32>
        tpu.vector_store %arg10[%c3_199, %c2_200, %c0_201, %c0_202], %394 {strides = array<i32>} : memref<4x4x4x128xf32, #tpu.memory_space<vmem>>, vector<1x1x4x128xf32>,
        %395 = arith.mulf %387, %352 : vector<1x1xf32>
        %396 = arith.addf %309, %395 : vector<1x1xf32>
        %c3_203 = arith.constant 3 : index
        %c0_204 = arith.constant 0 : index
        %c0_205 = arith.constant 0 : index
        %397 = vector.load %arg7[%c3_203, %c0_204, %c0_205] : memref<4x4x128xf32, #tpu.memory_space<vmem>>, vector<1x4x128xf32>
        %398 = vector.shape_cast %397 : vector<1x4x128xf32> to vector<4x128xf32>
        %399 = vector.extract_strided_slice %398 {offsets = [0, 0], sizes = [1, 128], strides = [1, 1]} : vector<4x128xf32> to vector<1x128xf32>
        %400 = vector.extract_strided_slice %398 {offsets = [1, 0], sizes = [1, 128], strides = [1, 1]} : vector<4x128xf32> to vector<1x128xf32>
        %401 = arith.addf %399, %400 : vector<1x128xf32>
        %402 = vector.extract_strided_slice %398 {offsets = [2, 0], sizes = [1, 128], strides = [1, 1]} : vector<4x128xf32> to vector<1x128xf32>
        %403 = arith.addf %401, %402 : vector<1x128xf32>
        %404 = vector.extract_strided_slice %398 {offsets = [3, 0], sizes = [1, 128], strides = [1, 1]} : vector<4x128xf32> to vector<1x128xf32>
        %405 = arith.addf %403, %404 : vector<1x128xf32>
        %cst_206 = arith.constant dense<0.000000e+00> : vector<1xf32>
        %406 = vector.multi_reduction <add>, %405, %cst_206 [1] : vector<1x128xf32> to vector<1xf32>
        %407 = vector.shape_cast %406 : vector<1xf32> to vector<1x1xf32>
        %c3_207 = arith.constant 3 : index
        %c0_208 = arith.constant 0 : index
        %c0_209 = arith.constant 0 : index
        %408 = vector.load %arg8[%c3_207, %c0_208, %c0_209] : memref<4x4x128xf32, #tpu.memory_space<vmem>>, vector<1x4x128xf32>
        %409 = vector.shape_cast %408 : vector<1x4x128xf32> to vector<4x128xf32>
        %410 = vector.extract_strided_slice %409 {offsets = [0, 0], sizes = [1, 128], strides = [1, 1]} : vector<4x128xf32> to vector<1x128xf32>
        %411 = vector.extract_strided_slice %409 {offsets = [1, 0], sizes = [1, 128], strides = [1, 1]} : vector<4x128xf32> to vector<1x128xf32>
        %412 = arith.addf %410, %411 : vector<1x128xf32>
        %413 = vector.extract_strided_slice %409 {offsets = [2, 0], sizes = [1, 128], strides = [1, 1]} : vector<4x128xf32> to vector<1x128xf32>
        %414 = arith.addf %412, %413 : vector<1x128xf32>
        %415 = vector.extract_strided_slice %409 {offsets = [3, 0], sizes = [1, 128], strides = [1, 1]} : vector<4x128xf32> to vector<1x128xf32>
        %416 = arith.addf %414, %415 : vector<1x128xf32>
        %cst_210 = arith.constant dense<0.000000e+00> : vector<1xf32>
        %417 = vector.multi_reduction <add>, %416, %cst_210 [1] : vector<1x128xf32> to vector<1xf32>
        %418 = vector.shape_cast %417 : vector<1xf32> to vector<1x1xf32>
        %c3_211 = arith.constant 3 : index
        %c0_212 = arith.constant 0 : index
        %c0_213 = arith.constant 0 : index
        %419 = vector.load %arg9[%c3_211, %c0_212, %c0_213] : memref<4x4x128xf32, #tpu.memory_space<vmem>>, vector<1x4x128xf32>
        %420 = vector.shape_cast %419 : vector<1x4x128xf32> to vector<4x128xf32>
        %421 = vector.extract_strided_slice %420 {offsets = [0, 0], sizes = [1, 1], strides = [1, 1]} : vector<4x128xf32> to vector<1x1xf32>
        %cst_214 = arith.constant 0.001953125 : f32
        %422 = vector.broadcast %cst_214 : f32 to vector<1x1xf32>
        %423 = arith.mulf %407, %422 : vector<1x1xf32>
        %424 = arith.addf %421, %423 : vector<1x1xf32>
        %cst_215 = arith.constant 0.001953125 : f32
        %425 = vector.broadcast %cst_215 : f32 to vector<1x1xf32>
        %426 = arith.mulf %418, %425 : vector<1x1xf32>
        %427 = arith.mulf %423, %423 : vector<1x1xf32>
        %428 = arith.subf %426, %427 : vector<1x1xf32>
        %cst_216 = arith.constant 0.000000e+00 : f32
        %429 = vector.broadcast %cst_216 : f32 to vector<1x1xf32>
        %430 = arith.maximumf %428, %429 : vector<1x1xf32>
        %431 = math.sqrt %430 : vector<1x1xf32>
        %cst_217 = arith.constant 9.99999997E-7 : f32
        %432 = vector.broadcast %cst_217 : f32 to vector<1x1xf32>
        %433 = arith.addf %431, %432 : vector<1x1xf32>
        %cst_218 = arith.constant 1.000000e+00 : f32
        %434 = vector.broadcast %cst_218 : f32 to vector<1x1xf32>
        %435 = arith.divf %434, %433 : vector<1x1xf32>
        %436 = math.log %435 : vector<1x1xf32>
        %437 = arith.addf %350, %436 : vector<1x1xf32>
        %cst_219 = arith.constant 0.000000e+00 : f32
        %438 = vector.broadcast %cst_219 : f32 to vector<1x1xf32>
        %439 = arith.subf %438, %424 : vector<1x1xf32>
        %440 = vector.extract_strided_slice %140 {offsets = [0, 3], sizes = [1, 1], strides = [1, 1]} : vector<4x4xf32> to vector<1x1xf32>
        %441 = arith.mulf %440, %435 : vector<1x1xf32>
        %442 = vector.shape_cast %441 : vector<1x1xf32> to vector<1x1xf32>
        %443 = vector.broadcast %442 : vector<1x1xf32> to vector<1x128xf32>
        %444 = vector.shape_cast %443 : vector<1x128xf32> to vector<1x128xf32>
        %445 = vector.broadcast %444 : vector<1x128xf32> to vector<4x128xf32>
        %c0_220 = arith.constant 0 : index
        %c3_221 = arith.constant 3 : index
        %c0_222 = arith.constant 0 : index
        %c0_223 = arith.constant 0 : index
        %446 = vector.load %arg10[%c0_220, %c3_221, %c0_222, %c0_223] : memref<4x4x4x128xf32, #tpu.memory_space<vmem>>, vector<1x1x4x128xf32>
        %447 = vector.shape_cast %446 : vector<1x1x4x128xf32> to vector<4x128xf32>
        %448 = vector.shape_cast %445 : vector<4x128xf32> to vector<1x1x4x128xf32>
        tpu.vector_store %arg10[%c0_220, %c3_221, %c0_222, %c0_223], %448 {strides = array<i32>} : memref<4x4x4x128xf32, #tpu.memory_space<vmem>>, vector<1x1x4x128xf32>,
        %449 = arith.mulf %441, %439 : vector<1x1xf32>
        %450 = arith.addf %363, %449 : vector<1x1xf32>
        %451 = vector.extract_strided_slice %140 {offsets = [1, 3], sizes = [1, 1], strides = [1, 1]} : vector<4x4xf32> to vector<1x1xf32>
        %452 = arith.mulf %451, %435 : vector<1x1xf32>
        %453 = vector.shape_cast %452 : vector<1x1xf32> to vector<1x1xf32>
        %454 = vector.broadcast %453 : vector<1x1xf32> to vector<1x128xf32>
        %455 = vector.shape_cast %454 : vector<1x128xf32> to vector<1x128xf32>
        %456 = vector.broadcast %455 : vector<1x128xf32> to vector<4x128xf32>
        %c1_224 = arith.constant 1 : index
        %c3_225 = arith.constant 3 : index
        %c0_226 = arith.constant 0 : index
        %c0_227 = arith.constant 0 : index
        %457 = vector.load %arg10[%c1_224, %c3_225, %c0_226, %c0_227] : memref<4x4x4x128xf32, #tpu.memory_space<vmem>>, vector<1x1x4x128xf32>
        %458 = vector.shape_cast %457 : vector<1x1x4x128xf32> to vector<4x128xf32>
        %459 = vector.shape_cast %456 : vector<4x128xf32> to vector<1x1x4x128xf32>
        tpu.vector_store %arg10[%c1_224, %c3_225, %c0_226, %c0_227], %459 {strides = array<i32>} : memref<4x4x4x128xf32, #tpu.memory_space<vmem>>, vector<1x1x4x128xf32>,
        %460 = arith.mulf %452, %439 : vector<1x1xf32>
        %461 = arith.addf %374, %460 : vector<1x1xf32>
        %462 = vector.extract_strided_slice %140 {offsets = [2, 3], sizes = [1, 1], strides = [1, 1]} : vector<4x4xf32> to vector<1x1xf32>
        %463 = arith.mulf %462, %435 : vector<1x1xf32>
        %464 = vector.shape_cast %463 : vector<1x1xf32> to vector<1x1xf32>
        %465 = vector.broadcast %464 : vector<1x1xf32> to vector<1x128xf32>
        %466 = vector.shape_cast %465 : vector<1x128xf32> to vector<1x128xf32>
        %467 = vector.broadcast %466 : vector<1x128xf32> to vector<4x128xf32>
        %c2_228 = arith.constant 2 : index
        %c3_229 = arith.constant 3 : index
        %c0_230 = arith.constant 0 : index
        %c0_231 = arith.constant 0 : index
        %468 = vector.load %arg10[%c2_228, %c3_229, %c0_230, %c0_231] : memref<4x4x4x128xf32, #tpu.memory_space<vmem>>, vector<1x1x4x128xf32>
        %469 = vector.shape_cast %468 : vector<1x1x4x128xf32> to vector<4x128xf32>
        %470 = vector.shape_cast %467 : vector<4x128xf32> to vector<1x1x4x128xf32>
        tpu.vector_store %arg10[%c2_228, %c3_229, %c0_230, %c0_231], %470 {strides = array<i32>} : memref<4x4x4x128xf32, #tpu.memory_space<vmem>>, vector<1x1x4x128xf32>,
        %471 = arith.mulf %463, %439 : vector<1x1xf32>
        %472 = arith.addf %385, %471 : vector<1x1xf32>
        %473 = vector.extract_strided_slice %140 {offsets = [3, 3], sizes = [1, 1], strides = [1, 1]} : vector<4x4xf32> to vector<1x1xf32>
        %474 = arith.mulf %473, %435 : vector<1x1xf32>
        %475 = vector.shape_cast %474 : vector<1x1xf32> to vector<1x1xf32>
        %476 = vector.broadcast %475 : vector<1x1xf32> to vector<1x128xf32>
        %477 = vector.shape_cast %476 : vector<1x128xf32> to vector<1x128xf32>
        %478 = vector.broadcast %477 : vector<1x128xf32> to vector<4x128xf32>
        %c3_232 = arith.constant 3 : index
        %c3_233 = arith.constant 3 : index
        %c0_234 = arith.constant 0 : index
        %c0_235 = arith.constant 0 : index
        %479 = vector.load %arg10[%c3_232, %c3_233, %c0_234, %c0_235] : memref<4x4x4x128xf32, #tpu.memory_space<vmem>>, vector<1x1x4x128xf32>
        %480 = vector.shape_cast %479 : vector<1x1x4x128xf32> to vector<4x128xf32>
        %481 = vector.shape_cast %478 : vector<4x128xf32> to vector<1x1x4x128xf32>
        tpu.vector_store %arg10[%c3_232, %c3_233, %c0_234, %c0_235], %481 {strides = array<i32>} : memref<4x4x4x128xf32, #tpu.memory_space<vmem>>, vector<1x1x4x128xf32>,
        %482 = arith.mulf %474, %439 : vector<1x1xf32>
        %483 = arith.addf %396, %482 : vector<1x1xf32>
        %484 = vector.shape_cast %450 : vector<1x1xf32> to vector<1x1xf32>
        %485 = vector.broadcast %484 : vector<1x1xf32> to vector<1x128xf32>
        %486 = vector.shape_cast %485 : vector<1x128xf32> to vector<1x128xf32>
        %487 = vector.broadcast %486 : vector<1x128xf32> to vector<4x128xf32>
        %c0_236 = arith.constant 0 : index
        %c0_237 = arith.constant 0 : index
        %c0_238 = arith.constant 0 : index
        %488 = vector.load %arg11[%c0_236, %c0_237, %c0_238] : memref<4x4x128xf32, #tpu.memory_space<vmem>>, vector<1x4x128xf32>
        %489 = vector.shape_cast %488 : vector<1x4x128xf32> to vector<4x128xf32>
        %490 = vector.shape_cast %487 : vector<4x128xf32> to vector<1x4x128xf32>
        tpu.vector_store %arg11[%c0_236, %c0_237, %c0_238], %490 {strides = array<i32>} : memref<4x4x128xf32, #tpu.memory_space<vmem>>, vector<1x4x128xf32>,
        %491 = vector.shape_cast %461 : vector<1x1xf32> to vector<1x1xf32>
        %492 = vector.broadcast %491 : vector<1x1xf32> to vector<1x128xf32>
        %493 = vector.shape_cast %492 : vector<1x128xf32> to vector<1x128xf32>
        %494 = vector.broadcast %493 : vector<1x128xf32> to vector<4x128xf32>
        %c1_239 = arith.constant 1 : index
        %c0_240 = arith.constant 0 : index
        %c0_241 = arith.constant 0 : index
        %495 = vector.load %arg11[%c1_239, %c0_240, %c0_241] : memref<4x4x128xf32, #tpu.memory_space<vmem>>, vector<1x4x128xf32>
        %496 = vector.shape_cast %495 : vector<1x4x128xf32> to vector<4x128xf32>
        %497 = vector.shape_cast %494 : vector<4x128xf32> to vector<1x4x128xf32>
        tpu.vector_store %arg11[%c1_239, %c0_240, %c0_241], %497 {strides = array<i32>} : memref<4x4x128xf32, #tpu.memory_space<vmem>>, vector<1x4x128xf32>,
        %498 = vector.shape_cast %472 : vector<1x1xf32> to vector<1x1xf32>
        %499 = vector.broadcast %498 : vector<1x1xf32> to vector<1x128xf32>
        %500 = vector.shape_cast %499 : vector<1x128xf32> to vector<1x128xf32>
        %501 = vector.broadcast %500 : vector<1x128xf32> to vector<4x128xf32>
        %c2_242 = arith.constant 2 : index
        %c0_243 = arith.constant 0 : index
        %c0_244 = arith.constant 0 : index
        %502 = vector.load %arg11[%c2_242, %c0_243, %c0_244] : memref<4x4x128xf32, #tpu.memory_space<vmem>>, vector<1x4x128xf32>
        %503 = vector.shape_cast %502 : vector<1x4x128xf32> to vector<4x128xf32>
        %504 = vector.shape_cast %501 : vector<4x128xf32> to vector<1x4x128xf32>
        tpu.vector_store %arg11[%c2_242, %c0_243, %c0_244], %504 {strides = array<i32>} : memref<4x4x128xf32, #tpu.memory_space<vmem>>, vector<1x4x128xf32>,
        %505 = vector.shape_cast %483 : vector<1x1xf32> to vector<1x1xf32>
        %506 = vector.broadcast %505 : vector<1x1xf32> to vector<1x128xf32>
        %507 = vector.shape_cast %506 : vector<1x128xf32> to vector<1x128xf32>
        %508 = vector.broadcast %507 : vector<1x128xf32> to vector<4x128xf32>
        %c3_245 = arith.constant 3 : index
        %c0_246 = arith.constant 0 : index
        %c0_247 = arith.constant 0 : index
        %509 = vector.load %arg11[%c3_245, %c0_246, %c0_247] : memref<4x4x128xf32, #tpu.memory_space<vmem>>, vector<1x4x128xf32>
        %510 = vector.shape_cast %509 : vector<1x4x128xf32> to vector<4x128xf32>
        %511 = vector.shape_cast %508 : vector<4x128xf32> to vector<1x4x128xf32>
        tpu.vector_store %arg11[%c3_245, %c0_246, %c0_247], %511 {strides = array<i32>} : memref<4x4x128xf32, #tpu.memory_space<vmem>>, vector<1x4x128xf32>,
        %c0_248 = arith.constant 0 : index
        %c0_249 = arith.constant 0 : index
        %512 = vector.load %arg12[%c0_248, %c0_249] : memref<1x1xf32, #tpu.memory_space<vmem>>, vector<1x1xf32>
        %cst_250 = arith.constant 2.560000e+02 : f32
        %513 = vector.broadcast %cst_250 : f32 to vector<1x1xf32>
        %514 = arith.mulf %437, %513 : vector<1x1xf32>
        %515 = arith.addf %512, %514 : vector<1x1xf32>
        %c0_251 = arith.constant 0 : index
        %c0_252 = arith.constant 0 : index
        %516 = vector.load %arg12[%c0_251, %c0_252] : memref<1x1xf32, #tpu.memory_space<vmem>>, vector<1x1xf32>
        tpu.vector_store %arg12[%c0_251, %c0_252], %515 {strides = array<i32>} : memref<1x1xf32, #tpu.memory_space<vmem>>, vector<1x1xf32>,
        %cst_253 = arith.constant 0.000000e+00 : f32
        %517 = vector.broadcast %cst_253 : f32 to vector<4x4x128xf32>
        %c0_254 = arith.constant 0 : index
        %c0_255 = arith.constant 0 : index
        %c0_256 = arith.constant 0 : index
        %518 = vector.load %arg7[%c0_254, %c0_255, %c0_256] : memref<4x4x128xf32, #tpu.memory_space<vmem>>, vector<4x4x128xf32>
        tpu.vector_store %arg7[%c0_254, %c0_255, %c0_256], %517 {strides = array<i32>} : memref<4x4x128xf32, #tpu.memory_space<vmem>>, vector<4x4x128xf32>,
        %cst_257 = arith.constant 0.000000e+00 : f32
        %519 = vector.broadcast %cst_257 : f32 to vector<4x4x128xf32>
        %c0_258 = arith.constant 0 : index
        %c0_259 = arith.constant 0 : index
        %c0_260 = arith.constant 0 : index
        %520 = vector.load %arg8[%c0_258, %c0_259, %c0_260] : memref<4x4x128xf32, #tpu.memory_space<vmem>>, vector<4x4x128xf32>
        tpu.vector_store %arg8[%c0_258, %c0_259, %c0_260], %519 {strides = array<i32>} : memref<4x4x128xf32, #tpu.memory_space<vmem>>, vector<4x4x128xf32>,
      } else {
      }
      %c0 = arith.constant 0 : index
      %c0_11 = arith.constant 0 : index
      %c0_12 = arith.constant 0 : index
      %c0_13 = arith.constant 0 : index
      %22 = vector.load %arg10[%c0, %c0_11, %c0_12, %c0_13] : memref<4x4x4x128xf32, #tpu.memory_space<vmem>>, vector<1x1x4x128xf32>
      %23 = vector.shape_cast %22 : vector<1x1x4x128xf32> to vector<4x128xf32>
      %c0_14 = arith.constant 0 : index
      %c1 = arith.constant 1 : index
      %c0_15 = arith.constant 0 : index
      %c0_16 = arith.constant 0 : index
      %24 = vector.load %arg10[%c0_14, %c1, %c0_15, %c0_16] : memref<4x4x4x128xf32, #tpu.memory_space<vmem>>, vector<1x1x4x128xf32>
      %25 = vector.shape_cast %24 : vector<1x1x4x128xf32> to vector<4x128xf32>
      %c0_17 = arith.constant 0 : index
      %c2 = arith.constant 2 : index
      %c0_18 = arith.constant 0 : index
      %c0_19 = arith.constant 0 : index
      %26 = vector.load %arg10[%c0_17, %c2, %c0_18, %c0_19] : memref<4x4x4x128xf32, #tpu.memory_space<vmem>>, vector<1x1x4x128xf32>
      %27 = vector.shape_cast %26 : vector<1x1x4x128xf32> to vector<4x128xf32>
      %c0_20 = arith.constant 0 : index
      %c3 = arith.constant 3 : index
      %c0_21 = arith.constant 0 : index
      %c0_22 = arith.constant 0 : index
      %28 = vector.load %arg10[%c0_20, %c3, %c0_21, %c0_22] : memref<4x4x4x128xf32, #tpu.memory_space<vmem>>, vector<1x1x4x128xf32>
      %29 = vector.shape_cast %28 : vector<1x1x4x128xf32> to vector<4x128xf32>
      %c1_23 = arith.constant 1 : index
      %c0_24 = arith.constant 0 : index
      %c0_25 = arith.constant 0 : index
      %c0_26 = arith.constant 0 : index
      %30 = vector.load %arg10[%c1_23, %c0_24, %c0_25, %c0_26] : memref<4x4x4x128xf32, #tpu.memory_space<vmem>>, vector<1x1x4x128xf32>
      %31 = vector.shape_cast %30 : vector<1x1x4x128xf32> to vector<4x128xf32>
      %c1_27 = arith.constant 1 : index
      %c1_28 = arith.constant 1 : index
      %c0_29 = arith.constant 0 : index
      %c0_30 = arith.constant 0 : index
      %32 = vector.load %arg10[%c1_27, %c1_28, %c0_29, %c0_30] : memref<4x4x4x128xf32, #tpu.memory_space<vmem>>, vector<1x1x4x128xf32>
      %33 = vector.shape_cast %32 : vector<1x1x4x128xf32> to vector<4x128xf32>
      %c1_31 = arith.constant 1 : index
      %c2_32 = arith.constant 2 : index
      %c0_33 = arith.constant 0 : index
      %c0_34 = arith.constant 0 : index
      %34 = vector.load %arg10[%c1_31, %c2_32, %c0_33, %c0_34] : memref<4x4x4x128xf32, #tpu.memory_space<vmem>>, vector<1x1x4x128xf32>
      %35 = vector.shape_cast %34 : vector<1x1x4x128xf32> to vector<4x128xf32>
      %c1_35 = arith.constant 1 : index
      %c3_36 = arith.constant 3 : index
      %c0_37 = arith.constant 0 : index
      %c0_38 = arith.constant 0 : index
      %36 = vector.load %arg10[%c1_35, %c3_36, %c0_37, %c0_38] : memref<4x4x4x128xf32, #tpu.memory_space<vmem>>, vector<1x1x4x128xf32>
      %37 = vector.shape_cast %36 : vector<1x1x4x128xf32> to vector<4x128xf32>
      %c2_39 = arith.constant 2 : index
      %c0_40 = arith.constant 0 : index
      %c0_41 = arith.constant 0 : index
      %c0_42 = arith.constant 0 : index
      %38 = vector.load %arg10[%c2_39, %c0_40, %c0_41, %c0_42] : memref<4x4x4x128xf32, #tpu.memory_space<vmem>>, vector<1x1x4x128xf32>
      %39 = vector.shape_cast %38 : vector<1x1x4x128xf32> to vector<4x128xf32>
      %c2_43 = arith.constant 2 : index
      %c1_44 = arith.constant 1 : index
      %c0_45 = arith.constant 0 : index
      %c0_46 = arith.constant 0 : index
      %40 = vector.load %arg10[%c2_43, %c1_44, %c0_45, %c0_46] : memref<4x4x4x128xf32, #tpu.memory_space<vmem>>, vector<1x1x4x128xf32>
      %41 = vector.shape_cast %40 : vector<1x1x4x128xf32> to vector<4x128xf32>
      %c2_47 = arith.constant 2 : index
      %c2_48 = arith.constant 2 : index
      %c0_49 = arith.constant 0 : index
      %c0_50 = arith.constant 0 : index
      %42 = vector.load %arg10[%c2_47, %c2_48, %c0_49, %c0_50] : memref<4x4x4x128xf32, #tpu.memory_space<vmem>>, vector<1x1x4x128xf32>
      %43 = vector.shape_cast %42 : vector<1x1x4x128xf32> to vector<4x128xf32>
      %c2_51 = arith.constant 2 : index
      %c3_52 = arith.constant 3 : index
      %c0_53 = arith.constant 0 : index
      %c0_54 = arith.constant 0 : index
      %44 = vector.load %arg10[%c2_51, %c3_52, %c0_53, %c0_54] : memref<4x4x4x128xf32, #tpu.memory_space<vmem>>, vector<1x1x4x128xf32>
      %45 = vector.shape_cast %44 : vector<1x1x4x128xf32> to vector<4x128xf32>
      %c3_55 = arith.constant 3 : index
      %c0_56 = arith.constant 0 : index
      %c0_57 = arith.constant 0 : index
      %c0_58 = arith.constant 0 : index
      %46 = vector.load %arg10[%c3_55, %c0_56, %c0_57, %c0_58] : memref<4x4x4x128xf32, #tpu.memory_space<vmem>>, vector<1x1x4x128xf32>
      %47 = vector.shape_cast %46 : vector<1x1x4x128xf32> to vector<4x128xf32>
      %c3_59 = arith.constant 3 : index
      %c1_60 = arith.constant 1 : index
      %c0_61 = arith.constant 0 : index
      %c0_62 = arith.constant 0 : index
      %48 = vector.load %arg10[%c3_59, %c1_60, %c0_61, %c0_62] : memref<4x4x4x128xf32, #tpu.memory_space<vmem>>, vector<1x1x4x128xf32>
      %49 = vector.shape_cast %48 : vector<1x1x4x128xf32> to vector<4x128xf32>
      %c3_63 = arith.constant 3 : index
      %c2_64 = arith.constant 2 : index
      %c0_65 = arith.constant 0 : index
      %c0_66 = arith.constant 0 : index
      %50 = vector.load %arg10[%c3_63, %c2_64, %c0_65, %c0_66] : memref<4x4x4x128xf32, #tpu.memory_space<vmem>>, vector<1x1x4x128xf32>
      %51 = vector.shape_cast %50 : vector<1x1x4x128xf32> to vector<4x128xf32>
      %c3_67 = arith.constant 3 : index
      %c3_68 = arith.constant 3 : index
      %c0_69 = arith.constant 0 : index
      %c0_70 = arith.constant 0 : index
      %52 = vector.load %arg10[%c3_67, %c3_68, %c0_69, %c0_70] : memref<4x4x4x128xf32, #tpu.memory_space<vmem>>, vector<1x1x4x128xf32>
      %53 = vector.shape_cast %52 : vector<1x1x4x128xf32> to vector<4x128xf32>
      %c0_71 = arith.constant 0 : index
      %c0_72 = arith.constant 0 : index
      %c0_73 = arith.constant 0 : index
      %54 = vector.load %arg11[%c0_71, %c0_72, %c0_73] : memref<4x4x128xf32, #tpu.memory_space<vmem>>, vector<1x4x128xf32>
      %55 = vector.shape_cast %54 : vector<1x4x128xf32> to vector<4x128xf32>
      %c1_74 = arith.constant 1 : index
      %c0_75 = arith.constant 0 : index
      %c0_76 = arith.constant 0 : index
      %56 = vector.load %arg11[%c1_74, %c0_75, %c0_76] : memref<4x4x128xf32, #tpu.memory_space<vmem>>, vector<1x4x128xf32>
      %57 = vector.shape_cast %56 : vector<1x4x128xf32> to vector<4x128xf32>
      %c2_77 = arith.constant 2 : index
      %c0_78 = arith.constant 0 : index
      %c0_79 = arith.constant 0 : index
      %58 = vector.load %arg11[%c2_77, %c0_78, %c0_79] : memref<4x4x128xf32, #tpu.memory_space<vmem>>, vector<1x4x128xf32>
      %59 = vector.shape_cast %58 : vector<1x4x128xf32> to vector<4x128xf32>
      %c3_80 = arith.constant 3 : index
      %c0_81 = arith.constant 0 : index
      %c0_82 = arith.constant 0 : index
      %60 = vector.load %arg11[%c3_80, %c0_81, %c0_82] : memref<4x4x128xf32, #tpu.memory_space<vmem>>, vector<1x4x128xf32>
      %61 = vector.shape_cast %60 : vector<1x4x128xf32> to vector<4x128xf32>
      %c0_i32_83 = arith.constant 0 : i32
      %62 = arith.addi %1, %c0_i32_83 : i32
      %c0_84 = arith.constant 0 : index
      %63 = arith.index_cast %62 : i32 to index
      %c0_85 = arith.constant 0 : index
      %c0_86 = arith.constant 0 : index
      %64 = vector.load %arg6[%c0_84, %63, %c0_85, %c0_86] : memref<4x1x4x128xf32, #tpu.memory_space<vmem>>, vector<1x1x4x128xf32>
      %65 = vector.shape_cast %64 : vector<1x1x4x128xf32> to vector<1x4x128xf32>
      %c1_87 = arith.constant 1 : index
      %66 = arith.index_cast %62 : i32 to index
      %c0_88 = arith.constant 0 : index
      %c0_89 = arith.constant 0 : index
      %67 = vector.load %arg6[%c1_87, %66, %c0_88, %c0_89] : memref<4x1x4x128xf32, #tpu.memory_space<vmem>>, vector<1x1x4x128xf32>
      %68 = vector.shape_cast %67 : vector<1x1x4x128xf32> to vector<1x4x128xf32>
      %c2_90 = arith.constant 2 : index
      %69 = arith.index_cast %62 : i32 to index
      %c0_91 = arith.constant 0 : index
      %c0_92 = arith.constant 0 : index
      %70 = vector.load %arg6[%c2_90, %69, %c0_91, %c0_92] : memref<4x1x4x128xf32, #tpu.memory_space<vmem>>, vector<1x1x4x128xf32>
      %71 = vector.shape_cast %70 : vector<1x1x4x128xf32> to vector<1x4x128xf32>
      %c3_93 = arith.constant 3 : index
      %72 = arith.index_cast %62 : i32 to index
      %c0_94 = arith.constant 0 : index
      %c0_95 = arith.constant 0 : index
      %73 = vector.load %arg6[%c3_93, %72, %c0_94, %c0_95] : memref<4x1x4x128xf32, #tpu.memory_space<vmem>>, vector<1x1x4x128xf32>
      %74 = vector.shape_cast %73 : vector<1x1x4x128xf32> to vector<1x4x128xf32>
      %75 = vector.shape_cast %23 : vector<4x128xf32> to vector<1x4x128xf32>
      %76 = arith.mulf %65, %75 : vector<1x4x128xf32>
      %77 = vector.shape_cast %55 : vector<4x128xf32> to vector<1x4x128xf32>
      %78 = arith.addf %76, %77 : vector<1x4x128xf32>
      %79 = vector.shape_cast %25 : vector<4x128xf32> to vector<1x4x128xf32>
      %80 = arith.mulf %68, %79 : vector<1x4x128xf32>
      %81 = arith.addf %78, %80 : vector<1x4x128xf32>
      %82 = vector.shape_cast %27 : vector<4x128xf32> to vector<1x4x128xf32>
      %83 = arith.mulf %71, %82 : vector<1x4x128xf32>
      %84 = arith.addf %81, %83 : vector<1x4x128xf32>
      %85 = vector.shape_cast %29 : vector<4x128xf32> to vector<1x4x128xf32>
      %86 = arith.mulf %74, %85 : vector<1x4x128xf32>
      %87 = arith.addf %84, %86 : vector<1x4x128xf32>
      %88 = vector.shape_cast %31 : vector<4x128xf32> to vector<1x4x128xf32>
      %89 = arith.mulf %65, %88 : vector<1x4x128xf32>
      %90 = vector.shape_cast %57 : vector<4x128xf32> to vector<1x4x128xf32>
      %91 = arith.addf %89, %90 : vector<1x4x128xf32>
      %92 = vector.shape_cast %33 : vector<4x128xf32> to vector<1x4x128xf32>
      %93 = arith.mulf %68, %92 : vector<1x4x128xf32>
      %94 = arith.addf %91, %93 : vector<1x4x128xf32>
      %95 = vector.shape_cast %35 : vector<4x128xf32> to vector<1x4x128xf32>
      %96 = arith.mulf %71, %95 : vector<1x4x128xf32>
      %97 = arith.addf %94, %96 : vector<1x4x128xf32>
      %98 = vector.shape_cast %37 : vector<4x128xf32> to vector<1x4x128xf32>
      %99 = arith.mulf %74, %98 : vector<1x4x128xf32>
      %100 = arith.addf %97, %99 : vector<1x4x128xf32>
      %101 = vector.shape_cast %39 : vector<4x128xf32> to vector<1x4x128xf32>
      %102 = arith.mulf %65, %101 : vector<1x4x128xf32>
      %103 = vector.shape_cast %59 : vector<4x128xf32> to vector<1x4x128xf32>
      %104 = arith.addf %102, %103 : vector<1x4x128xf32>
      %105 = vector.shape_cast %41 : vector<4x128xf32> to vector<1x4x128xf32>
      %106 = arith.mulf %68, %105 : vector<1x4x128xf32>
      %107 = arith.addf %104, %106 : vector<1x4x128xf32>
      %108 = vector.shape_cast %43 : vector<4x128xf32> to vector<1x4x128xf32>
      %109 = arith.mulf %71, %108 : vector<1x4x128xf32>
      %110 = arith.addf %107, %109 : vector<1x4x128xf32>
      %111 = vector.shape_cast %45 : vector<4x128xf32> to vector<1x4x128xf32>
      %112 = arith.mulf %74, %111 : vector<1x4x128xf32>
      %113 = arith.addf %110, %112 : vector<1x4x128xf32>
      %114 = vector.shape_cast %47 : vector<4x128xf32> to vector<1x4x128xf32>
      %115 = arith.mulf %65, %114 : vector<1x4x128xf32>
      %116 = vector.shape_cast %61 : vector<4x128xf32> to vector<1x4x128xf32>
      %117 = arith.addf %115, %116 : vector<1x4x128xf32>
      %118 = vector.shape_cast %49 : vector<4x128xf32> to vector<1x4x128xf32>
      %119 = arith.mulf %68, %118 : vector<1x4x128xf32>
      %120 = arith.addf %117, %119 : vector<1x4x128xf32>
      %121 = vector.shape_cast %51 : vector<4x128xf32> to vector<1x4x128xf32>
      %122 = arith.mulf %71, %121 : vector<1x4x128xf32>
      %123 = arith.addf %120, %122 : vector<1x4x128xf32>
      %124 = vector.shape_cast %53 : vector<4x128xf32> to vector<1x4x128xf32>
      %125 = arith.mulf %74, %124 : vector<1x4x128xf32>
      %126 = arith.addf %123, %125 : vector<1x4x128xf32>
      %c0_i32_96 = arith.constant 0 : i32
      %127 = arith.cmpi eq, %arg1, %c0_i32_96 : i32
      %c2_i32_97 = arith.constant 2 : i32
      %128 = arith.cmpi slt, %arg0, %c2_i32_97 : i32
      %129 = arith.andi %127, %128 : i1
      %130 = arith.extui %129 : i1 to i32
      %c0_i32_98 = arith.constant 0 : i32
      %131 = arith.cmpi ne, %130, %c0_i32_98 : i32
      scf.if %131 {
        %138 = vector.extract_strided_slice %87 {offsets = [0, 0, 0], sizes = [1, 1, 1], strides = [1, 1, 1]} : vector<1x4x128xf32> to vector<1x1x1xf32>
        %139 = vector.shape_cast %138 : vector<1x1x1xf32> to vector<1x1xf32>
        %140 = vector.shape_cast %139 : vector<1x1xf32> to vector<1x1xf32>
        %141 = vector.broadcast %140 : vector<1x1xf32> to vector<1x128xf32>
        %142 = vector.shape_cast %141 : vector<1x128xf32> to vector<1x128xf32>
        %143 = vector.broadcast %142 : vector<1x128xf32> to vector<4x128xf32>
        %c0_103 = arith.constant 0 : index
        %c0_104 = arith.constant 0 : index
        %c0_105 = arith.constant 0 : index
        %144 = vector.load %arg9[%c0_103, %c0_104, %c0_105] : memref<4x4x128xf32, #tpu.memory_space<vmem>>, vector<1x4x128xf32>
        %145 = vector.shape_cast %144 : vector<1x4x128xf32> to vector<4x128xf32>
        %146 = vector.shape_cast %143 : vector<4x128xf32> to vector<1x4x128xf32>
        tpu.vector_store %arg9[%c0_103, %c0_104, %c0_105], %146 {strides = array<i32>} : memref<4x4x128xf32, #tpu.memory_space<vmem>>, vector<1x4x128xf32>,
        %147 = vector.extract_strided_slice %100 {offsets = [0, 0, 0], sizes = [1, 1, 1], strides = [1, 1, 1]} : vector<1x4x128xf32> to vector<1x1x1xf32>
        %148 = vector.shape_cast %147 : vector<1x1x1xf32> to vector<1x1xf32>
        %149 = vector.shape_cast %148 : vector<1x1xf32> to vector<1x1xf32>
        %150 = vector.broadcast %149 : vector<1x1xf32> to vector<1x128xf32>
        %151 = vector.shape_cast %150 : vector<1x128xf32> to vector<1x128xf32>
        %152 = vector.broadcast %151 : vector<1x128xf32> to vector<4x128xf32>
        %c1_106 = arith.constant 1 : index
        %c0_107 = arith.constant 0 : index
        %c0_108 = arith.constant 0 : index
        %153 = vector.load %arg9[%c1_106, %c0_107, %c0_108] : memref<4x4x128xf32, #tpu.memory_space<vmem>>, vector<1x4x128xf32>
        %154 = vector.shape_cast %153 : vector<1x4x128xf32> to vector<4x128xf32>
        %155 = vector.shape_cast %152 : vector<4x128xf32> to vector<1x4x128xf32>
        tpu.vector_store %arg9[%c1_106, %c0_107, %c0_108], %155 {strides = array<i32>} : memref<4x4x128xf32, #tpu.memory_space<vmem>>, vector<1x4x128xf32>,
        %156 = vector.extract_strided_slice %113 {offsets = [0, 0, 0], sizes = [1, 1, 1], strides = [1, 1, 1]} : vector<1x4x128xf32> to vector<1x1x1xf32>
        %157 = vector.shape_cast %156 : vector<1x1x1xf32> to vector<1x1xf32>
        %158 = vector.shape_cast %157 : vector<1x1xf32> to vector<1x1xf32>
        %159 = vector.broadcast %158 : vector<1x1xf32> to vector<1x128xf32>
        %160 = vector.shape_cast %159 : vector<1x128xf32> to vector<1x128xf32>
        %161 = vector.broadcast %160 : vector<1x128xf32> to vector<4x128xf32>
        %c2_109 = arith.constant 2 : index
        %c0_110 = arith.constant 0 : index
        %c0_111 = arith.constant 0 : index
        %162 = vector.load %arg9[%c2_109, %c0_110, %c0_111] : memref<4x4x128xf32, #tpu.memory_space<vmem>>, vector<1x4x128xf32>
        %163 = vector.shape_cast %162 : vector<1x4x128xf32> to vector<4x128xf32>
        %164 = vector.shape_cast %161 : vector<4x128xf32> to vector<1x4x128xf32>
        tpu.vector_store %arg9[%c2_109, %c0_110, %c0_111], %164 {strides = array<i32>} : memref<4x4x128xf32, #tpu.memory_space<vmem>>, vector<1x4x128xf32>,
        %165 = vector.extract_strided_slice %126 {offsets = [0, 0, 0], sizes = [1, 1, 1], strides = [1, 1, 1]} : vector<1x4x128xf32> to vector<1x1x1xf32>
        %166 = vector.shape_cast %165 : vector<1x1x1xf32> to vector<1x1xf32>
        %167 = vector.shape_cast %166 : vector<1x1xf32> to vector<1x1xf32>
        %168 = vector.broadcast %167 : vector<1x1xf32> to vector<1x128xf32>
        %169 = vector.shape_cast %168 : vector<1x128xf32> to vector<1x128xf32>
        %170 = vector.broadcast %169 : vector<1x128xf32> to vector<4x128xf32>
        %c3_112 = arith.constant 3 : index
        %c0_113 = arith.constant 0 : index
        %c0_114 = arith.constant 0 : index
        %171 = vector.load %arg9[%c3_112, %c0_113, %c0_114] : memref<4x4x128xf32, #tpu.memory_space<vmem>>, vector<1x4x128xf32>
        %172 = vector.shape_cast %171 : vector<1x4x128xf32> to vector<4x128xf32>
        %173 = vector.shape_cast %170 : vector<4x128xf32> to vector<1x4x128xf32>
        tpu.vector_store %arg9[%c3_112, %c0_113, %c0_114], %173 {strides = array<i32>} : memref<4x4x128xf32, #tpu.memory_space<vmem>>, vector<1x4x128xf32>,
      } else {
      }
      %c2_i32_99 = arith.constant 2 : i32
      %132 = arith.cmpi slt, %arg0, %c2_i32_99 : i32
      %133 = arith.extui %132 : i1 to i32
      %c0_i32_100 = arith.constant 0 : i32
      %134 = arith.cmpi ne, %133, %c0_i32_100 : i32
      scf.if %134 {
        %c0_103 = arith.constant 0 : index
        %c0_104 = arith.constant 0 : index
        %c0_105 = arith.constant 0 : index
        %138 = vector.load %arg9[%c0_103, %c0_104, %c0_105] : memref<4x4x128xf32, #tpu.memory_space<vmem>>, vector<1x4x128xf32>
        %139 = vector.shape_cast %138 : vector<1x4x128xf32> to vector<4x128xf32>
        %140 = vector.shape_cast %139 : vector<4x128xf32> to vector<1x4x128xf32>
        %141 = arith.subf %87, %140 : vector<1x4x128xf32>
        %c0_106 = arith.constant 0 : index
        %c0_107 = arith.constant 0 : index
        %c0_108 = arith.constant 0 : index
        %142 = vector.load %arg7[%c0_106, %c0_107, %c0_108] : memref<4x4x128xf32, #tpu.memory_space<vmem>>, vector<1x4x128xf32>
        %143 = vector.shape_cast %142 : vector<1x4x128xf32> to vector<4x128xf32>
        %cst = arith.constant dense<0.000000e+00> : vector<4x128xf32>
        %144 = vector.multi_reduction <add>, %141, %cst [0] : vector<1x4x128xf32> to vector<4x128xf32>
        %145 = arith.addf %143, %144 : vector<4x128xf32>
        %c0_109 = arith.constant 0 : index
        %c0_110 = arith.constant 0 : index
        %c0_111 = arith.constant 0 : index
        %146 = vector.load %arg7[%c0_109, %c0_110, %c0_111] : memref<4x4x128xf32, #tpu.memory_space<vmem>>, vector<1x4x128xf32>
        %147 = vector.shape_cast %146 : vector<1x4x128xf32> to vector<4x128xf32>
        %148 = vector.shape_cast %145 : vector<4x128xf32> to vector<1x4x128xf32>
        tpu.vector_store %arg7[%c0_109, %c0_110, %c0_111], %148 {strides = array<i32>} : memref<4x4x128xf32, #tpu.memory_space<vmem>>, vector<1x4x128xf32>,
        %c0_112 = arith.constant 0 : index
        %c0_113 = arith.constant 0 : index
        %c0_114 = arith.constant 0 : index
        %149 = vector.load %arg8[%c0_112, %c0_113, %c0_114] : memref<4x4x128xf32, #tpu.memory_space<vmem>>, vector<1x4x128xf32>
        %150 = vector.shape_cast %149 : vector<1x4x128xf32> to vector<4x128xf32>
        %151 = arith.mulf %141, %141 : vector<1x4x128xf32>
        %cst_115 = arith.constant dense<0.000000e+00> : vector<4x128xf32>
        %152 = vector.multi_reduction <add>, %151, %cst_115 [0] : vector<1x4x128xf32> to vector<4x128xf32>
        %153 = arith.addf %150, %152 : vector<4x128xf32>
        %c0_116 = arith.constant 0 : index
        %c0_117 = arith.constant 0 : index
        %c0_118 = arith.constant 0 : index
        %154 = vector.load %arg8[%c0_116, %c0_117, %c0_118] : memref<4x4x128xf32, #tpu.memory_space<vmem>>, vector<1x4x128xf32>
        %155 = vector.shape_cast %154 : vector<1x4x128xf32> to vector<4x128xf32>
        %156 = vector.shape_cast %153 : vector<4x128xf32> to vector<1x4x128xf32>
        tpu.vector_store %arg8[%c0_116, %c0_117, %c0_118], %156 {strides = array<i32>} : memref<4x4x128xf32, #tpu.memory_space<vmem>>, vector<1x4x128xf32>,
        %c0_119 = arith.constant 0 : index
        %157 = arith.index_cast %62 : i32 to index
        %c0_120 = arith.constant 0 : index
        %c0_121 = arith.constant 0 : index
        %158 = vector.load %arg6[%c0_119, %157, %c0_120, %c0_121] : memref<4x1x4x128xf32, #tpu.memory_space<vmem>>, vector<1x1x4x128xf32>
        %159 = vector.shape_cast %158 : vector<1x1x4x128xf32> to vector<1x4x128xf32>
        %160 = vector.shape_cast %87 : vector<1x4x128xf32> to vector<1x1x4x128xf32>
        tpu.vector_store %arg6[%c0_119, %157, %c0_120, %c0_121], %160 {strides = array<i32>} : memref<4x1x4x128xf32, #tpu.memory_space<vmem>>, vector<1x1x4x128xf32>,
        %c1_122 = arith.constant 1 : index
        %c0_123 = arith.constant 0 : index
        %c0_124 = arith.constant 0 : index
        %161 = vector.load %arg9[%c1_122, %c0_123, %c0_124] : memref<4x4x128xf32, #tpu.memory_space<vmem>>, vector<1x4x128xf32>
        %162 = vector.shape_cast %161 : vector<1x4x128xf32> to vector<4x128xf32>
        %163 = vector.shape_cast %162 : vector<4x128xf32> to vector<1x4x128xf32>
        %164 = arith.subf %100, %163 : vector<1x4x128xf32>
        %c1_125 = arith.constant 1 : index
        %c0_126 = arith.constant 0 : index
        %c0_127 = arith.constant 0 : index
        %165 = vector.load %arg7[%c1_125, %c0_126, %c0_127] : memref<4x4x128xf32, #tpu.memory_space<vmem>>, vector<1x4x128xf32>
        %166 = vector.shape_cast %165 : vector<1x4x128xf32> to vector<4x128xf32>
        %cst_128 = arith.constant dense<0.000000e+00> : vector<4x128xf32>
        %167 = vector.multi_reduction <add>, %164, %cst_128 [0] : vector<1x4x128xf32> to vector<4x128xf32>
        %168 = arith.addf %166, %167 : vector<4x128xf32>
        %c1_129 = arith.constant 1 : index
        %c0_130 = arith.constant 0 : index
        %c0_131 = arith.constant 0 : index
        %169 = vector.load %arg7[%c1_129, %c0_130, %c0_131] : memref<4x4x128xf32, #tpu.memory_space<vmem>>, vector<1x4x128xf32>
        %170 = vector.shape_cast %169 : vector<1x4x128xf32> to vector<4x128xf32>
        %171 = vector.shape_cast %168 : vector<4x128xf32> to vector<1x4x128xf32>
        tpu.vector_store %arg7[%c1_129, %c0_130, %c0_131], %171 {strides = array<i32>} : memref<4x4x128xf32, #tpu.memory_space<vmem>>, vector<1x4x128xf32>,
        %c1_132 = arith.constant 1 : index
        %c0_133 = arith.constant 0 : index
        %c0_134 = arith.constant 0 : index
        %172 = vector.load %arg8[%c1_132, %c0_133, %c0_134] : memref<4x4x128xf32, #tpu.memory_space<vmem>>, vector<1x4x128xf32>
        %173 = vector.shape_cast %172 : vector<1x4x128xf32> to vector<4x128xf32>
        %174 = arith.mulf %164, %164 : vector<1x4x128xf32>
        %cst_135 = arith.constant dense<0.000000e+00> : vector<4x128xf32>
        %175 = vector.multi_reduction <add>, %174, %cst_135 [0] : vector<1x4x128xf32> to vector<4x128xf32>
        %176 = arith.addf %173, %175 : vector<4x128xf32>
        %c1_136 = arith.constant 1 : index
        %c0_137 = arith.constant 0 : index
        %c0_138 = arith.constant 0 : index
        %177 = vector.load %arg8[%c1_136, %c0_137, %c0_138] : memref<4x4x128xf32, #tpu.memory_space<vmem>>, vector<1x4x128xf32>
        %178 = vector.shape_cast %177 : vector<1x4x128xf32> to vector<4x128xf32>
        %179 = vector.shape_cast %176 : vector<4x128xf32> to vector<1x4x128xf32>
        tpu.vector_store %arg8[%c1_136, %c0_137, %c0_138], %179 {strides = array<i32>} : memref<4x4x128xf32, #tpu.memory_space<vmem>>, vector<1x4x128xf32>,
        %c1_139 = arith.constant 1 : index
        %180 = arith.index_cast %62 : i32 to index
        %c0_140 = arith.constant 0 : index
        %c0_141 = arith.constant 0 : index
        %181 = vector.load %arg6[%c1_139, %180, %c0_140, %c0_141] : memref<4x1x4x128xf32, #tpu.memory_space<vmem>>, vector<1x1x4x128xf32>
        %182 = vector.shape_cast %181 : vector<1x1x4x128xf32> to vector<1x4x128xf32>
        %183 = vector.shape_cast %100 : vector<1x4x128xf32> to vector<1x1x4x128xf32>
        tpu.vector_store %arg6[%c1_139, %180, %c0_140, %c0_141], %183 {strides = array<i32>} : memref<4x1x4x128xf32, #tpu.memory_space<vmem>>, vector<1x1x4x128xf32>,
        %c2_142 = arith.constant 2 : index
        %c0_143 = arith.constant 0 : index
        %c0_144 = arith.constant 0 : index
        %184 = vector.load %arg9[%c2_142, %c0_143, %c0_144] : memref<4x4x128xf32, #tpu.memory_space<vmem>>, vector<1x4x128xf32>
        %185 = vector.shape_cast %184 : vector<1x4x128xf32> to vector<4x128xf32>
        %186 = vector.shape_cast %185 : vector<4x128xf32> to vector<1x4x128xf32>
        %187 = arith.subf %113, %186 : vector<1x4x128xf32>
        %c2_145 = arith.constant 2 : index
        %c0_146 = arith.constant 0 : index
        %c0_147 = arith.constant 0 : index
        %188 = vector.load %arg7[%c2_145, %c0_146, %c0_147] : memref<4x4x128xf32, #tpu.memory_space<vmem>>, vector<1x4x128xf32>
        %189 = vector.shape_cast %188 : vector<1x4x128xf32> to vector<4x128xf32>
        %cst_148 = arith.constant dense<0.000000e+00> : vector<4x128xf32>
        %190 = vector.multi_reduction <add>, %187, %cst_148 [0] : vector<1x4x128xf32> to vector<4x128xf32>
        %191 = arith.addf %189, %190 : vector<4x128xf32>
        %c2_149 = arith.constant 2 : index
        %c0_150 = arith.constant 0 : index
        %c0_151 = arith.constant 0 : index
        %192 = vector.load %arg7[%c2_149, %c0_150, %c0_151] : memref<4x4x128xf32, #tpu.memory_space<vmem>>, vector<1x4x128xf32>
        %193 = vector.shape_cast %192 : vector<1x4x128xf32> to vector<4x128xf32>
        %194 = vector.shape_cast %191 : vector<4x128xf32> to vector<1x4x128xf32>
        tpu.vector_store %arg7[%c2_149, %c0_150, %c0_151], %194 {strides = array<i32>} : memref<4x4x128xf32, #tpu.memory_space<vmem>>, vector<1x4x128xf32>,
        %c2_152 = arith.constant 2 : index
        %c0_153 = arith.constant 0 : index
        %c0_154 = arith.constant 0 : index
        %195 = vector.load %arg8[%c2_152, %c0_153, %c0_154] : memref<4x4x128xf32, #tpu.memory_space<vmem>>, vector<1x4x128xf32>
        %196 = vector.shape_cast %195 : vector<1x4x128xf32> to vector<4x128xf32>
        %197 = arith.mulf %187, %187 : vector<1x4x128xf32>
        %cst_155 = arith.constant dense<0.000000e+00> : vector<4x128xf32>
        %198 = vector.multi_reduction <add>, %197, %cst_155 [0] : vector<1x4x128xf32> to vector<4x128xf32>
        %199 = arith.addf %196, %198 : vector<4x128xf32>
        %c2_156 = arith.constant 2 : index
        %c0_157 = arith.constant 0 : index
        %c0_158 = arith.constant 0 : index
        %200 = vector.load %arg8[%c2_156, %c0_157, %c0_158] : memref<4x4x128xf32, #tpu.memory_space<vmem>>, vector<1x4x128xf32>
        %201 = vector.shape_cast %200 : vector<1x4x128xf32> to vector<4x128xf32>
        %202 = vector.shape_cast %199 : vector<4x128xf32> to vector<1x4x128xf32>
        tpu.vector_store %arg8[%c2_156, %c0_157, %c0_158], %202 {strides = array<i32>} : memref<4x4x128xf32, #tpu.memory_space<vmem>>, vector<1x4x128xf32>,
        %c2_159 = arith.constant 2 : index
        %203 = arith.index_cast %62 : i32 to index
        %c0_160 = arith.constant 0 : index
        %c0_161 = arith.constant 0 : index
        %204 = vector.load %arg6[%c2_159, %203, %c0_160, %c0_161] : memref<4x1x4x128xf32, #tpu.memory_space<vmem>>, vector<1x1x4x128xf32>
        %205 = vector.shape_cast %204 : vector<1x1x4x128xf32> to vector<1x4x128xf32>
        %206 = vector.shape_cast %113 : vector<1x4x128xf32> to vector<1x1x4x128xf32>
        tpu.vector_store %arg6[%c2_159, %203, %c0_160, %c0_161], %206 {strides = array<i32>} : memref<4x1x4x128xf32, #tpu.memory_space<vmem>>, vector<1x1x4x128xf32>,
        %c3_162 = arith.constant 3 : index
        %c0_163 = arith.constant 0 : index
        %c0_164 = arith.constant 0 : index
        %207 = vector.load %arg9[%c3_162, %c0_163, %c0_164] : memref<4x4x128xf32, #tpu.memory_space<vmem>>, vector<1x4x128xf32>
        %208 = vector.shape_cast %207 : vector<1x4x128xf32> to vector<4x128xf32>
        %209 = vector.shape_cast %208 : vector<4x128xf32> to vector<1x4x128xf32>
        %210 = arith.subf %126, %209 : vector<1x4x128xf32>
        %c3_165 = arith.constant 3 : index
        %c0_166 = arith.constant 0 : index
        %c0_167 = arith.constant 0 : index
        %211 = vector.load %arg7[%c3_165, %c0_166, %c0_167] : memref<4x4x128xf32, #tpu.memory_space<vmem>>, vector<1x4x128xf32>
        %212 = vector.shape_cast %211 : vector<1x4x128xf32> to vector<4x128xf32>
        %cst_168 = arith.constant dense<0.000000e+00> : vector<4x128xf32>
        %213 = vector.multi_reduction <add>, %210, %cst_168 [0] : vector<1x4x128xf32> to vector<4x128xf32>
        %214 = arith.addf %212, %213 : vector<4x128xf32>
        %c3_169 = arith.constant 3 : index
        %c0_170 = arith.constant 0 : index
        %c0_171 = arith.constant 0 : index
        %215 = vector.load %arg7[%c3_169, %c0_170, %c0_171] : memref<4x4x128xf32, #tpu.memory_space<vmem>>, vector<1x4x128xf32>
        %216 = vector.shape_cast %215 : vector<1x4x128xf32> to vector<4x128xf32>
        %217 = vector.shape_cast %214 : vector<4x128xf32> to vector<1x4x128xf32>
        tpu.vector_store %arg7[%c3_169, %c0_170, %c0_171], %217 {strides = array<i32>} : memref<4x4x128xf32, #tpu.memory_space<vmem>>, vector<1x4x128xf32>,
        %c3_172 = arith.constant 3 : index
        %c0_173 = arith.constant 0 : index
        %c0_174 = arith.constant 0 : index
        %218 = vector.load %arg8[%c3_172, %c0_173, %c0_174] : memref<4x4x128xf32, #tpu.memory_space<vmem>>, vector<1x4x128xf32>
        %219 = vector.shape_cast %218 : vector<1x4x128xf32> to vector<4x128xf32>
        %220 = arith.mulf %210, %210 : vector<1x4x128xf32>
        %cst_175 = arith.constant dense<0.000000e+00> : vector<4x128xf32>
        %221 = vector.multi_reduction <add>, %220, %cst_175 [0] : vector<1x4x128xf32> to vector<4x128xf32>
        %222 = arith.addf %219, %221 : vector<4x128xf32>
        %c3_176 = arith.constant 3 : index
        %c0_177 = arith.constant 0 : index
        %c0_178 = arith.constant 0 : index
        %223 = vector.load %arg8[%c3_176, %c0_177, %c0_178] : memref<4x4x128xf32, #tpu.memory_space<vmem>>, vector<1x4x128xf32>
        %224 = vector.shape_cast %223 : vector<1x4x128xf32> to vector<4x128xf32>
        %225 = vector.shape_cast %222 : vector<4x128xf32> to vector<1x4x128xf32>
        tpu.vector_store %arg8[%c3_176, %c0_177, %c0_178], %225 {strides = array<i32>} : memref<4x4x128xf32, #tpu.memory_space<vmem>>, vector<1x4x128xf32>,
        %c3_179 = arith.constant 3 : index
        %226 = arith.index_cast %62 : i32 to index
        %c0_180 = arith.constant 0 : index
        %c0_181 = arith.constant 0 : index
        %227 = vector.load %arg6[%c3_179, %226, %c0_180, %c0_181] : memref<4x1x4x128xf32, #tpu.memory_space<vmem>>, vector<1x1x4x128xf32>
        %228 = vector.shape_cast %227 : vector<1x1x4x128xf32> to vector<1x4x128xf32>
        %229 = vector.shape_cast %126 : vector<1x4x128xf32> to vector<1x1x4x128xf32>
        tpu.vector_store %arg6[%c3_179, %226, %c0_180, %c0_181], %229 {strides = array<i32>} : memref<4x1x4x128xf32, #tpu.memory_space<vmem>>, vector<1x1x4x128xf32>,
      } else {
      }
      %c2_i32_101 = arith.constant 2 : i32
      %135 = arith.cmpi eq, %arg0, %c2_i32_101 : i32
      %136 = arith.extui %135 : i1 to i32
      %c0_i32_102 = arith.constant 0 : i32
      %137 = arith.cmpi ne, %136, %c0_i32_102 : i32
      scf.if %137 {
        %c0_103 = arith.constant 0 : index
        %c0_104 = arith.constant 0 : index
        %c0_105 = arith.constant 0 : index
        %c0_106 = arith.constant 0 : index
        %138 = vector.load %arg4[%c0_103, %c0_104, %c0_105, %c0_106] : memref<4x1x4x128xf32, #tpu.memory_space<vmem>>, vector<1x1x4x128xf32>
        %139 = vector.shape_cast %138 : vector<1x1x4x128xf32> to vector<1x4x128xf32>
        %140 = vector.shape_cast %87 : vector<1x4x128xf32> to vector<1x1x4x128xf32>
        tpu.vector_store %arg4[%c0_103, %c0_104, %c0_105, %c0_106], %140 {strides = array<i32>} : memref<4x1x4x128xf32, #tpu.memory_space<vmem>>, vector<1x1x4x128xf32>,
        %c1_107 = arith.constant 1 : index
        %c0_108 = arith.constant 0 : index
        %c0_109 = arith.constant 0 : index
        %c0_110 = arith.constant 0 : index
        %141 = vector.load %arg4[%c1_107, %c0_108, %c0_109, %c0_110] : memref<4x1x4x128xf32, #tpu.memory_space<vmem>>, vector<1x1x4x128xf32>
        %142 = vector.shape_cast %141 : vector<1x1x4x128xf32> to vector<1x4x128xf32>
        %143 = vector.shape_cast %100 : vector<1x4x128xf32> to vector<1x1x4x128xf32>
        tpu.vector_store %arg4[%c1_107, %c0_108, %c0_109, %c0_110], %143 {strides = array<i32>} : memref<4x1x4x128xf32, #tpu.memory_space<vmem>>, vector<1x1x4x128xf32>,
        %c2_111 = arith.constant 2 : index
        %c0_112 = arith.constant 0 : index
        %c0_113 = arith.constant 0 : index
        %c0_114 = arith.constant 0 : index
        %144 = vector.load %arg4[%c2_111, %c0_112, %c0_113, %c0_114] : memref<4x1x4x128xf32, #tpu.memory_space<vmem>>, vector<1x1x4x128xf32>
        %145 = vector.shape_cast %144 : vector<1x1x4x128xf32> to vector<1x4x128xf32>
        %146 = vector.shape_cast %113 : vector<1x4x128xf32> to vector<1x1x4x128xf32>
        tpu.vector_store %arg4[%c2_111, %c0_112, %c0_113, %c0_114], %146 {strides = array<i32>} : memref<4x1x4x128xf32, #tpu.memory_space<vmem>>, vector<1x1x4x128xf32>,
        %c3_115 = arith.constant 3 : index
        %c0_116 = arith.constant 0 : index
        %c0_117 = arith.constant 0 : index
        %c0_118 = arith.constant 0 : index
        %147 = vector.load %arg4[%c3_115, %c0_116, %c0_117, %c0_118] : memref<4x1x4x128xf32, #tpu.memory_space<vmem>>, vector<1x1x4x128xf32>
        %148 = vector.shape_cast %147 : vector<1x1x4x128xf32> to vector<1x4x128xf32>
        %149 = vector.shape_cast %126 : vector<1x4x128xf32> to vector<1x1x4x128xf32>
        tpu.vector_store %arg4[%c3_115, %c0_116, %c0_117, %c0_118], %149 {strides = array<i32>} : memref<4x1x4x128xf32, #tpu.memory_space<vmem>>, vector<1x1x4x128xf32>,
      } else {
      }
    } else {
    }
    %c2_i32 = arith.constant 2 : i32
    %13 = arith.cmpi eq, %arg0, %c2_i32 : i32
    %c0_i32_6 = arith.constant 0 : i32
    %14 = arith.cmpi eq, %arg1, %c0_i32_6 : i32
    %15 = arith.andi %13, %14 : i1
    %16 = arith.extui %15 : i1 to i32
    %c0_i32_7 = arith.constant 0 : i32
    %17 = arith.cmpi ne, %16, %c0_i32_7 : i32
    scf.if %17 {
      %c0 = arith.constant 0 : index
      %c0_8 = arith.constant 0 : index
      %18 = vector.load %arg12[%c0, %c0_8] : memref<1x1xf32, #tpu.memory_space<vmem>>, vector<1x1xf32>
      %c0_9 = arith.constant 0 : index
      %c0_10 = arith.constant 0 : index
      %19 = vector.load %arg5[%c0_9, %c0_10] : memref<1x1xf32, #tpu.memory_space<vmem>>, vector<1x1xf32>
      tpu.vector_store %arg5[%c0_9, %c0_10], %18 {strides = array<i32>} : memref<1x1xf32, #tpu.memory_space<vmem>>, vector<1x1xf32>,
    } else {
    }
    return
  }
  func.func @transform_0(%arg0: i32, %arg1: i32) -> (i32, i32, i32, i32) {
    %c0_i32 = arith.constant 0 : i32
    %0 = arith.cmpi eq, %arg0, %c0_i32 : i32
    %c0_i32_0 = arith.constant 0 : i32
    %1 = arith.select %0, %arg1, %c0_i32_0 : i32
    %c0_i32_1 = arith.constant 0 : i32
    %c0_i32_2 = arith.constant 0 : i32
    %c0_i32_3 = arith.constant 0 : i32
    %c0_i32_4 = arith.constant 0 : i32
    return %c0_i32_1, %1, %c0_i32_2, %c0_i32_3 : i32, i32, i32, i32
  }
  func.func @transform_1(%arg0: i32, %arg1: i32) -> (i32, i32, i32) {
    %c0_i32 = arith.constant 0 : i32
    %c0_i32_0 = arith.constant 0 : i32
    %c0_i32_1 = arith.constant 0 : i32
    %c0_i32_2 = arith.constant 0 : i32
    return %c0_i32, %c0_i32_0, %c0_i32_1 : i32, i32, i32
  }
  func.func @transform_2(%arg0: i32, %arg1: i32) -> (i32, i32, i32, i32) {
    %c2_i32 = arith.constant 2 : i32
    %0 = arith.cmpi eq, %arg0, %c2_i32 : i32
    %c0_i32 = arith.constant 0 : i32
    %1 = arith.select %0, %arg1, %c0_i32 : i32
    %c0_i32_0 = arith.constant 0 : i32
    %c0_i32_1 = arith.constant 0 : i32
    %c0_i32_2 = arith.constant 0 : i32
    %c0_i32_3 = arith.constant 0 : i32
    return %c0_i32_0, %1, %c0_i32_1, %c0_i32_2 : i32, i32, i32, i32
  }
  func.func @transform_3(%arg0: i32, %arg1: i32) -> (i32, i32) {
    %c0_i32 = arith.constant 0 : i32
    %c0_i32_0 = arith.constant 0 : i32
    %c0_i32_1 = arith.constant 0 : i32
    return %c0_i32, %c0_i32_0 : i32, i32
  }
}

</mosaic_0001>

<bundles_post_ra>
// kernel: tpu_custom_call.1
= control target key start
LH: loop header
LB: loop body
LE: loop exit
PB: predicated region body
PF: predicated region fallthrough
CT: control target
= control target key end

     0   :  { %9 = vsyncpa [#allocation10], 0  ;;  %s2037_s0 = inlined_call_operand.hbm [shape: f32[4,1,4,128], index: 0, kind: input, shape index: {}]   ;;  %s2038_s1 = inlined_call_operand.hbm [shape: f32[2,4,4], index: 1, kind: input, shape index: {}]   ;;  %s2039_s2 = inlined_call_operand.hbm [shape: f32[4,1,4,128], index: 2, kind: output, shape index: {0}]   ;;  %s2040_s3 = inlined_call_operand.hbm [shape: f32[1,1], index: 3, kind: output, shape index: {1}]  }
   0x1   :  { %11 = vsyncpa [#allocation10 + $0x1], 0 }
   0x2   :  { %12 = vsyncpa [#allocation13], 0 }
   0x3   :  { %13 = vsyncpa [#allocation11], 0 }
   0x4   :  { %15 = vsyncpa [#allocation11 + $0x1], 0 }
   0x5   :  { %16 = vsyncpa [#allocation16], 0  ;;  %s1726_s12 = smov 0   ;;  %s1728_s13 = smov 0  }
   0x6   :  { %s1730_s14 = smov 0  }
   0x7 LB: > { %s1331_s15 = sadd.s32 4294967295, %s1688_s14   ;;  %s1332_s16 = sadd.s32 4294967294, %s1688_s14   ;;  %s1688_s14 = sphi %s1730_s14, %s22_s14   ;;  %s1684_s13 = sphi %s1728_s13, %s2045_s13   ;;  %s1680_s12 = sphi %s1726_s12, %s2044_s12  }
   0x8   : > { %s34_s17 = sadd.s32 1, %s1684_s13  ;;  %p1333_p0 = scmp.ge.s32.totalorder %s1688_s14, 1 }
   0x9   : > { %p36_p1 = scmp.ge.s32.totalorder %s34_s17, 3  ;;  %p141_p2 = scmp.lt.s32.totalorder %s1688_s14, 4 }
   0xa   : > { %p1748_p3 = scmp.eq.s32.totalorder %s1331_s15, 0  ;;  %s152_s22 = sshll.u32 %s2038_s1, 4  ;;  %s153_s22 = int_to_ptr.hbm [resolvable:$true] %s152_s22 }
   0xb   : > { %s2047_s17 = smov (%p36_p1, %s34_s17), 0  ;;  %p1754_p4 = pnand %p1333_p0, %p141_p2 }
   0xc   : > { %s1690_s23 = smov [#allocation12]   ;;  %p1461_p7 = scmp.lt.s32.totalorder %s1688_s14, 3 }
   0xd   : > { %p1448_p5 = pneg %p1754_p4  ;;  %s154_s24 = sshll.u32 %s1690_s23, 4  ;;  %s155_s24 = int_to_ptr.vmem [resolvable:$true] %s154_s24 }
   0xe   : > { %s1691_s25 = smov 64   ;;  %s1692_s26 = smov 4  }
   0xf   : > { %p1449_p6 = pnand %p1748_p3, %p1448_p5  ;;  %p1462_p8 = scmp.eq.s32.totalorder %s1688_s14, 0 }
  0x10   : > { %s179_s29 = sshll.u32 %s2037_s0, 4  ;;  %s1693_s30 = smov [#allocation9]   ;;  %s180_s29 = int_to_ptr.hbm [resolvable:$true] %s179_s29 }
  0x11   : > { %1451 = dma.hbm_to_vmem [thread:$0]  (!%p1449_p6), %s153_s22, 128, %s155_s24, [#allocation13], %s1691_s25, %s1691_s25, %s1692_s26  }
  0x12   : > { %s181_s4 = sshll.u32 %s1693_s30, 4  ;;  %p1453_p9 = pnand %p1462_p8, %p1461_p7  ;;  %s182_s4 = int_to_ptr.vmem [resolvable:$true] %s181_s4 }
  0x13   : > { %193 = sbr.rel (%p1754_p4) target bundleno = 688 (0x2b0), region = 28 }
  0x14   : > { %1455 = dma.hbm_to_vmem [thread:$0]  (!%p1453_p9), %s180_s29, 256, %s182_s4, [#allocation10], %s1691_s25, %s1691_s25, %s1692_s26  }
  0x18   : > { %1663 = dma.done.wait (%p1748_p3), [#allocation10], 256  }
  0x19   : > { %1665 = vsyncadd (%p1748_p3), [#allocation10], 4294967040 }
  0x1a   : > { %1667 = dma.done.wait (%p1748_p3), [#allocation13], 128  }
  0x1b   : > { %1669 = vsyncadd (%p1748_p3), [#allocation13], 4294967168  ;;  %p232_p10 = scmp.eq.s32.totalorder %s1680_s12, 0 }
  0x1c   : > { %v1694_v0 = vmov (%p232_p10), 0.0   ;;  %vm246_vm0 = vcmask (%p232_p10), 0   ;;  %v248_v1 = vld [vmem:[#allocation9] sm:$0xf] (%p232_p10)  ;;  %v1341_v2 = vld [vmem:[#allocation9 + $0x4] sm:$0xf] (%p232_p10) }
  0x1d   : > { %237 = sbr.rel (!%p232_p10) target bundleno = 93 (0x5d), region = 40  ;;  %238 = vst [vmem:[#allocation3] sm:$0xf] (%p232_p10), %v1694_v0  ;;  %v1342_v3 = vld [vmem:[#allocation9 + $0x8] sm:$0xf] (%p232_p10) }
  0x1e   : > { %239 = vst [vmem:[#allocation3 + $0x4] sm:$0xf] (%p232_p10), %v1694_v0  ;;  %v1343_v4 = vld [vmem:[#allocation9 + $0xc] sm:$0xf] (%p232_p10) }
  0x1f   : > { %240 = vst [vmem:[#allocation3 + $0x8] sm:$0xf] (%p232_p10), %v1694_v0 }
  0x20   : > { %241 = vst [vmem:[#allocation3 + $0xc] sm:$0xf] (%p232_p10), %v1694_v0 }
  0x21   : > { %242 = vst [vmem:[#allocation4] sm:$0xf] (%p232_p10), %v1694_v0 }
  0x22   : > { %243 = vst [vmem:[#allocation4 + $0x4] sm:$0xf] %v1694_v0 }
  0x23   : > { %244 = vst [vmem:[#allocation4 + $0x8] sm:$0xf] %v1694_v0 }
  0x24   : > { %245 = vst [vmem:[#allocation4 + $0xc] sm:$0xf] %v1694_v0 }
  0x25   : > { %247 = vst.msk [vmem:[#allocation8] sm:$0x1] %vm246_vm0, %v1694_v0 }
  0x26   : > { %1376 = vpush %v248_v1 }
  0x27   : > { %1378 = vpush %v1341_v2 }
  0x28   : > { %1380 = vpush %v1342_v3 }
  0x29   : > { %1382 = vpush %v1343_v4 }
  0x57   : > { %s1377_s5 = spop %1376 }
  0x58   : > { %v251_v5 = vstv %s1377_s5  ;;  %s1379_s6 = spop %1378 }
  0x59   : > { %253 = vst [vmem:[#allocation5] sm:$0xf] %v251_v5  ;;  %v258_v6 = vstv %s1379_s6  ;;  %s1381_s7 = spop %1380 }
  0x5a   : > { %261 = vst [vmem:[#allocation5 + $0x4] sm:$0xf] %v258_v6  ;;  %v266_v7 = vstv %s1381_s7  ;;  %s1383_s8 = spop %1382 }
  0x5b   : > { %269 = vst [vmem:[#allocation5 + $0x8] sm:$0xf] %v266_v7  ;;  %v274_v8 = vstv %s1383_s8 }
  0x5c   : > { %277 = vst [vmem:[#allocation5 + $0xc] sm:$0xf] %v274_v8 }
  0x5d PF: > { %p1344_p11 = scmp.ne.s32.totalorder %s1680_s12, 0 }
  0x5f   : > { %280 = sbr.rel (%p1344_p11) target bundleno = 114 (0x72), region = 44 }
  0x64   : > { %v281_v9 = vld [vmem:[#allocation9] sm:$0xf]  ;;  %v288_v13 = vld [vmem:[#allocation4] sm:$0xf]  ;;  %v1345_v14 = vld [vmem:[#allocation9 + $0x4] sm:$0xf] }
  0x65   : > { %v282_v10 = vld [vmem:[#allocation5] sm:$0xf]  ;;  %295 = vst [vmem:[#allocation2] sm:$0xf] %v281_v9  ;;  %v299_v15 = vld [vmem:[#allocation5 + $0x4] sm:$0xf] }
  0x66   : > { %v284_v11 = vld [vmem:[#allocation3] sm:$0xf]  ;;  %v283_v12 = vsub.f32 %v281_v9, %v282_v10  ;;  %v302_v16 = vld [vmem:[#allocation3 + $0x4] sm:$0xf]  ;;  %1346 = vst [vmem:[#allocation2 + $0x4] sm:$0xf] %v1345_v14  ;;  %v300_v19 = vsub.f32 %v1345_v14, %v299_v15 }
  0x67   : > { %v307_v20 = vld [vmem:[#allocation4 + $0x4] sm:$0xf]  ;;  %v1347_v21 = vld [vmem:[#allocation9 + $0x8] sm:$0xf]  ;;  %v326_v25 = vld [vmem:[#allocation4 + $0x8] sm:$0xf] }
  0x68   : > { %v286_v17 = vadd.f32 %v284_v11, %v283_v12  ;;  %v289_v18 = vmul.f32 %v283_v12, %v283_v12  ;;  %v318_v22 = vld [vmem:[#allocation5 + $0x8] sm:$0xf]  ;;  %1348 = vst [vmem:[#allocation2 + $0x8] sm:$0xf] %v1347_v21  ;;  %v304_v27 = vadd.f32 %v302_v16, %v300_v19  ;;  %v308_v28 = vmul.f32 %v300_v19, %v300_v19  ;;  %v1349_v29 = vld [vmem:[#allocation9 + $0xc] sm:$0xf] }
  0x69   : > { %v319_v23 = vsub.f32 %v1347_v21, %v318_v22  ;;  %v321_v24 = vld [vmem:[#allocation3 + $0x8] sm:$0xf]  ;;  %v337_v30 = vld [vmem:[#allocation5 + $0xc] sm:$0xf]  ;;  %1350 = vst [vmem:[#allocation2 + $0xc] sm:$0xf] %v1349_v29 }
  0x6a   : > { %287 = vst [vmem:[#allocation3] sm:$0xf] %v286_v17  ;;  %v291_v26 = vadd.f32 %v289_v18, %v288_v13  ;;  %v338_v33 = vsub.f32 %v1349_v29, %v337_v30  ;;  %v340_v34 = vld [vmem:[#allocation3 + $0xc] sm:$0xf]  ;;  %v310_v35 = vadd.f32 %v308_v28, %v307_v20  ;;  %v345_v36 = vld [vmem:[#allocation4 + $0xc] sm:$0xf] }
  0x6b   : > { %v323_v31 = vadd.f32 %v321_v24, %v319_v23  ;;  %v327_v32 = vmul.f32 %v319_v23, %v319_v23  ;;  %305 = vst [vmem:[#allocation3 + $0x4] sm:$0xf] %v304_v27 }
  0x6c   : > { %292 = vst [vmem:[#allocation4] sm:$0xf] %v291_v26  ;;  %v342_v38 = vadd.f32 %v340_v34, %v338_v33  ;;  %v346_v39 = vmul.f32 %v338_v33, %v338_v33 }
  0x6d   : > { %v329_v37 = vadd.f32 %v327_v32, %v326_v25  ;;  %311 = vst [vmem:[#allocation4 + $0x4] sm:$0xf] %v310_v35 }
  0x6e   : > { %324 = vst [vmem:[#allocation3 + $0x8] sm:$0xf] %v323_v31  ;;  %v348_v40 = vadd.f32 %v346_v39, %v345_v36 }
  0x6f   : > { %330 = vst [vmem:[#allocation4 + $0x8] sm:$0xf] %v329_v37 }
  0x70   : > { %343 = vst [vmem:[#allocation3 + $0xc] sm:$0xf] %v342_v38 }
  0x71   : > { %349 = vst [vmem:[#allocation4 + $0xc] sm:$0xf] %v348_v40 }
  0x72 PF: > { %p1351_p12 = scmp.le.s32.totalorder %s1680_s12, 0 }
  0x73   : > { %s1696_s9 = smov (!%p1351_p12), 2   ;;  %s1697_s10 = smov (!%p1351_p12), 1  }
  0x74   : > { %356 = sbr.rel (%p1351_p12) target bundleno = 672 (0x2a0), region = 48  ;;  %s1698_s11 = smov (!%p1351_p12), 3  }
  0x75   : > { %s1352_s18 = sadd.s32 (!%p1351_p12), 4294967295, %s1680_s12  ;;  %s1699_s21 = smov (!%p1351_p12), 125  }
  0x76   : > { %s1353_s19 = sshll.u32 (!%p1351_p12), %s1352_s18, 2  ;;  %s1700_s22 = smov (!%p1351_p12), 126  }
  0x77   : > { %s362_s20 = scalar_lea.vmem (!%p1351_p12), [#allocation12], %s1353_s19  ;;  %s1701_s23 = smov (!%p1351_p12), 127  }
  0x78   : > { %p1068_p13 = scmp.lt.s32.totalorder (!%p1351_p12), %s1680_s12, 2 }
  0x79   : > { %v792_v41 = vld [vmem:[#allocation3 + $0xc] sm:$0xf]  ;;  %v636_v42 = vld [vmem:[#allocation3 + $0x8] sm:$0xf]  ;;  %v1695_v46 = vmov 0.0   ;;  %vm375_vm1 = vcmask 1040384  }
  0x7a   : > { %v794_v43 = vrot.slane %v792_v41, 1  ;;  %v797_v44 = vrot.slane %v792_v41, 2  ;;  %v800_v45 = vrot.slane %v792_v41, 3  ;;  %981 = vst [vmem:[#allocation3 + $0xc] sm:$0xf] %v1695_v46  ;;  %v638_v47 = vrot.slane %v636_v42, 1 }
  0x7b   : > { %v641_v48 = vrot.slane %v636_v42, 2  ;;  %v644_v49 = vrot.slane %v636_v42, 3  ;;  %980 = vst [vmem:[#allocation3 + $0x8] sm:$0xf] %v1695_v46  ;;  %v480_v50 = vld [vmem:[#allocation3 + $0x4] sm:$0xf] }
  0x7c   : > { %v796_v51 = vadd.f32 %v794_v43, %v792_v41  ;;  %v640_v52 = vadd.f32 %v638_v47, %v636_v42  ;;  %v482_v53 = vrot.slane %v480_v50, 1  ;;  %v485_v54 = vrot.slane %v480_v50, 2  ;;  %979 = vst [vmem:[#allocation3 + $0x4] sm:$0xf] %v1695_v46  ;;  %v807_v55 = vld [vmem:[#allocation4 + $0xc] sm:$0xf] }
  0x7d   : > { %v488_v56 = vrot.slane %v480_v50, 3  ;;  %v809_v57 = vrot.slane %v807_v55, 1  ;;  %v812_v58 = vrot.slane %v807_v55, 2  ;;  %985 = vst [vmem:[#allocation4 + $0xc] sm:$0xf] %v1695_v46  ;;  %v815_v62 = vrot.slane %v807_v55, 3 }
  0x7e   : > { %v799_v59 = vadd.f32 %v797_v44, %v796_v51  ;;  %v643_v60 = vadd.f32 %v641_v48, %v640_v52  ;;  %v484_v61 = vadd.f32 %v482_v53, %v480_v50  ;;  %v651_v63 = vld [vmem:[#allocation4 + $0x8] sm:$0xf]  ;;  %v495_v0 = vld [vmem:[#allocation4 + $0x4] sm:$0xf]  ;;  %v364_v9 = vld [vmem:[#allocation3] sm:$0xf] }
  0x7f   : > { %v811_v1 = vadd.f32 %v809_v57, %v807_v55  ;;  %v653_v2 = vrot.slane %v651_v63, 1  ;;  %v656_v3 = vrot.slane %v651_v63, 2  ;;  %v659_v4 = vrot.slane %v651_v63, 3  ;;  %984 = vst [vmem:[#allocation4 + $0x8] sm:$0xf] %v1695_v46 }
  0x80   : > { %v802_v5 = vadd.f32 %v800_v45, %v799_v59  ;;  %v646_v6 = vadd.f32 %v644_v49, %v643_v60  ;;  %v487_v7 = vadd.f32 %v485_v54, %v484_v61  ;;  %v497_v8 = vrot.slane %v495_v0, 1  ;;  %983 = vst [vmem:[#allocation4 + $0x4] sm:$0xf] %v1695_v46  ;;  %v379_v14 = vld [vmem:[#allocation4] sm:$0xf] }
  0x81   : > { %v814_v10 = vadd.f32 %v812_v58, %v811_v1  ;;  %v655_v11 = vadd.f32 %v653_v2, %v651_v63  ;;  %v500_v12 = vrot.slane %v495_v0, 2  ;;  %v503_v13 = vrot.slane %v495_v0, 3  ;;  %978 = vst [vmem:[#allocation3] sm:$0xf] %v1695_v46  ;;  %v666_v43 = vld [vmem:[#allocation5 + $0x8] sm:$0xf] }
  0x82   : > { %v803_v15 = vsel %vm375_vm1, %v802_v5, 0.0  ;;  %v647_v16 = vsel %vm375_vm1, %v646_v6, 0.0  ;;  %v490_v17 = vadd.f32 %v488_v56, %v487_v7  ;;  %v499_v18 = vadd.f32 %v497_v8, %v495_v0  ;;  %982 = vst [vmem:[#allocation4] sm:$0xf] %v1695_v46  ;;  %v510_v49 = vld [vmem:[#allocation5 + $0x4] sm:$0xf] }
  0x83   : > { %804 = vadd.xlane.f32.xlu2 %v803_v15  ;;  %648 = vadd.xlane.f32.xlu1 %v647_v16  ;;  %v658_v19 = vadd.f32 %v656_v3, %v655_v11  ;;  %v366_v20 = vrot.slane %v364_v9, 1  ;;  %v817_v22 = vadd.f32 %v815_v62, %v814_v10  ;;  %v381_v24 = vrot.slane %v379_v14, 1  ;;  %v822_v53 = vld [vmem:[#allocation5 + $0xc] sm:$0xf] }
  0x84   : > { %v491_v21 = vsel %vm375_vm1, %v490_v17, 0.0  ;;  %v502_v23 = vadd.f32 %v500_v12, %v499_v18  ;;  %v384_v26 = vrot.slane %v379_v14, 2  ;;  %v369_v29 = vrot.slane %v364_v9, 2 }
  0x85   : > { %492 = vadd.xlane.f32.xlu0 %v491_v21  ;;  %v661_v25 = vadd.f32 %v659_v4, %v658_v19  ;;  %v368_v28 = vadd.f32 %v366_v20, %v364_v9  ;;  %v383_v30 = vadd.f32 %v381_v24, %v379_v14  ;;  %v818_v31 = vsel %vm375_vm1, %v817_v22, 0.0 }
  0x86   : > { %v505_v27 = vadd.f32 %v503_v13, %v502_v23  ;;  %v387_v34 = vrot.slane %v379_v14, 3  ;;  %v372_v37 = vrot.slane %v364_v9, 3 }
  0x87   : > { %v662_v32 = vsel %vm375_vm1, %v661_v25, 0.0  ;;  %v386_v33 = vadd.f32 %v384_v26, %v383_v30  ;;  %v371_v36 = vadd.f32 %v369_v29, %v368_v28 }
  0x88   : > { %v506_v35 = vsel %vm375_vm1, %v505_v27, 0.0 }
  0x89   : > { %v389_v38 = vadd.f32 %v387_v34, %v386_v33  ;;  %v374_v39 = vadd.f32 %v372_v37, %v371_v36 }
  0x8b   : > { %819 = vadd.xlane.f32.xlu2 %v818_v31  ;;  %663 = vadd.xlane.f32.xlu1 %v662_v32  ;;  %v390_v40 = vsel %vm375_vm1, %v389_v38, 0.0  ;;  %v376_v41 = vsel %vm375_vm1, %v374_v39, 0.0 }
  0x8d   : > { %507 = vadd.xlane.f32.xlu0 %v506_v35 }
  0x93   : > { %391 = vadd.xlane.f32.xlu1 %v390_v40 }
  0x95   : > { %377 = vadd.xlane.f32.xlu0 %v376_v41 }
  0xf6   : > { %v805_v42 = vpop.xlane.xlu2 %804  ;;  %v649_v44 = vpop.xlane.xlu1 %648 }
  0xf7   : > { %v667_v45 = vmul.f32 0.001953125, %v649_v44  ;;  %v823_v47 = vmul.f32 0.001953125, %v805_v42 }
  0xf8   : > { %v493_v46 = vpop.xlane.xlu0 %492 }
  0xf9   : > { %v668_v48 = vadd.f32 %v667_v45, %v666_v43  ;;  %v511_v50 = vmul.f32 0.001953125, %v493_v46  ;;  %v826_v54 = vmul.f32 %v823_v47, %v823_v47  ;;  %v670_v58 = vmul.f32 %v667_v45, %v667_v45 }
  0xfa   : > { %v824_v62 = vadd.f32 %v823_v47, %v822_v53 }
  0xfb   : > { %v1791_v51 = vsub.f32 0.0, %v668_v48  ;;  %v512_v52 = vadd.f32 %v511_v50, %v510_v49  ;;  %v514_v59 = vmul.f32 %v511_v50, %v511_v50 }
  0xfc   : > { %v1801_v8 = vsub.f32 0.0, %v824_v62 }
  0xfd   : > { %715 = vrot.lane.b32.xlu0 %v1791_v51, %s1696_s9  ;;  %v548_v55 = vsub.f32 0.0, %v512_v52  ;;  %v781_v12 = vrot.slane %v1791_v51, 5  ;;  %v737_v16 = vrot.slane %v1791_v51, 7  ;;  %v759_v40 = vrot.slane %v1791_v51, 6 }
  0xfe   : > { %v820_v56 = vpop.xlane.xlu2 %819  ;;  %v664_v57 = vpop.xlane.xlu1 %663  ;;  %v915_v24 = vrot.slane %v1801_v8, 6  ;;  %v937_v31 = vrot.slane %v1801_v8, 5 }
  0xff   : > { %v825_v60 = vmul.f32 0.001953125, %v820_v56  ;;  %v669_v61 = vmul.f32 0.001953125, %v664_v57  ;;  %559 = vrot.lane.b32.xlu2 %v548_v55, %s1697_s10  ;;  %v625_v0 = vrot.slane %v548_v55, 5  ;;  %v603_v4 = vrot.slane %v548_v55, 6 }
 0x100   : > { %v508_v63 = vpop.xlane.xlu0 %507  ;;  %v581_v23 = vrot.slane %v548_v55, 7 }
 0x101   : > { %v827_v1 = vsub.f32 %v825_v60, %v826_v54  ;;  %v671_v2 = vsub.f32 %v669_v61, %v670_v58  ;;  %v513_v3 = vmul.f32 0.001953125, %v508_v63  ;;  %626 = vrot.lane.b32.xlu1 %v625_v0, %s1697_s10  ;;  %v893_v58 = vrot.slane %v1801_v8, 7 }
 0x103   : > { %v1797_v5 = vmax.f32 %v827_v1, 0.0  ;;  %v1799_v6 = vmax.f32 %v671_v2, 0.0  ;;  %v515_v7 = vsub.f32 %v513_v3, %v514_v59 }
 0x105   : > { %1510 = vrsqrt.f32 %v1797_v5  ;;  %604 = vrot.lane.b32.xlu0 %v603_v4, %s1697_s10  ;;  %v1806_v9 = vmax.f32 %v515_v7, 0.0  ;;  %vm836_vm2 = vcmp.eq.f32.partialorder %v1797_v5, inf  ;;  %vm838_vm3 = vcmp.eq.f32.partialorder %v1797_v5, 0.0 }
 0x106   : > { %1512 = vrsqrt.f32 %v1799_v6  ;;  %v392_v10 = vpop.xlane.xlu1 %391  ;;  %v839_v41 = vand.u32 2147483648, %v1797_v5  ;;  %vm680_vm4 = vcmp.eq.f32.partialorder %v1799_v6, inf  ;;  %v683_v45 = vand.u32 2147483648, %v1799_v6 }
 0x107   : > { %871 = vrot.lane.b32.xlu2 %v1801_v8, %s1698_s11  ;;  %1514 = vrsqrt.f32 %v1806_v9  ;;  %v396_v14 = vmul.f32 0.001953125, %v392_v10  ;;  %vm682_vm5 = vcmp.eq.f32.partialorder %v1799_v6, 0.0  ;;  %vm524_vm6 = vcmp.eq.f32.partialorder %v1806_v9, inf }
 0x108   : > { %v378_v11 = vpop.xlane.xlu0 %377  ;;  %v527_v56 = vand.u32 2147483648, %v1806_v9  ;;  %vm526_vm7 = vcmp.eq.f32.partialorder %v1806_v9, 0.0 }
 0x109   : > { %v1812_v13 = vmul.f32 0.001953125, %v378_v11  ;;  %782 = vrot.lane.b32.xlu1 %v781_v12, %s1696_s9 }
 0x10b   : > { %v1511_v15 = vpop.eup %1510  ;;  %v397_v19 = vmul.f32 %v1812_v13, %v1812_v13 }
 0x10c   : > { %v1513_v17 = vpop.eup %1512  ;;  %v830_v18 = vmul.f32 %v1511_v15, %v1797_v5 }
 0x10d   : > { %v674_v20 = vmul.f32 %v1513_v17, %v1799_v6  ;;  %738 = vrot.lane.b32.xlu0 %v737_v16, %s1696_s9  ;;  %v398_v22 = vsub.f32 %v396_v14, %v397_v19  ;;  %v1515_v25 = vpop.eup %1514 }
 0x10e   : > { %v831_v21 = vmul.f32 %v1511_v15, %v830_v18  ;;  %v518_v28 = vmul.f32 %v1515_v25, %v1806_v9 }
 0x10f   : > { %v675_v26 = vmul.f32 %v1513_v17, %v674_v20  ;;  %v1823_v29 = vmax.f32 %v398_v22, 0.0  ;;  %582 = vrot.lane.b32.xlu2 %v581_v23, %s1697_s10  ;;  %v1863_v20 = vld [vmem:[%s362_s20] sm:$0xf] }
 0x110   : > { %v832_v27 = vmul.f32 0.5, %v831_v21  ;;  %v519_v33 = vmul.f32 %v1515_v25, %v518_v28 }
 0x111   : > { %v676_v30 = vmul.f32 0.5, %v675_v26  ;;  %1516 = vrsqrt.f32 %v1823_v29  ;;  %916 = vrot.lane.b32.xlu1 %v915_v24, %s1698_s11  ;;  %vm407_vm8 = vcmp.eq.f32.partialorder %v1823_v29, inf  ;;  %v410_v0 = vand.u32 2147483648, %v1823_v29 }
 0x112   : > { %v833_v32 = vsub.f32 1.5, %v832_v27  ;;  %v520_v36 = vmul.f32 0.5, %v519_v33  ;;  %vm409_vm9 = vcmp.eq.f32.partialorder %v1823_v29, 0.0 }
 0x113   : > { %v677_v34 = vsub.f32 1.5, %v676_v30 }
 0x114   : > { %v834_v35 = vmul.f32 %v1511_v15, %v833_v32  ;;  %v521_v39 = vsub.f32 1.5, %v520_v36 }
 0x115   : > { %v678_v37 = vmul.f32 %v1513_v17, %v677_v34  ;;  %938 = vrot.lane.b32.xlu0 %v937_v31, %s1698_s11 }
 0x116   : > { %v835_v38 = vmul.f32 %v834_v35, %v1797_v5  ;;  %v522_v46 = vmul.f32 %v1515_v25, %v521_v39 }
 0x117   : > { %v679_v42 = vmul.f32 %v678_v37, %v1799_v6  ;;  %v1517_v43 = vpop.eup %1516  ;;  %760 = vrot.lane.b32.xlu2 %v759_v40, %s1696_s9 }
 0x118   : > { %v837_v44 = vsel %vm836_vm2, %v1797_v5, %v835_v38  ;;  %v401_v48 = vmul.f32 %v1517_v43, %v1823_v29  ;;  %v523_v50 = vmul.f32 %v522_v46, %v1806_v9 }
 0x119   : > { %v681_v47 = vsel %vm680_vm4, %v1799_v6, %v679_v42  ;;  %v840_v49 = vsel %vm838_vm3, %v839_v41, %v837_v44 }
 0x11a   : > { %v841_v51 = vadd.f32 1e-06, %v840_v49  ;;  %v684_v52 = vsel %vm682_vm5, %v683_v45, %v681_v47  ;;  %v402_v53 = vmul.f32 %v1517_v43, %v401_v48  ;;  %v525_v55 = vsel %vm524_vm6, %v1806_v9, %v523_v50 }
 0x11b   : > { %v685_v54 = vadd.f32 1e-06, %v684_v52  ;;  %v528_v59 = vsel %vm526_vm7, %v527_v56, %v525_v55 }
 0x11c   : > { %1518 = vrcp.f32 %v841_v51  ;;  %v403_v57 = vmul.f32 0.5, %v402_v53  ;;  %v1849_v61 = vadd.f32 1e-06, %v528_v59  ;;  %v851_v6 = vand.u32 2147483647, %v841_v51 }
 0x11d   : > { %1520 = vrcp.f32 %v685_v54  ;;  %v853_v8 = vand.u32 2147483648, %v841_v51  ;;  %v695_v10 = vand.u32 2147483647, %v685_v54  ;;  %v697_v15 = vand.u32 2147483648, %v685_v54 }
 0x11e   : > { %v404_v60 = vsub.f32 1.5, %v403_v57  ;;  %1522 = vrcp.f32 %v1849_v61  ;;  %vm847_vm11 = vweird.f32 %v841_v51  ;;  %vm852_vm13 = vcmp.eq.f32.partialorder %v851_v6, 8.507059e+37 }
 0x11f   : > { %894 = vrot.lane.b32.xlu2 %v893_v58, %s1698_s11  ;;  %vm691_vm14 = vweird.f32 %v685_v54  ;;  %v854_v21 = vor.u32 1.1754944e-38, %v853_v8  ;;  %vm696_vm0 = vcmp.eq.f32.partialorder %v695_v10, 8.507059e+37  ;;  %v698_v25 = vor.u32 1.1754944e-38, %v697_v15  ;;  %v393_v8 = vld [vmem:[#allocation5] sm:$0xf] }
 0x120   : > { %v405_v62 = vmul.f32 %v1517_v43, %v404_v60  ;;  %v539_v26 = vand.u32 2147483647, %v1849_v61  ;;  %v541_v27 = vand.u32 2147483648, %v1849_v61  ;;  %vm535_vm3 = vweird.f32 %v1849_v61 }
 0x122   : > { %v1519_v63 = vpop.eup %1518  ;;  %v406_v2 = vmul.f32 %v405_v62, %v1823_v29  ;;  %v542_v37 = vor.u32 1.1754944e-38, %v541_v27  ;;  %vm540_vm5 = vcmp.eq.f32.partialorder %v539_v26, 8.507059e+37 }
 0x123   : > { %v1521_v1 = vpop.eup %1520  ;;  %v843_v3 = vmul.f32 %v1519_v63, %v841_v51  ;;  %vm848_vm10 = vweird.f32 %v1519_v63 }
 0x124   : > { %v687_v4 = vmul.f32 %v1521_v1, %v685_v54  ;;  %v408_v7 = vsel %vm407_vm8, %v1823_v29, %v406_v2  ;;  %v1523_v12 = vpop.eup %1522  ;;  %vm692_vm12 = vweird.f32 %v1521_v1  ;;  %vm849_vm15 = vmor %vm847_vm11, %vm848_vm10  ;;  %vm976_vm10 = vcmask 0  }
 0x125   : > { %v844_v5 = vsub.f32 1.0, %v843_v3  ;;  %v411_v11 = vsel %vm409_vm9, %v410_v0, %v408_v7  ;;  %v531_v18 = vmul.f32 %v1523_v12, %v1849_v61  ;;  %vm693_vm1 = vmor %vm691_vm14, %vm692_vm12  ;;  %vm536_vm2 = vweird.f32 %v1523_v12 }
 0x126   : > { %v688_v9 = vsub.f32 1.0, %v687_v4  ;;  %v1859_v16 = vadd.f32 1e-06, %v411_v11  ;;  %vm537_vm4 = vmor %vm535_vm3, %vm536_vm2 }
 0x127   : > { %v845_v14 = vmul.f32 %v1519_v63, %v844_v5  ;;  %v532_v23 = vsub.f32 1.0, %v531_v18 }
 0x128   : > { %v689_v17 = vmul.f32 %v1521_v1, %v688_v9  ;;  %1524 = vrcp.f32 %v1859_v16  ;;  %vm418_vm6 = vweird.f32 %v1859_v16  ;;  %v422_v47 = vand.u32 2147483647, %v1859_v16 }
 0x129   : > { %v846_v19 = vadd.f32 %v1519_v63, %v845_v14  ;;  %v533_v30 = vmul.f32 %v1523_v12, %v532_v23  ;;  %v424_v48 = vand.u32 2147483648, %v1859_v16 }
 0x12a   : > { %v690_v22 = vadd.f32 %v1521_v1, %v689_v17  ;;  %vm423_vm9 = vcmp.eq.f32.partialorder %v422_v47, 8.507059e+37 }
 0x12b   : > { %v850_v24 = vsel %vm849_vm15, %v1519_v63, %v846_v19  ;;  %v534_v35 = vadd.f32 %v1523_v12, %v533_v30  ;;  %v425_v60 = vor.u32 1.1754944e-38, %v424_v48 }
 0x12c   : > { %v855_v28 = vsel %vm852_vm13, %v854_v21, %v850_v24  ;;  %v694_v29 = vsel %vm693_vm1, %v1521_v1, %v690_v22 }
 0x12d   : > { %v1868_v31 = vmul.f32 %v855_v28, %v1863_v20  ;;  %v699_v32 = vsel %vm696_vm0, %v698_v25, %v694_v29  ;;  %v881_v33 = vrot.slane %v855_v28, 7  ;;  %v538_v39 = vsel %vm537_vm4, %v1523_v12, %v534_v35  ;;  %v973_v29 = vld [vmem:[#allocation8] sm:$0x1] }
 0x12e   : > { %v1871_v34 = vmul.f32 %v699_v32, %v1863_v20  ;;  %v1525_v36 = vpop.eup %1524  ;;  %v543_v41 = vsel %vm540_vm5, %v542_v37, %v538_v39  ;;  %v903_v42 = vrot.slane %v855_v28, 6  ;;  %v725_v52 = vrot.slane %v699_v32, 7 }
 0x12f   : > { %863 = vrot.lane.b32.xlu2 %v1868_v31, %s1699_s21  ;;  %v1877_v38 = vmul.f32 %v881_v33, %v1863_v20  ;;  %v414_v40 = vmul.f32 %v1525_v36, %v1859_v16  ;;  %v1883_v43 = vmul.f32 %v543_v41, %v1863_v20  ;;  %v591_v44 = vrot.slane %v543_v41, 6 }
 0x130   : > { %707 = vrot.lane.b32.xlu0 %v1871_v34, %s1700_s22  ;;  %v569_v45 = vrot.slane %v543_v41, 7  ;;  %v613_v46 = vrot.slane %v543_v41, 5  ;;  %vm419_vm7 = vweird.f32 %v1525_v36  ;;  %v769_v53 = vrot.slane %v699_v32, 5 }
 0x131   : > { %551 = vrot.lane.b32.xlu1 %v1883_v43, %s1701_s23  ;;  %v1891_v49 = vmul.f32 %v591_v44, %v1863_v20  ;;  %v415_v51 = vsub.f32 1.0, %v414_v40  ;;  %v1897_v54 = vmul.f32 %v903_v42, %v1863_v20  ;;  %v925_v55 = vrot.slane %v855_v28, 5  ;;  %vm420_vm8 = vmor %vm418_vm6, %vm419_vm7 }
 0x132   : > { %v1894_v50 = vmul.f32 %v569_v45, %v1863_v20  ;;  %v1902_v58 = vmul.f32 %v613_v46, %v1863_v20  ;;  %v1912_v63 = vmul.f32 %v725_v52, %v1863_v20  ;;  %v747_v0 = vrot.slane %v699_v32, 6 }
 0x133   : > { %v595_v56 = vrot.slane %v1891_v49, 2  ;;  %v416_v59 = vmul.f32 %v1525_v36, %v415_v51  ;;  %v1907_v61 = vmul.f32 %v925_v55, %v1863_v20  ;;  %1526 = vlog2.f32 %v543_v41 }
 0x134   : > { %v573_v57 = vrot.slane %v1894_v50, 1  ;;  %v617_v1 = vrot.slane %v1902_v58, 3  ;;  %v1916_v2 = vmul.f32 %v769_v53, %v1863_v20  ;;  %1528 = vlog2.f32 %v699_v32 }
 0x135   : > { %v417_v62 = vadd.f32 %v1525_v36, %v416_v59  ;;  %v729_v5 = vrot.slane %v1912_v63, 1  ;;  %v1922_v7 = vmul.f32 %v747_v0, %v1863_v20  ;;  %v395_v12 = vadd.f32 %v1812_v13, %v393_v8 }
 0x136   : > { %v773_v6 = vrot.slane %v1916_v2, 3 }
 0x137   : > { %596 = vrot.lane.b32.xlu2 %v595_v56, %s1701_s23  ;;  %v421_v3 = vsel %vm420_vm8, %v1525_v36, %v417_v62  ;;  %v751_v14 = vrot.slane %v1922_v7, 2  ;;  %v430_v21 = vsub.f32 0.0, %v395_v12  ;;  %v907_v12 = vrot.slane %v1897_v54, 2 }
 0x138   : > { %574 = vrot.lane.b32.xlu0 %v573_v57, %s1701_s23  ;;  %v426_v4 = vsel %vm423_vm9, %v425_v60, %v421_v3 }
 0x139   : > { %618 = vrot.lane.b32.xlu1 %v617_v1, %s1701_s23  ;;  %1530 = vlog2.f32 %v426_v4  ;;  %v1527_v9 = vpop.eup %1526  ;;  %v431_v23 = vmul.f32 %v426_v4, %v1863_v20  ;;  %v439_v25 = vrot.slane %v426_v4, 7  ;;  %v453_v26 = vrot.slane %v426_v4, 6 }
 0x13a   : > { %1532 = vlog2.f32 %v855_v28  ;;  %v1529_v10 = vpop.eup %1528  ;;  %v546_v16 = vmul.f32 0.6931472, %v1527_v9  ;;  %v466_v27 = vrot.slane %v426_v4, 5  ;;  %v476_v36 = vrot.slane %v430_v21, 5 }
 0x13b   : > { %v702_v18 = vmul.f32 0.6931472, %v1529_v10  ;;  %1384 = vpush %v431_v23  ;;  %v441_v13 = vmul.f32 %v439_v25, %v1863_v20  ;;  %v455_v30 = vmul.f32 %v453_v26, %v1863_v20  ;;  %v1933_v35 = vmul.f32 %v431_v23, %v430_v21 }
 0x13c   : > { %v468_v32 = vmul.f32 %v466_v27, %v1863_v20  ;;  %v450_v37 = vrot.slane %v430_v21, 7  ;;  %v463_v39 = vrot.slane %v430_v21, 6  ;;  %v929_v10 = vrot.slane %v1907_v61, 3 }
 0x13d   : > { %v443_v45 = vrot.slane %v441_v13, 1  ;;  %v457_v46 = vrot.slane %v455_v30, 2 }
 0x13e   : > { %v1935_v41 = vmul.f32 %v476_v36, %v468_v32  ;;  %v1937_v42 = vmul.f32 %v450_v37, %v441_v13  ;;  %v1939_v44 = vmul.f32 %v463_v39, %v455_v30  ;;  %v470_v47 = vrot.slane %v468_v32, 3 }
 0x13f   : > { %730 = vrot.lane.b32.xlu2 %v729_v5, %s1700_s22  ;;  %v1531_v11 = vpop.eup %1530  ;;  %1386 = vpush %v443_v45 }
 0x140   : > { %774 = vrot.lane.b32.xlu0 %v773_v6, %s1700_s22  ;;  %v1533_v15 = vpop.eup %1532  ;;  %v429_v17 = vmul.f32 0.6931472, %v1531_v11  ;;  %1388 = vpush %v457_v46  ;;  %v885_v11 = vrot.slane %v1877_v38, 1 }
 0x141   : > { %752 = vrot.lane.b32.xlu1 %v751_v14, %s1700_s22  ;;  %v858_v22 = vmul.f32 0.6931472, %v1533_v15  ;;  %1390 = vpush %v470_v47 }
 0x142   : > { %v547_v19 = vadd.f32 %v546_v16, %v429_v17 }
 0x144   : > { %v703_v24 = vadd.f32 %v702_v18, %v547_v19 }
 0x146   : > { %v859_v28 = vadd.f32 %v858_v22, %v703_v24 }
 0x148   : > { %v974_v33 = vmul.f32 256.0, %v859_v28 }
 0x14a   : > { %v975_v40 = vadd.f32 %v974_v33, %v973_v29 }
 0x14c   : > { %977 = vst.msk [vmem:[#allocation8] sm:$0x1] %vm976_vm10, %v975_v40 }
 0x159   : > { %v560_v20 = vpop.permute.xlu2 %559 }
 0x15a   : > { %v562_v48 = vmul.f32 %v560_v20, %v1883_v43 }
 0x15c   : > { %564 = vrot.lane.b32.xlu1 %v562_v48, %s1701_s23 }
 0x161   : > { %v872_v51 = vpop.permute.xlu2 %871 }
 0x162   : > { %v874_v52 = vmul.f32 %v872_v51, %v1868_v31 }
 0x164   : > { %876 = vrot.lane.b32.xlu2 %v874_v52, %s1699_s21 }
 0x169   : > { %v583_v53 = vpop.permute.xlu2 %582 }
 0x16a   : > { %v585_v55 = vmul.f32 %v583_v53, %v1894_v50 }
 0x16c   : > { %587 = vrot.lane.b32.xlu1 %v585_v55, %s1701_s23  ;;  %s1385_s24 = spop %1384 }
 0x16d   : > { %v434_v50 = vstv %s1385_s24 }
 0x16e   : > { %436 = vst [vmem:[#allocation6] sm:$0xf] %v434_v50 }
 0x16f   : > { %v716_v56 = vpop.permute.xlu0 %715 }
 0x170   : > { %v718_v57 = vmul.f32 %v716_v56, %v1871_v34  ;;  %s1387_s25 = spop %1386 }
 0x171   : > { %v761_v62 = vpop.permute.xlu2 %760  ;;  %v445_v8 = vstv %s1387_s25  ;;  %s1389_s26 = spop %1388 }
 0x172   : > { %720 = vrot.lane.b32.xlu0 %v718_v57, %s1700_s22  ;;  %v763_v1 = vmul.f32 %v761_v62, %v1922_v7  ;;  %448 = vst [vmem:[#allocation6 + $0x10] sm:$0xf] %v445_v8  ;;  %s1391_s27 = spop %1390 }
 0x173   : > { %v627_v59 = vpop.permute.xlu1 %626  ;;  %v472_v9 = vstv %s1391_s27 }
 0x174   : > { %v629_v43 = vmul.f32 %v627_v59, %v1902_v58  ;;  %475 = vst [vmem:[#allocation6 + $0x30] sm:$0xf] %v472_v9  ;;  %v1354_v9 = vld [vmem:[#allocation2 + $0x4] sm:$0xf] }
 0x176   : > { %631 = vrot.lane.b32.xlu2 %v629_v43, %s1701_s23 }
 0x177   : > { %v605_v60 = vpop.permute.xlu0 %604 }
 0x178   : > { %v607_v31 = vmul.f32 %v605_v60, %v1891_v49 }
 0x179   : > { %v895_v4 = vpop.permute.xlu2 %894 }
 0x17a   : > { %609 = vrot.lane.b32.xlu0 %v607_v31, %s1701_s23  ;;  %v897_v5 = vmul.f32 %v895_v4, %v1877_v38 }
 0x17b   : > { %v783_v0 = vpop.permute.xlu1 %782 }
 0x17c   : > { %v785_v34 = vmul.f32 %v783_v0, %v1916_v2 }
 0x17e   : > { %765 = vrot.lane.b32.xlu2 %v763_v1, %s1700_s22  ;;  %787 = vrot.lane.b32.xlu1 %v785_v34, %s1700_s22 }
 0x17f   : > { %v739_v58 = vpop.permute.xlu0 %738 }
 0x180   : > { %v741_v3 = vmul.f32 %v739_v58, %v1912_v63  ;;  %v459_v63 = vstv %s1389_s26 }
 0x181   : > { %462 = vst [vmem:[#allocation6 + $0x20] sm:$0xf] %v459_v63 }
 0x182   : > { %743 = vrot.lane.b32.xlu0 %v741_v3, %s1700_s22 }
 0x183   : > { %v917_v49 = vpop.permute.xlu1 %916 }
 0x184   : > { %v919_v6 = vmul.f32 %v917_v49, %v1897_v54 }
 0x186   : > { %899 = vrot.lane.b32.xlu2 %v897_v5, %s1699_s21  ;;  %921 = vrot.lane.b32.xlu1 %v919_v6, %s1699_s21  ;;  %v986_v6 = vld [vmem:[#allocation6] sm:$0xf] }
 0x187   : > { %v939_v2 = vpop.permute.xlu0 %938 }
 0x188   : > { %v941_v7 = vmul.f32 %v939_v2, %v1907_v61  ;;  %v1026_v2 = vld [vmem:[#allocation2] sm:$0xf] }
 0x189   : > { %v864_v14 = vpop.permute.xlu2 %863  ;;  %v1002_v8 = vld [vmem:[#allocation6 + $0x20] sm:$0xf] }
 0x18a   : > { %943 = vrot.lane.b32.xlu0 %v941_v7, %s1699_s21  ;;  %v994_v7 = vld [vmem:[#allocation6 + $0x10] sm:$0xf] }
 0x18e   : > { %930 = vrot.lane.b32.xlu2 %v929_v10, %s1699_s21  ;;  %886 = vrot.lane.b32.xlu1 %v885_v11, %s1699_s21  ;;  %v1036_v10 = vmul.f32 %v1026_v2, %v986_v6  ;;  %v1010_v11 = vld [vmem:[#allocation6 + $0x30] sm:$0xf] }
 0x191   : > { %v597_v16 = vpop.permute.xlu2 %596 }
 0x192   : > { %908 = vrot.lane.b32.xlu0 %v907_v12, %s1699_s21 }
 0x199   : > { %v731_v38 = vpop.permute.xlu2 %730 }
 0x1a2   : > { %v708_v15 = vpop.permute.xlu0 %707 }
 0x1a3   : > { %v552_v17 = vpop.permute.xlu1 %551 }
 0x1a4   : > { %1392 = vpush %v552_v17 }
 0x1aa   : > { %v575_v18 = vpop.permute.xlu0 %574 }
 0x1ab   : > { %1394 = vpush %v575_v18  ;;  %v619_v61 = vpop.permute.xlu1 %618  ;;  %v1356_v18 = vld [vmem:[#allocation2 + $0xc] sm:$0xf] }
 0x1ac   : > { %1396 = vpush %v597_v16 }
 0x1ad   : > { %1398 = vpush %v619_v61 }
 0x1ae   : > { %1400 = vpush %v708_v15  ;;  %v1044_v15 = vmul.f32 %v1026_v2, %v994_v7 }
 0x1af   : > { %1402 = vpush %v731_v38  ;;  %v1052_v38 = vmul.f32 %v1026_v2, %v1002_v8 }
 0x1b2   : > { %v775_v19 = vpop.permute.xlu0 %774 }
 0x1b3   : > { %v753_v21 = vpop.permute.xlu1 %752 }
 0x1b4   : > { %1404 = vpush %v753_v21 }
 0x1b5   : > { %1406 = vpush %v775_v19 }
 0x1b6   : > { %1408 = vpush %v864_v14  ;;  %v1355_v14 = vld [vmem:[#allocation2 + $0x8] sm:$0xf] }
 0x1be   : > { %v877_v24 = vpop.permute.xlu2 %876 }
 0x1ce   : > { %v565_v25 = vpop.permute.xlu1 %564 }
 0x1cf   : > { %v567_v53 = vadd.f32 %v565_v25, %v1933_v35 }
 0x1d0   : > { %v632_v29 = vpop.permute.xlu2 %631 }
 0x1d1   : > { %v634_v55 = vadd.f32 %v632_v29, %v1935_v41 }
 0x1d5   : > { %s1393_s28 = spop %1392 }
 0x1d6   : > { %v554_v54 = vstv %s1393_s28 }
 0x1d7   : > { %557 = vst [vmem:[#allocation6 + $0x4] sm:$0xf] %v554_v54 }
 0x1d8   : > { %v766_v39 = vpop.permute.xlu2 %765 }
 0x1dc   : > { %s1395_s29 = spop %1394 }
 0x1dd   : > { %v577_v22 = vstv %s1395_s29  ;;  %s1397_s30 = spop %1396 }
 0x1de   : > { %580 = vst [vmem:[#allocation6 + $0x14] sm:$0xf] %v577_v22  ;;  %v599_v23 = vstv %s1397_s30  ;;  %s1399_s4 = spop %1398  ;;  %v588_v30 = vpop.permute.xlu1 %587  ;;  %v988_v63 = vld [vmem:[#allocation6 + $0x4] sm:$0xf] }
 0x1df   : > { %602 = vst [vmem:[#allocation6 + $0x24] sm:$0xf] %v599_v23  ;;  %v621_v26 = vstv %s1399_s4  ;;  %s1401_s5 = spop %1400  ;;  %v590_v20 = vadd.f32 %v588_v30, %v1937_v42  ;;  %v1038_v19 = vmul.f32 %v1354_v9, %v988_v63 }
 0x1e0   : > { %624 = vst [vmem:[#allocation6 + $0x34] sm:$0xf] %v621_v26  ;;  %v710_v27 = vstv %s1401_s5  ;;  %s1403_s6 = spop %1402  ;;  %v900_v47 = vpop.permute.xlu2 %899 }
 0x1e1   : > { %713 = vst [vmem:[#allocation6 + $0x8] sm:$0xf] %v710_v27  ;;  %v733_v28 = vstv %s1403_s6 }
 0x1e2   : > { %736 = vst [vmem:[#allocation6 + $0x18] sm:$0xf] %v733_v28 }
 0x1e4   : > { %v721_v13 = vpop.permute.xlu0 %720 }
 0x1e5   : > { %s1405_s7 = spop %1404  ;;  %v723_v56 = vadd.f32 %v721_v13, %v567_v53  ;;  %v996_v12 = vld [vmem:[#allocation6 + $0x14] sm:$0xf] }
 0x1e6   : > { %v755_v32 = vstv %s1405_s7  ;;  %s1407_s8 = spop %1406  ;;  %v1004_v16 = vld [vmem:[#allocation6 + $0x24] sm:$0xf]  ;;  %v1046_v25 = vmul.f32 %v1354_v9, %v996_v12 }
 0x1e7   : > { %758 = vst [vmem:[#allocation6 + $0x28] sm:$0xf] %v755_v32  ;;  %v777_v33 = vstv %s1407_s8  ;;  %s1409_s9 = spop %1408  ;;  %v879_v42 = vadd.f32 %v877_v24, %v723_v56  ;;  %v1012_v21 = vld [vmem:[#allocation6 + $0x34] sm:$0xf]  ;;  %v1060_v24 = vmul.f32 %v1026_v2, %v1010_v11  ;;  %v1054_v29 = vmul.f32 %v1354_v9, %v1004_v16 }
 0x1e8   : > { %780 = vst [vmem:[#allocation6 + $0x38] sm:$0xf] %v777_v33  ;;  %v866_v36 = vstv %s1409_s9  ;;  %v931_v0 = vpop.permute.xlu2 %930  ;;  %v990_v17 = vld [vmem:[#allocation6 + $0x8] sm:$0xf] }
 0x1e9   : > { %869 = vst [vmem:[#allocation6 + $0xc] sm:$0xf] %v866_v36  ;;  %v998_v54 = vld [vmem:[#allocation6 + $0x18] sm:$0xf]  ;;  %v1040_v30 = vmul.f32 %v1355_v14, %v990_v17 }
 0x1ec   : > { %v610_v37 = vpop.permute.xlu0 %609 }
 0x1ed   : > { %v612_v51 = vadd.f32 %v610_v37, %v1939_v44 }
 0x1ee   : > { %v1006_v26 = vld [vmem:[#allocation6 + $0x28] sm:$0xf] }
 0x1ef   : > { %v768_v57 = vadd.f32 %v766_v39, %v612_v51  ;;  %v1014_v32 = vld [vmem:[#allocation6 + $0x38] sm:$0xf] }
 0x1f0   : > { %v788_v40 = vpop.permute.xlu1 %787  ;;  %v992_v27 = vld [vmem:[#allocation6 + $0xc] sm:$0xf]  ;;  %v1064_v56 = vmul.f32 %v1355_v14, %v1014_v32 }
 0x1f1   : > { %v790_v43 = vadd.f32 %v788_v40, %v634_v55  ;;  %v1062_v40 = vmul.f32 %v1354_v9, %v1012_v21  ;;  %v1042_v51 = vmul.f32 %v1356_v18, %v992_v27 }
 0x1f4   : > { %v744_v45 = vpop.permute.xlu0 %743 }
 0x1f5   : > { %v746_v52 = vadd.f32 %v744_v45, %v590_v20  ;;  %v1048_v45 = vmul.f32 %v1355_v14, %v998_v54 }
 0x1f7   : > { %v902_v60 = vadd.f32 %v900_v47, %v746_v52 }
 0x1f8   : > { %v922_v46 = vpop.permute.xlu1 %921 }
 0x1f9   : > { %v924_v62 = vadd.f32 %v922_v46, %v768_v57  ;;  %v953_v1 = vrot.slane %v902_v60, 1 }
 0x1fb   : > { %v960_v44 = vrot.slane %v924_v62, 2 }
 0x1fc   : > { %v944_v48 = vpop.permute.xlu0 %943 }
 0x1fd   : > { %v946_v31 = vadd.f32 %v944_v48, %v790_v43  ;;  %v1056_v48 = vmul.f32 %v1355_v14, %v1006_v26 }
 0x1ff   : > { %v967_v34 = vrot.slane %v946_v31, 3 }
 0x200   : > { %v887_v59 = vpop.permute.xlu1 %886 }
 0x201   : > { %1410 = vpush %v887_v59 }
 0x204   : > { %v909_v50 = vpop.permute.xlu0 %908 }
 0x205   : > { %1412 = vpush %v909_v50 }
 0x206   : > { %1414 = vpush %v931_v0 }
 0x207   : > { %1416 = vpush %v879_v42 }
 0x208   : > { %1418 = vpush %v953_v1 }
 0x209   : > { %1420 = vpush %v960_v44 }
 0x20a   : > { %1422 = vpush %v967_v34 }
 0x232   : > { %s1411_s10 = spop %1410 }
 0x233   : > { %v889_v35 = vstv %s1411_s10 }
 0x234   : > { %892 = vst [vmem:[#allocation6 + $0x1c] sm:$0xf] %v889_v35 }
 0x236   : > { %s1413_s11 = spop %1412 }
 0x237   : > { %v911_v41 = vstv %s1413_s11  ;;  %s1415_s18 = spop %1414 }
 0x238   : > { %914 = vst [vmem:[#allocation6 + $0x2c] sm:$0xf] %v911_v41  ;;  %v933_v58 = vstv %s1415_s18  ;;  %s1417_s19 = spop %1416 }
 0x239   : > { %936 = vst [vmem:[#allocation6 + $0x3c] sm:$0xf] %v933_v58  ;;  %v949_v3 = vstv %s1417_s19  ;;  %s1419_s20 = spop %1418 }
 0x23a   : > { %951 = vst [vmem:[#allocation7] sm:$0xf] %v949_v3  ;;  %v955_v4 = vstv %s1419_s20  ;;  %s1421_s21 = spop %1420 }
 0x23b   : > { %958 = vst [vmem:[#allocation7 + $0x4] sm:$0xf] %v955_v4  ;;  %v962_v49 = vstv %s1421_s21  ;;  %s1423_s22 = spop %1422  ;;  %v1000_v33 = vld [vmem:[#allocation6 + $0x1c] sm:$0xf] }
 0x23c   : > { %965 = vst [vmem:[#allocation7 + $0x8] sm:$0xf] %v962_v49  ;;  %v969_v5 = vstv %s1423_s22  ;;  %v1050_v57 = vmul.f32 %v1356_v18, %v1000_v33 }
 0x23d   : > { %972 = vst [vmem:[#allocation7 + $0xc] sm:$0xf] %v969_v5 }
 0x23f   : > { %v1008_v46 = vld [vmem:[#allocation6 + $0x2c] sm:$0xf] }
 0x240   : > { %v1016_v52 = vld [vmem:[#allocation6 + $0x3c] sm:$0xf]  ;;  %v1058_v60 = vmul.f32 %v1356_v18, %v1008_v46 }
 0x241   : > { %v1017_v61 = vld [vmem:[#allocation7] sm:$0xf]  ;;  %v1066_v50 = vmul.f32 %v1356_v18, %v1016_v52 }
 0x242   : > { %v1037_v22 = vadd.f32 %v1036_v10, %v1017_v61  ;;  %v1019_v23 = vld [vmem:[#allocation7 + $0x4] sm:$0xf] }
 0x243   : > { %v1045_v28 = vadd.f32 %v1044_v15, %v1019_v23  ;;  %v1021_v13 = vld [vmem:[#allocation7 + $0x8] sm:$0xf] }
 0x244   : > { %v1039_v36 = vadd.f32 %v1038_v19, %v1037_v22  ;;  %v1053_v37 = vadd.f32 %v1052_v38, %v1021_v13  ;;  %v1023_v39 = vld [vmem:[#allocation7 + $0xc] sm:$0xf] }
 0x245   : > { %v1047_v47 = vadd.f32 %v1046_v25, %v1045_v28  ;;  %v1061_v20 = vadd.f32 %v1060_v24, %v1023_v39 }
 0x246   : > { %v1041_v53 = vadd.f32 %v1040_v30, %v1039_v36  ;;  %v1055_v55 = vadd.f32 %v1054_v29, %v1053_v37 }
 0x247   : > { %v1049_v59 = vadd.f32 %v1048_v45, %v1047_v47  ;;  %v1063_v43 = vadd.f32 %v1062_v40, %v1061_v20  ;;  %1072 = sbr.rel (!%p1068_p13) target bundleno = 641 (0x281), region = 56 }
 0x248   : > { %v1976_v62 = vadd.f32 %v1042_v51, %v1041_v53  ;;  %v1057_v31 = vadd.f32 %v1056_v48, %v1055_v55 }
 0x249   : > { %v1978_v0 = vadd.f32 %v1050_v57, %v1049_v59  ;;  %v1065_v42 = vadd.f32 %v1064_v56, %v1063_v43 }
 0x24a   : > { %v1980_v1 = vadd.f32 %v1058_v60, %v1057_v31  ;;  %1424 = vpush (%p1068_p13), %v1976_v62 }
 0x24b   : > { %v1982_v44 = vadd.f32 %v1066_v50, %v1065_v42  ;;  %1426 = vpush (%p1068_p13), %v1978_v0 }
 0x24c   : > { %1428 = vpush %v1980_v1 }
 0x24d   : > { %1430 = vpush %v1982_v44 }
 0x27b   : > { %s1425_s23 = spop %1424 }
 0x27c   : > { %v1075_v34 = vstv %s1425_s23  ;;  %s1427_s24 = spop %1426 }
 0x27d   : > { %1077 = vst [vmem:[#allocation5] sm:$0xf] %v1075_v34  ;;  %v1080_v35 = vstv %s1427_s24  ;;  %s1429_s25 = spop %1428 }
 0x27e   : > { %1083 = vst [vmem:[#allocation5 + $0x4] sm:$0xf] %v1080_v35  ;;  %v1086_v41 = vstv %s1429_s25  ;;  %s1431_s26 = spop %1430 }
 0x27f   : > { %1089 = vst [vmem:[#allocation5 + $0x8] sm:$0xf] %v1086_v41  ;;  %v1092_v58 = vstv %s1431_s26 }
 0x280   : > { %1095 = vst [vmem:[#allocation5 + $0xc] sm:$0xf] %v1092_v58 }
 0x281 PF: > { %p1358_p0 = scmp.ge.s32.totalorder %s1680_s12, 2 }
 0x283   : > { %1098 = sbr.rel (%p1358_p0) target bundleno = 661 (0x295), region = 60 }
 0x288   : > { %v1099_v3 = vld [vmem:[#allocation5] sm:$0xf]  ;;  %1110 = vst [vmem:[#allocation2] sm:$0xf] %v1976_v62  ;;  %v1112_v5 = vld [vmem:[#allocation5 + $0x4] sm:$0xf] }
 0x289   : > { %v1101_v4 = vld [vmem:[#allocation3] sm:$0xf]  ;;  %v1100_v49 = vsub.f32 %v1976_v62, %v1099_v3  ;;  %v1115_v6 = vld [vmem:[#allocation3 + $0x4] sm:$0xf]  ;;  %v1105_v2 = vld [vmem:[#allocation4] sm:$0xf]  ;;  %v1113_v7 = vsub.f32 %v1978_v0, %v1112_v5 }
 0x28a   : > { %1359 = vst [vmem:[#allocation2 + $0x4] sm:$0xf] %v1978_v0  ;;  %v1127_v8 = vld [vmem:[#allocation5 + $0x8] sm:$0xf]  ;;  %v1120_v10 = vld [vmem:[#allocation4 + $0x4] sm:$0xf] }
 0x28b   : > { %v1103_v63 = vadd.f32 %v1101_v4, %v1100_v49  ;;  %v1106_v9 = vmul.f32 %v1100_v49, %v1100_v49  ;;  %v1128_v11 = vsub.f32 %v1980_v1, %v1127_v8  ;;  %v1130_v12 = vld [vmem:[#allocation3 + $0x8] sm:$0xf]  ;;  %1360 = vst [vmem:[#allocation2 + $0x8] sm:$0xf] %v1980_v1  ;;  %v1117_v14 = vadd.f32 %v1115_v6, %v1113_v7  ;;  %v1135_v16 = vld [vmem:[#allocation4 + $0x8] sm:$0xf] }
 0x28c   : > { %v1121_v15 = vmul.f32 %v1113_v7, %v1113_v7  ;;  %v1142_v17 = vld [vmem:[#allocation5 + $0xc] sm:$0xf]  ;;  %v1150_v22 = vld [vmem:[#allocation4 + $0xc] sm:$0xf]  ;;  %1361 = vst [vmem:[#allocation2 + $0xc] sm:$0xf] %v1982_v44 }
 0x28d   : > { %v1145_v18 = vld [vmem:[#allocation3 + $0xc] sm:$0xf]  ;;  %1104 = vst [vmem:[#allocation3] sm:$0xf] %v1103_v63  ;;  %v1108_v61 = vadd.f32 %v1106_v9, %v1105_v2  ;;  %v1132_v38 = vadd.f32 %v1130_v12, %v1128_v11  ;;  %v1136_v19 = vmul.f32 %v1128_v11, %v1128_v11  ;;  %v1143_v21 = vsub.f32 %v1982_v44, %v1142_v17 }
 0x28e   : > { %1118 = vst [vmem:[#allocation3 + $0x4] sm:$0xf] %v1117_v14  ;;  %v1123_v54 = vadd.f32 %v1121_v15, %v1120_v10 }
 0x28f   : > { %1109 = vst [vmem:[#allocation4] sm:$0xf] %v1108_v61  ;;  %v1138_v23 = vadd.f32 %v1136_v19, %v1135_v16  ;;  %v1147_v24 = vadd.f32 %v1145_v18, %v1143_v21  ;;  %v1151_v25 = vmul.f32 %v1143_v21, %v1143_v21 }
 0x290   : > { %1124 = vst [vmem:[#allocation4 + $0x4] sm:$0xf] %v1123_v54 }
 0x291   : > { %1133 = vst [vmem:[#allocation3 + $0x8] sm:$0xf] %v1132_v38  ;;  %v1153_v26 = vadd.f32 %v1151_v25, %v1150_v22 }
 0x292   : > { %1139 = vst [vmem:[#allocation4 + $0x8] sm:$0xf] %v1138_v23 }
 0x293   : > { %1148 = vst [vmem:[#allocation3 + $0xc] sm:$0xf] %v1147_v24 }
 0x294   : > { %1154 = vst [vmem:[#allocation4 + $0xc] sm:$0xf] %v1153_v26 }
 0x295 PF: > { %p1362_p1 = scmp.ne.s32.totalorder %s1680_s12, 2 }
 0x297   : > { %1159 = sbr.rel (%p1362_p1) target bundleno = 672 (0x2a0), region = 64 }
 0x29c   : > { %1160 = vst [vmem:[#allocation14] sm:$0xf] %v1976_v62 }
 0x29d   : > { %1363 = vst [vmem:[#allocation14 + $0x4] sm:$0xf] %v1978_v0 }
 0x29e   : > { %1364 = vst [vmem:[#allocation14 + $0x8] sm:$0xf] %v1980_v1 }
 0x29f   : > { %1365 = vst [vmem:[#allocation14 + $0xc] sm:$0xf] %v1982_v44 }
 0x2a0 PF: > { %p1167_p2 = scmp.eq.s32.totalorder %s1680_s12, 2 }
 0x2a1   : > { %v1172_v27 = vld [vmem:[#allocation8] sm:$0x1] (%p1167_p2)  ;;  %vm1173_vm11 = vcmask (%p1167_p2), 0  }
 0x2a2   : > { %1171 = sbr.rel (!%p1167_p2) target bundleno = 679 (0x2a7), region = 68  ;;  %1174 = vst.msk [vmem:[#allocation15] sm:$0x1] (%p1167_p2), %vm1173_vm11, %v1172_v27 }
 0x2a7 PF: > { %p2007_p3 = scmp.eq.s32.totalorder %s1331_s15, 2  ;;  %s1191_s30 = sshll.u32 %s2039_s2, 4  ;;  %s1192_s30 = int_to_ptr.hbm [resolvable:$true] %s1191_s30 }
 0x2a8   : > { %s1702_s4 = smov [#allocation14]   ;;  %s1703_s5 = smov 64  }
 0x2a9   : > { %s1189_s12 = sshll.u32 %s1702_s4, 4  ;;  %s1704_s6 = smov 4   ;;  %s1190_s12 = int_to_ptr.vmem [resolvable:$true] %s1189_s12 }
 0x2aa   : > { %1441 = dma.vmem_to_hbm [thread:$0]  (%p2007_p3), %s1190_s12, 256, %s1192_s30, [#allocation11], %s1703_s5, %s1703_s5, %s1704_s6  }
 0x2ab   : > { %s1705_s7 = smov [#allocation15]   ;;  %s1206_s10 = sshll.u32 %s2040_s3, 4  ;;  %s1207_s10 = int_to_ptr.hbm [resolvable:$true] %s1206_s10 }
 0x2ac   : > { %s1204_s15 = sshll.u32 %s1705_s7, 4  ;;  %s1205_s15 = int_to_ptr.vmem [resolvable:$true] %s1204_s15 }
 0x2ad   : > { %1443 = dma.vmem_to_hbm [thread:$0]  (%p2007_p3), %s1205_s15, 16, %s1207_s10, [#allocation16]  }
 0x2ae   : > { %1671 = dma.done.wait (%p2007_p3), [#allocation16], 16  }
 0x2af   : > { %1673 = vsyncadd (%p2007_p3), [#allocation16], 4294967280 }
 0x2b0 PF: > { %p1468_p4 = scmp.ge.s32.totalorder %s1688_s14, 2  ;;  %p1469_p5 = scmp.eq.s32.totalorder %s1332_s16, 2 }
 0x2b2   : > { %p1457_p6 = pnand %p1469_p5, %p1468_p4 }
 0x2b4   : > { %p1458_p7 = pneg %p1457_p6 }
 0x2b6   : > { %1675 = dma.done.wait (%p1458_p7), [#allocation11], 256  }
 0x2b7   : > { %1677 = vsyncadd (%p1458_p7), [#allocation11], 4294967040  ;;  %s22_s14 = sadd.s32 1, %s1688_s14   ;;  %s2044_s12 = smov %s1684_s13 }
 0x2b8   : > { %p19_p8 = scmp.ge.s32.totalorder %s22_s14, 5   ;;  %s2045_s13 = smov %s2047_s17 }
 0x2ba   :  { %21 = sbr.rel (!%p19_p8) target bundleno = 7 (0x7), region = 204 }
 0x2bf   :  { %1230 = vsyncpa [#allocation10], 1 }
 0x2c0   :  { %1232 = vsyncpa [#allocation10 + $0x1], 1 }
 0x2c1   :  { %1233 = vsyncpa [#allocation13], 1 }
 0x2c2   :  { %1234 = vsyncpa [#allocation11], 1 }
 0x2c3   :  { %1236 = vsyncpa [#allocation11 + $0x1], 1 }
 0x2c4   :  { %1237 = vsyncpa [#allocation16], 1 }

</bundles_post_ra>
